<compile_context>
chip_gen: v5e
topology: v5e:2x2
jax: 0.10.0
libtpu: 0.0.40
codegen_flags: <defaults>
</compile_context>

<pallas_src>
import functools

import jax
import jax.numpy as jnp
from jax.experimental import pallas as pl
from jax.experimental.pallas import tpu as pltpu

NEG_SLOPE = 0.2                 # GATConv default negative_slope
LANE = 128                      # lane-dense feature padding
MAX_TILE = 1024                 # upper bound for dst/src node tiles
MASK_NEG = -(2.0 ** 100)        # large-negative mask, exactly representable in bf16 and f32


def _round_up(v, m):
    return (v + m - 1) // m * m


def _cdiv(a, b):
    return -(-a // b)


def _pick_tiles(n):
    """Adaptive node padding/tiling: tile <= MAX_TILE, >= 2 dst blocks when possible (v7x 2 TCs)."""
    n128 = _round_up(max(int(n), 1), LANE)
    nblk = _cdiv(n128, MAX_TILE)
    if n128 >= 2 * LANE:
        nblk = max(nblk, 2)      # give both v7x TensorCores dst work
    tile = _round_up(_cdiv(n128, nblk), LANE)
    return tile, nblk * tile


def _score_dtype_for_backend():
    """bf16 score math on v6e/v7x (bf16 VPU/EUP); keep f32 on v5e and older."""
    try:
        kind = jax.devices()[0].device_kind.lower()
    except Exception:
        return jnp.float32
    if any(tag in kind for tag in ("v2", "v3", "v4", "v5")):
        return jnp.float32
    return jnp.bfloat16


# ----------------------------------------------------------------- projection kernel
def _proj_kernel(x_ref, w_ref, asrc_ref, adst_ref, h_ref, as_ref, ad_ref, *, denom_col):
    # h = x @ W   (bf16 operands on the MXU, f32 accumulation)
    h = jnp.dot(x_ref[...], w_ref[...], preferred_element_type=jnp.float32)
    # Per-node attention logits (heads = 1): alpha = <h, a>.  Padded lanes of a are zero,
    # so the ones-lane inserted below cannot leak into these sums.
    as_ref[...] = jnp.sum(h * asrc_ref[...], axis=-1, keepdims=True)
    ad_ref[...] = jnp.sum(h * adst_ref[...], axis=-1, keepdims=True)
    # Plant a constant-1 lane in a spare padded column: the attention kernel's p @ h matmul
    # then yields the softmax denominator in that column for free on the MXU.
    col = jax.lax.broadcasted_iota(jnp.int32, h.shape, 1)
    h = jnp.where(col == denom_col, 1.0, h)
    h_ref[...] = h.astype(h_ref.dtype)


def gat_project(x, w, att_src, att_dst, *, tm, denom_col):
    n_pad, c_in_pad = x.shape
    c_op = w.shape[1]
    kernel = functools.partial(_proj_kernel, denom_col=denom_col)
    return pl.pallas_call(
        kernel,
        out_shape=(
            jax.ShapeDtypeStruct((n_pad, c_op), jnp.bfloat16),   # h (+ ones lane)
            jax.ShapeDtypeStruct((n_pad, 1), jnp.float32),       # alpha_src
            jax.ShapeDtypeStruct((n_pad, 1), jnp.float32),       # alpha_dst
        ),
        grid_spec=pltpu.PrefetchScalarGridSpec(
            num_scalar_prefetch=0,
            grid=(n_pad // tm,),
            in_specs=[
                pl.BlockSpec((tm, c_in_pad), lambda i: (i, 0)),
                pl.BlockSpec(w.shape, lambda i: (0, 0)),           # resident weight tile
                pl.BlockSpec(att_src.shape, lambda i: (0, 0)),
                pl.BlockSpec(att_dst.shape, lambda i: (0, 0)),
            ],
            out_specs=(
                pl.BlockSpec((tm, c_op), lambda i: (i, 0)),
                pl.BlockSpec((tm, 1), lambda i: (i, 0)),
                pl.BlockSpec((tm, 1), lambda i: (i, 0)),
            ),
        ),
        compiler_params=pltpu.CompilerParams(dimension_semantics=("parallel",)),
    )(x, w, att_src, att_dst)


# ------------------------------------------------------------------ attention kernel
def _attn_kernel(adst_ref, asrcr_ref, h_ref, adjb_ref, b_ref, o_ref,
                 m_sc, acc_sc, *, apply_elu, score_dtype, denom_col):
    kk = pl.program_id(1)

    @pl.when(kk == 0)
    def _():
        m_sc[...] = jnp.full(m_sc.shape, MASK_NEG, dtype=m_sc.dtype)
        acc_sc[...] = jnp.zeros(acc_sc.shape, dtype=acc_sc.dtype)

    # e[i,j] = LeakyReLU(alpha_dst[i] + alpha_src[j]) + log(edge multiplicity)  (MASK_NEG: no edge)
    adst = adst_ref[...].astype(score_dtype)                 # [tm, 1]
    asrc = asrcr_ref[...].astype(score_dtype)                # [1, tk]
    e = adst + asrc                                          # [tm, tk]
    e = jnp.maximum(e, NEG_SLOPE * e)                        # LeakyReLU with a single VALU op
    e = e + adjb_ref[...].astype(score_dtype)                # additive log-count / mask bias

    # Online (flash-style) softmax accumulation over src tiles.  The denominator rides along
    # in the ones-column of h, so no per-element row-sum is spent on the VPU/XLU.
    m_new = jnp.maximum(m_sc[...], jnp.max(e, axis=-1, keepdims=True).astype(jnp.float32))
    corr = jnp.exp(m_sc[...] - m_new)                        # [tm, 1] f32
    p = jnp.exp(e - m_new.astype(score_dtype))               # masked logits underflow to exactly 0
    acc_sc[...] = corr * acc_sc[...] + jnp.dot(
        p.astype(jnp.bfloat16), h_ref[...], preferred_element_type=jnp.float32)
    m_sc[...] = m_new

    @pl.when(kk == pl.num_programs(1) - 1)
    def _():
        acc = acc_sc[...]
        col = jax.lax.broadcasted_iota(jnp.int32, acc.shape, 1)
        denom = jnp.sum(jnp.where(col == denom_col, acc, 0.0), axis=-1, keepdims=True)
        # Deferred normalization: one EUP reciprocal per row instead of O(N^2) divides.
        out = acc * pl.reciprocal(denom, approx=True) + b_ref[...]
        if apply_elu:                                        # nn.ELU() between GAT layers
            out = jnp.where(out > 0, out, jnp.exp(out) - 1.0)
        o_ref[...] = out.astype(o_ref.dtype)


def gat_attention(alpha_dst, alpha_src_row, h, adj_bias, bias, *, apply_elu, score_dtype,
                  denom_col, out_dtype, tm, tk):
    n_pad, c_op = h.shape
    kernel = functools.partial(_attn_kernel, apply_elu=apply_elu, score_dtype=score_dtype,
                               denom_col=denom_col)
    return pl.pallas_call(
        kernel,
        out_shape=jax.ShapeDtypeStruct((n_pad, c_op), out_dtype),
        grid_spec=pltpu.PrefetchScalarGridSpec(
            num_scalar_prefetch=0,
            grid=(n_pad // tm, n_pad // tk),
            in_specs=[
                pl.BlockSpec((tm, 1), lambda i, k: (i, 0)),        # alpha_dst column tile
                pl.BlockSpec((1, tk), lambda i, k: (0, k)),        # alpha_src row tile
                pl.BlockSpec((tk, c_op), lambda i, k: (k, 0)),     # h src tile (bf16, + ones lane)
                pl.BlockSpec((tm, tk), lambda i, k: (i, k)),       # additive mask tile (bf16)
                pl.BlockSpec(bias.shape, lambda i, k: (0, 0)),     # bias (resident)
            ],
            out_specs=pl.BlockSpec((tm, c_op), lambda i, k: (i, 0)),
            scratch_shapes=[
                pltpu.VMEM((tm, 1), jnp.float32),                  # running max
                pltpu.VMEM((tm, c_op), jnp.float32),               # running numerator (+denominator lane)
            ],
        ),
        compiler_params=pltpu.CompilerParams(
            dimension_semantics=("parallel", "arbitrary")),
        # TODO(synk): on v5e, if profiling shows exposed adj/h DMA, add
        # pipeline_mode=pl.Buffered(3) to the adj/h in_specs.
    )(alpha_dst, alpha_src_row, h, adj_bias, bias)


# -------------------------------------------------------------------------- wrapper
def init_gat_params(key, c_in, c_out):
    """Deterministic glorot-uniform init matching GATConv parameter shapes (heads=1)."""
    k1, k2, k3 = jax.random.split(key, 3)
    lim_w = (6.0 / (c_in + c_out)) ** 0.5
    w = jax.random.uniform(k1, (c_in, c_out), jnp.float32, -lim_w, lim_w)
    lim_a = (6.0 / (1 + c_out)) ** 0.5
    a_src = jax.random.uniform(k2, (1, c_out), jnp.float32, -lim_a, lim_a)
    a_dst = jax.random.uniform(k3, (1, c_out), jnp.float32, -lim_a, lim_a)
    b = jnp.zeros((1, c_out), jnp.float32)
    return dict(w=w, a_src=a_src, a_dst=a_dst, b=b)


def _pad2(a, rows, cols):
    return jnp.zeros((rows, cols), a.dtype).at[: a.shape[0], : a.shape[1]].set(a)


def pyg_gnn_forward(params, x, edge_index):
    """Mirrors pyg_GNNModel.forward: (GATConv -> ELU -> Dropout) x2 -> GATConv (eval mode)."""
    n, c_in = x.shape
    tile, n_pad = _pick_tiles(n)
    tm = tk = tile
    c_in_pad = _round_up(c_in, LANE)
    score_dtype = _score_dtype_for_backend()

    # Additive attention-mask adjacency (dst rows, src cols), bf16:
    #   log(#edges j->i) for non-self edges (duplicates counted separately, as in PyG's softmax),
    #   0 for the single re-added self loop (GATConv: remove_self_loops + add_self_loops),
    #   MASK_NEG where no edge exists.
    src, dst = edge_index[0], edge_index[1]
    notself = (src != dst).astype(jnp.float32)
    cnt = jnp.zeros((n_pad, n_pad), jnp.float32).at[dst, src].add(notself)
    idx = jnp.arange(n)
    cnt = cnt.at[idx, idx].set(1.0)
    adj_bias = jnp.where(cnt > 0, jnp.log(jnp.maximum(cnt, 1.0)), MASK_NEG).astype(jnp.bfloat16)

    h = _pad2(x, n_pad, c_in_pad).astype(jnp.bfloat16)
    n_layers = len(params)
    for li, p in enumerate(params):
        c_o = p["w"].shape[1]
        c_op = _round_up(c_o + 1, LANE)    # +1 spare lane for the softmax-denominator column
        denom_col = c_o
        # Zero-padded parameters (padding lanes stay exactly zero -> results unchanged).
        w_pad = _pad2(p["w"], h.shape[1], c_op).astype(jnp.bfloat16)
        asrc_pad = _pad2(p["a_src"], 1, c_op)
        adst_pad = _pad2(p["a_dst"], 1, c_op)
        b_pad = _pad2(p["b"], 1, c_op)

        hp, a_s, a_d = gat_project(h, w_pad, asrc_pad, adst_pad, tm=tm, denom_col=denom_col)
        # [n_pad,1] -> [1,n_pad] is a free relayout at the HBM level (identical linear layout).
        a_s_row = a_s.reshape(1, n_pad)
        last = li == n_layers - 1
        h = gat_attention(a_d, a_s_row, hp, adj_bias, b_pad,
                          apply_elu=not last, score_dtype=score_dtype, denom_col=denom_col,
                          out_dtype=jnp.float32 if last else jnp.bfloat16, tm=tm, tk=tk)
        # TODO(synk): nn.Dropout(0.6) and GATConv's attention dropout are train-mode
        # stochastic ops; identity in eval mode, therefore omitted here.

    c_out_final = params[-1]["w"].shape[1]
    return h[:n, :c_out_final]


if __name__ == "__main__":
    key = jax.random.PRNGKey(0)
    kx, ke, kp = jax.random.split(key, 3)

    N, C_IN, C_HIDDEN, C_OUT, NUM_LAYERS = 16, 8, 16, 4, 3

    # Node features and a small random directed edge list (PyG notation [2, E]: row0=src, row1=dst).
    x = jax.random.normal(kx, (N, C_IN), dtype=jnp.float32)
    E = 40
    src = jax.random.randint(ke, (E,), 0, N)
    dst = jax.random.randint(jax.random.fold_in(ke, 1), (E,), 0, N)
    edge_index = jnp.stack([src, dst], axis=0)

    # Layer parameters: (C_IN->16), (16->16), (16->C_OUT), heads=1.
    params = []
    keys = jax.random.split(kp, NUM_LAYERS)
    in_c = C_IN
    for l in range(NUM_LAYERS - 1):
        params.append(init_gat_params(keys[l], in_c, C_HIDDEN))
        in_c = C_HIDDEN
    params.append(init_gat_params(keys[-1], in_c, C_OUT))

    fwd = jax.jit(pyg_gnn_forward)
    out = fwd(params, x, edge_index)
    jax.block_until_ready(out)
    assert out.shape == (N, C_OUT) and out.dtype == jnp.float32
    assert bool(jnp.all(jnp.isfinite(out)))
    print("KERNEL_OK")
</pallas_src>

<mosaic_0001>
module attributes {stable_mosaic.version = 11 : i64} {
  func.func @_proj_kernel(%arg0: i32, %arg1: memref<128x128xbf16, #tpu.memory_space<vmem>>, %arg2: memref<128x128xbf16, #tpu.memory_space<vmem>>, %arg3: memref<1x128xf32, #tpu.memory_space<vmem>>, %arg4: memref<1x128xf32, #tpu.memory_space<vmem>>, %arg5: memref<128x128xbf16, #tpu.memory_space<vmem>>, %arg6: memref<128x1xf32, #tpu.memory_space<vmem>>, %arg7: memref<128x1xf32, #tpu.memory_space<vmem>>) attributes {dimension_semantics = [#tpu.dimension_semantics<parallel>], iteration_bounds = array<i64: 1>, scalar_prefetch = 0 : i64, scratch_operands = 0 : i64, tpu.core_type = #tpu.core_type<tc>, window_params = [{transform_indices = @transform_0, window_bounds = array<i64: 128, 128>}, {pipeline_mode = #tpu.pipeline_mode<synchronous>, transform_indices = @transform_1, window_bounds = array<i64: 128, 128>}, {pipeline_mode = #tpu.pipeline_mode<synchronous>, transform_indices = @transform_2, window_bounds = array<i64: 1, 128>}, {pipeline_mode = #tpu.pipeline_mode<synchronous>, transform_indices = @transform_3, window_bounds = array<i64: 1, 128>}, {transform_indices = @transform_4, window_bounds = array<i64: 128, 128>}, {transform_indices = @transform_5, window_bounds = array<i64: 128, 1>}, {transform_indices = @transform_6, window_bounds = array<i64: 128, 1>}]} {
    %c0 = arith.constant 0 : index
    %c0_0 = arith.constant 0 : index
    %0 = vector.load %arg1[%c0, %c0_0] : memref<128x128xbf16, #tpu.memory_space<vmem>>, vector<128x128xbf16>
    %c0_1 = arith.constant 0 : index
    %c0_2 = arith.constant 0 : index
    %1 = vector.load %arg2[%c0_1, %c0_2] : memref<128x128xbf16, #tpu.memory_space<vmem>>, vector<128x128xbf16>
    %cst = arith.constant dense<0.000000e+00> : vector<128x128xf32>
    %2 = tpu.matmul %0, %1, %cst {dimension_numbers = #tpu.dot_dimension_numbers<[1], [0], [0], [1], [0, 0, 1, 1], [], []>} : vector<128x128xbf16>, vector<128x128xbf16>, vector<128x128xf32> -> vector<128x128xf32>
    %c0_3 = arith.constant 0 : index
    %c0_4 = arith.constant 0 : index
    %3 = vector.load %arg3[%c0_3, %c0_4] : memref<1x128xf32, #tpu.memory_space<vmem>>, vector<1x128xf32>
    %4 = vector.broadcast %3 : vector<1x128xf32> to vector<128x128xf32>
    %5 = arith.mulf %2, %4 : vector<128x128xf32>
    %cst_5 = arith.constant dense<0.000000e+00> : vector<128xf32>
    %6 = vector.multi_reduction <add>, %5, %cst_5 [1] : vector<128x128xf32> to vector<128xf32>
    %7 = vector.shape_cast %6 : vector<128xf32> to vector<128x1xf32>
    %c0_6 = arith.constant 0 : index
    %c0_7 = arith.constant 0 : index
    %8 = vector.load %arg6[%c0_6, %c0_7] : memref<128x1xf32, #tpu.memory_space<vmem>>, vector<128x1xf32>
    tpu.vector_store %arg6[%c0_6, %c0_7], %7 {strides = array<i32>} : memref<128x1xf32, #tpu.memory_space<vmem>>, vector<128x1xf32>,
    %c0_8 = arith.constant 0 : index
    %c0_9 = arith.constant 0 : index
    %9 = vector.load %arg4[%c0_8, %c0_9] : memref<1x128xf32, #tpu.memory_space<vmem>>, vector<1x128xf32>
    %10 = vector.broadcast %9 : vector<1x128xf32> to vector<128x128xf32>
    %11 = arith.mulf %2, %10 : vector<128x128xf32>
    %cst_10 = arith.constant dense<0.000000e+00> : vector<128xf32>
    %12 = vector.multi_reduction <add>, %11, %cst_10 [1] : vector<128x128xf32> to vector<128xf32>
    %13 = vector.shape_cast %12 : vector<128xf32> to vector<128x1xf32>
    %c0_11 = arith.constant 0 : index
    %c0_12 = arith.constant 0 : index
    %14 = vector.load %arg7[%c0_11, %c0_12] : memref<128x1xf32, #tpu.memory_space<vmem>>, vector<128x1xf32>
    tpu.vector_store %arg7[%c0_11, %c0_12], %13 {strides = array<i32>} : memref<128x1xf32, #tpu.memory_space<vmem>>, vector<128x1xf32>,
    %15 = tpu.iota {dimensions = array<i32: 1>} : vector<128x128xi32>
    %c16_i32 = arith.constant 16 : i32
    %16 = vector.broadcast %c16_i32 : i32 to vector<128x128xi32>
    %17 = arith.cmpi eq, %15, %16 : vector<128x128xi32>
    %cst_13 = arith.constant 1.000000e+00 : f32
    %18 = vector.broadcast %cst_13 : f32 to vector<128x128xf32>
    %19 = arith.select %17, %18, %2 : vector<128x128xi1>, vector<128x128xf32>
    %20 = arith.truncf %19 : vector<128x128xf32> to vector<128x128xbf16>
    %c0_14 = arith.constant 0 : index
    %c0_15 = arith.constant 0 : index
    %21 = vector.load %arg5[%c0_14, %c0_15] : memref<128x128xbf16, #tpu.memory_space<vmem>>, vector<128x128xbf16>
    tpu.vector_store %arg5[%c0_14, %c0_15], %20 {strides = array<i32>} : memref<128x128xbf16, #tpu.memory_space<vmem>>, vector<128x128xbf16>,
    return
  }
  func.func @transform_0(%arg0: i32) -> (i32, i32) {
    %c0_i32 = arith.constant 0 : i32
    %c0_i32_0 = arith.constant 0 : i32
    return %arg0, %c0_i32 : i32, i32
  }
  func.func @transform_1(%arg0: i32) -> (i32, i32) {
    %c0_i32 = arith.constant 0 : i32
    %c0_i32_0 = arith.constant 0 : i32
    %c0_i32_1 = arith.constant 0 : i32
    return %c0_i32, %c0_i32_0 : i32, i32
  }
  func.func @transform_2(%arg0: i32) -> (i32, i32) {
    %c0_i32 = arith.constant 0 : i32
    %c0_i32_0 = arith.constant 0 : i32
    %c0_i32_1 = arith.constant 0 : i32
    return %c0_i32, %c0_i32_0 : i32, i32
  }
  func.func @transform_3(%arg0: i32) -> (i32, i32) {
    %c0_i32 = arith.constant 0 : i32
    %c0_i32_0 = arith.constant 0 : i32
    %c0_i32_1 = arith.constant 0 : i32
    return %c0_i32, %c0_i32_0 : i32, i32
  }
  func.func @transform_4(%arg0: i32) -> (i32, i32) {
    %c0_i32 = arith.constant 0 : i32
    %c0_i32_0 = arith.constant 0 : i32
    return %arg0, %c0_i32 : i32, i32
  }
  func.func @transform_5(%arg0: i32) -> (i32, i32) {
    %c0_i32 = arith.constant 0 : i32
    %c0_i32_0 = arith.constant 0 : i32
    return %arg0, %c0_i32 : i32, i32
  }
  func.func @transform_6(%arg0: i32) -> (i32, i32) {
    %c0_i32 = arith.constant 0 : i32
    %c0_i32_0 = arith.constant 0 : i32
    return %arg0, %c0_i32 : i32, i32
  }
}

module attributes {stable_mosaic.version = 11 : i64} {
  func.func @_attn_kernel(%arg0: i32, %arg1: i32, %arg2: memref<128x1xf32, #tpu.memory_space<vmem>>, %arg3: memref<1x128xf32, #tpu.memory_space<vmem>>, %arg4: memref<128x128xbf16, #tpu.memory_space<vmem>>, %arg5: memref<128x128xbf16, #tpu.memory_space<vmem>>, %arg6: memref<1x128xf32, #tpu.memory_space<vmem>>, %arg7: memref<128x128xbf16, #tpu.memory_space<vmem>>, %arg8: memref<128x1xf32, #tpu.memory_space<vmem>>, %arg9: memref<128x128xf32, #tpu.memory_space<vmem>>) attributes {dimension_semantics = [#tpu.dimension_semantics<parallel>, #tpu.dimension_semantics<arbitrary>], iteration_bounds = array<i64: 1, 1>, scalar_prefetch = 0 : i64, scratch_operands = 2 : i64, tpu.core_type = #tpu.core_type<tc>, window_params = [{transform_indices = @transform_0, window_bounds = array<i64: 128, 1>}, {transform_indices = @transform_1, window_bounds = array<i64: 1, 128>}, {transform_indices = @transform_2, window_bounds = array<i64: 128, 128>}, {transform_indices = @transform_3, window_bounds = array<i64: 128, 128>}, {pipeline_mode = #tpu.pipeline_mode<synchronous>, transform_indices = @transform_4, window_bounds = array<i64: 1, 128>}, {transform_indices = @transform_5, window_bounds = array<i64: 128, 128>}]} {
    %c0_i32 = arith.constant 0 : i32
    %0 = arith.cmpi eq, %arg1, %c0_i32 : i32
    %1 = arith.extui %0 : i1 to i32
    %c0_i32_0 = arith.constant 0 : i32
    %2 = arith.cmpi ne, %1, %c0_i32_0 : i32
    scf.if %2 {
      %cst_22 = arith.constant -1.2676506E+30 : f32
      %38 = vector.broadcast %cst_22 : f32 to vector<128x1xf32>
      %c0_23 = arith.constant 0 : index
      %c0_24 = arith.constant 0 : index
      %39 = vector.load %arg8[%c0_23, %c0_24] : memref<128x1xf32, #tpu.memory_space<vmem>>, vector<128x1xf32>
      tpu.vector_store %arg8[%c0_23, %c0_24], %38 {strides = array<i32>} : memref<128x1xf32, #tpu.memory_space<vmem>>, vector<128x1xf32>,
      %cst_25 = arith.constant 0.000000e+00 : f32
      %40 = vector.broadcast %cst_25 : f32 to vector<128x128xf32>
      %c0_26 = arith.constant 0 : index
      %c0_27 = arith.constant 0 : index
      %41 = vector.load %arg9[%c0_26, %c0_27] : memref<128x128xf32, #tpu.memory_space<vmem>>, vector<128x128xf32>
      tpu.vector_store %arg9[%c0_26, %c0_27], %40 {strides = array<i32>} : memref<128x128xf32, #tpu.memory_space<vmem>>, vector<128x128xf32>,
    } else {
    }
    %c0 = arith.constant 0 : index
    %c0_1 = arith.constant 0 : index
    %3 = vector.load %arg2[%c0, %c0_1] : memref<128x1xf32, #tpu.memory_space<vmem>>, vector<128x1xf32>
    %4 = arith.truncf %3 : vector<128x1xf32> to vector<128x1xbf16>
    %c0_2 = arith.constant 0 : index
    %c0_3 = arith.constant 0 : index
    %5 = vector.load %arg3[%c0_2, %c0_3] : memref<1x128xf32, #tpu.memory_space<vmem>>, vector<1x128xf32>
    %6 = arith.truncf %5 : vector<1x128xf32> to vector<1x128xbf16>
    %7 = vector.broadcast %4 : vector<128x1xbf16> to vector<128x128xbf16>
    %8 = vector.broadcast %6 : vector<1x128xbf16> to vector<128x128xbf16>
    %9 = arith.addf %7, %8 : vector<128x128xbf16>
    %cst = arith.constant 2.001950e-01 : bf16
    %10 = vector.broadcast %cst : bf16 to vector<128x128xbf16>
    %11 = arith.mulf %10, %9 : vector<128x128xbf16>
    %12 = arith.maximumf %9, %11 : vector<128x128xbf16>
    %c0_4 = arith.constant 0 : index
    %c0_5 = arith.constant 0 : index
    %13 = vector.load %arg5[%c0_4, %c0_5] : memref<128x128xbf16, #tpu.memory_space<vmem>>, vector<128x128xbf16>
    %14 = arith.addf %12, %13 : vector<128x128xbf16>
    %c0_6 = arith.constant 0 : index
    %c0_7 = arith.constant 0 : index
    %15 = vector.load %arg8[%c0_6, %c0_7] : memref<128x1xf32, #tpu.memory_space<vmem>>, vector<128x1xf32>
    %cst_8 = arith.constant dense<0xFF80> : vector<128xbf16>
    %16 = vector.multi_reduction <maximumf>, %14, %cst_8 [1] : vector<128x128xbf16> to vector<128xbf16>
    %17 = vector.shape_cast %16 : vector<128xbf16> to vector<128x1xbf16>
    %18 = arith.extf %17 : vector<128x1xbf16> to vector<128x1xf32>
    %19 = arith.maximumf %15, %18 : vector<128x1xf32>
    %c0_9 = arith.constant 0 : index
    %c0_10 = arith.constant 0 : index
    %20 = vector.load %arg8[%c0_9, %c0_10] : memref<128x1xf32, #tpu.memory_space<vmem>>, vector<128x1xf32>
    %21 = arith.subf %20, %19 : vector<128x1xf32>
    %22 = math.exp %21 : vector<128x1xf32>
    %23 = arith.truncf %19 : vector<128x1xf32> to vector<128x1xbf16>
    %24 = vector.broadcast %23 : vector<128x1xbf16> to vector<128x128xbf16>
    %25 = arith.subf %14, %24 : vector<128x128xbf16>
    %26 = math.exp %25 : vector<128x128xbf16>
    %c0_11 = arith.constant 0 : index
    %c0_12 = arith.constant 0 : index
    %27 = vector.load %arg9[%c0_11, %c0_12] : memref<128x128xf32, #tpu.memory_space<vmem>>, vector<128x128xf32>
    %28 = vector.broadcast %22 : vector<128x1xf32> to vector<128x128xf32>
    %29 = arith.mulf %28, %27 : vector<128x128xf32>
    %c0_13 = arith.constant 0 : index
    %c0_14 = arith.constant 0 : index
    %30 = vector.load %arg4[%c0_13, %c0_14] : memref<128x128xbf16, #tpu.memory_space<vmem>>, vector<128x128xbf16>
    %cst_15 = arith.constant dense<0.000000e+00> : vector<128x128xf32>
    %31 = tpu.matmul %26, %30, %cst_15 {dimension_numbers = #tpu.dot_dimension_numbers<[1], [0], [0], [1], [0, 0, 1, 1], [], []>} : vector<128x128xbf16>, vector<128x128xbf16>, vector<128x128xf32> -> vector<128x128xf32>
    %32 = arith.addf %29, %31 : vector<128x128xf32>
    %c0_16 = arith.constant 0 : index
    %c0_17 = arith.constant 0 : index
    %33 = vector.load %arg9[%c0_16, %c0_17] : memref<128x128xf32, #tpu.memory_space<vmem>>, vector<128x128xf32>
    tpu.vector_store %arg9[%c0_16, %c0_17], %32 {strides = array<i32>} : memref<128x128xf32, #tpu.memory_space<vmem>>, vector<128x128xf32>,
    %c0_18 = arith.constant 0 : index
    %c0_19 = arith.constant 0 : index
    %34 = vector.load %arg8[%c0_18, %c0_19] : memref<128x1xf32, #tpu.memory_space<vmem>>, vector<128x1xf32>
    tpu.vector_store %arg8[%c0_18, %c0_19], %19 {strides = array<i32>} : memref<128x1xf32, #tpu.memory_space<vmem>>, vector<128x1xf32>,
    %c0_i32_20 = arith.constant 0 : i32
    %35 = arith.cmpi eq, %arg1, %c0_i32_20 : i32
    %36 = arith.extui %35 : i1 to i32
    %c0_i32_21 = arith.constant 0 : i32
    %37 = arith.cmpi ne, %36, %c0_i32_21 : i32
    scf.if %37 {
      %c0_22 = arith.constant 0 : index
      %c0_23 = arith.constant 0 : index
      %38 = vector.load %arg9[%c0_22, %c0_23] : memref<128x128xf32, #tpu.memory_space<vmem>>, vector<128x128xf32>
      %39 = tpu.iota {dimensions = array<i32: 1>} : vector<128x128xi32>
      %c16_i32 = arith.constant 16 : i32
      %40 = vector.broadcast %c16_i32 : i32 to vector<128x128xi32>
      %41 = arith.cmpi eq, %39, %40 : vector<128x128xi32>
      %cst_24 = arith.constant 0.000000e+00 : f32
      %42 = vector.broadcast %cst_24 : f32 to vector<128x128xf32>
      %43 = arith.select %41, %38, %42 : vector<128x128xi1>, vector<128x128xf32>
      %cst_25 = arith.constant dense<0.000000e+00> : vector<128xf32>
      %44 = vector.multi_reduction <add>, %43, %cst_25 [1] : vector<128x128xf32> to vector<128xf32>
      %45 = vector.shape_cast %44 : vector<128xf32> to vector<128x1xf32>
      %46 = tpu.reciprocal %45 {approx = true} : vector<128x1xf32> -> vector<128x1xf32>
      %47 = vector.broadcast %46 : vector<128x1xf32> to vector<128x128xf32>
      %48 = arith.mulf %38, %47 : vector<128x128xf32>
      %c0_26 = arith.constant 0 : index
      %c0_27 = arith.constant 0 : index
      %49 = vector.load %arg6[%c0_26, %c0_27] : memref<1x128xf32, #tpu.memory_space<vmem>>, vector<1x128xf32>
      %50 = vector.broadcast %49 : vector<1x128xf32> to vector<128x128xf32>
      %51 = arith.addf %48, %50 : vector<128x128xf32>
      %cst_28 = arith.constant 0.000000e+00 : f32
      %52 = vector.broadcast %cst_28 : f32 to vector<128x128xf32>
      %53 = arith.cmpf ogt, %51, %52 : vector<128x128xf32>
      %54 = math.exp %51 : vector<128x128xf32>
      %cst_29 = arith.constant 1.000000e+00 : f32
      %55 = vector.broadcast %cst_29 : f32 to vector<128x128xf32>
      %56 = arith.subf %54, %55 : vector<128x128xf32>
      %57 = arith.select %53, %51, %56 : vector<128x128xi1>, vector<128x128xf32>
      %58 = arith.truncf %57 : vector<128x128xf32> to vector<128x128xbf16>
      %c0_30 = arith.constant 0 : index
      %c0_31 = arith.constant 0 : index
      %59 = vector.load %arg7[%c0_30, %c0_31] : memref<128x128xbf16, #tpu.memory_space<vmem>>, vector<128x128xbf16>
      tpu.vector_store %arg7[%c0_30, %c0_31], %58 {strides = array<i32>} : memref<128x128xbf16, #tpu.memory_space<vmem>>, vector<128x128xbf16>,
    } else {
    }
    return
  }
  func.func @transform_0(%arg0: i32, %arg1: i32) -> (i32, i32) {
    %c0_i32 = arith.constant 0 : i32
    %c0_i32_0 = arith.constant 0 : i32
    return %arg0, %c0_i32 : i32, i32
  }
  func.func @transform_1(%arg0: i32, %arg1: i32) -> (i32, i32) {
    %c0_i32 = arith.constant 0 : i32
    %c0_i32_0 = arith.constant 0 : i32
    return %c0_i32, %arg1 : i32, i32
  }
  func.func @transform_2(%arg0: i32, %arg1: i32) -> (i32, i32) {
    %c0_i32 = arith.constant 0 : i32
    %c0_i32_0 = arith.constant 0 : i32
    return %arg1, %c0_i32 : i32, i32
  }
  func.func @transform_3(%arg0: i32, %arg1: i32) -> (i32, i32) {
    %c0_i32 = arith.constant 0 : i32
    return %arg0, %arg1 : i32, i32
  }
  func.func @transform_4(%arg0: i32, %arg1: i32) -> (i32, i32) {
    %c0_i32 = arith.constant 0 : i32
    %c0_i32_0 = arith.constant 0 : i32
    %c0_i32_1 = arith.constant 0 : i32
    return %c0_i32, %c0_i32_0 : i32, i32
  }
  func.func @transform_5(%arg0: i32, %arg1: i32) -> (i32, i32) {
    %c0_i32 = arith.constant 0 : i32
    %c0_i32_0 = arith.constant 0 : i32
    return %arg0, %c0_i32 : i32, i32
  }
}

module attributes {stable_mosaic.version = 11 : i64} {
  func.func @_proj_kernel(%arg0: i32, %arg1: memref<128x128xbf16, #tpu.memory_space<vmem>>, %arg2: memref<128x128xbf16, #tpu.memory_space<vmem>>, %arg3: memref<1x128xf32, #tpu.memory_space<vmem>>, %arg4: memref<1x128xf32, #tpu.memory_space<vmem>>, %arg5: memref<128x128xbf16, #tpu.memory_space<vmem>>, %arg6: memref<128x1xf32, #tpu.memory_space<vmem>>, %arg7: memref<128x1xf32, #tpu.memory_space<vmem>>) attributes {dimension_semantics = [#tpu.dimension_semantics<parallel>], iteration_bounds = array<i64: 1>, scalar_prefetch = 0 : i64, scratch_operands = 0 : i64, tpu.core_type = #tpu.core_type<tc>, window_params = [{transform_indices = @transform_0, window_bounds = array<i64: 128, 128>}, {pipeline_mode = #tpu.pipeline_mode<synchronous>, transform_indices = @transform_1, window_bounds = array<i64: 128, 128>}, {pipeline_mode = #tpu.pipeline_mode<synchronous>, transform_indices = @transform_2, window_bounds = array<i64: 1, 128>}, {pipeline_mode = #tpu.pipeline_mode<synchronous>, transform_indices = @transform_3, window_bounds = array<i64: 1, 128>}, {transform_indices = @transform_4, window_bounds = array<i64: 128, 128>}, {transform_indices = @transform_5, window_bounds = array<i64: 128, 1>}, {transform_indices = @transform_6, window_bounds = array<i64: 128, 1>}]} {
    %c0 = arith.constant 0 : index
    %c0_0 = arith.constant 0 : index
    %0 = vector.load %arg1[%c0, %c0_0] : memref<128x128xbf16, #tpu.memory_space<vmem>>, vector<128x128xbf16>
    %c0_1 = arith.constant 0 : index
    %c0_2 = arith.constant 0 : index
    %1 = vector.load %arg2[%c0_1, %c0_2] : memref<128x128xbf16, #tpu.memory_space<vmem>>, vector<128x128xbf16>
    %cst = arith.constant dense<0.000000e+00> : vector<128x128xf32>
    %2 = tpu.matmul %0, %1, %cst {dimension_numbers = #tpu.dot_dimension_numbers<[1], [0], [0], [1], [0, 0, 1, 1], [], []>} : vector<128x128xbf16>, vector<128x128xbf16>, vector<128x128xf32> -> vector<128x128xf32>
    %c0_3 = arith.constant 0 : index
    %c0_4 = arith.constant 0 : index
    %3 = vector.load %arg3[%c0_3, %c0_4] : memref<1x128xf32, #tpu.memory_space<vmem>>, vector<1x128xf32>
    %4 = vector.broadcast %3 : vector<1x128xf32> to vector<128x128xf32>
    %5 = arith.mulf %2, %4 : vector<128x128xf32>
    %cst_5 = arith.constant dense<0.000000e+00> : vector<128xf32>
    %6 = vector.multi_reduction <add>, %5, %cst_5 [1] : vector<128x128xf32> to vector<128xf32>
    %7 = vector.shape_cast %6 : vector<128xf32> to vector<128x1xf32>
    %c0_6 = arith.constant 0 : index
    %c0_7 = arith.constant 0 : index
    %8 = vector.load %arg6[%c0_6, %c0_7] : memref<128x1xf32, #tpu.memory_space<vmem>>, vector<128x1xf32>
    tpu.vector_store %arg6[%c0_6, %c0_7], %7 {strides = array<i32>} : memref<128x1xf32, #tpu.memory_space<vmem>>, vector<128x1xf32>,
    %c0_8 = arith.constant 0 : index
    %c0_9 = arith.constant 0 : index
    %9 = vector.load %arg4[%c0_8, %c0_9] : memref<1x128xf32, #tpu.memory_space<vmem>>, vector<1x128xf32>
    %10 = vector.broadcast %9 : vector<1x128xf32> to vector<128x128xf32>
    %11 = arith.mulf %2, %10 : vector<128x128xf32>
    %cst_10 = arith.constant dense<0.000000e+00> : vector<128xf32>
    %12 = vector.multi_reduction <add>, %11, %cst_10 [1] : vector<128x128xf32> to vector<128xf32>
    %13 = vector.shape_cast %12 : vector<128xf32> to vector<128x1xf32>
    %c0_11 = arith.constant 0 : index
    %c0_12 = arith.constant 0 : index
    %14 = vector.load %arg7[%c0_11, %c0_12] : memref<128x1xf32, #tpu.memory_space<vmem>>, vector<128x1xf32>
    tpu.vector_store %arg7[%c0_11, %c0_12], %13 {strides = array<i32>} : memref<128x1xf32, #tpu.memory_space<vmem>>, vector<128x1xf32>,
    %15 = tpu.iota {dimensions = array<i32: 1>} : vector<128x128xi32>
    %c4_i32 = arith.constant 4 : i32
    %16 = vector.broadcast %c4_i32 : i32 to vector<128x128xi32>
    %17 = arith.cmpi eq, %15, %16 : vector<128x128xi32>
    %cst_13 = arith.constant 1.000000e+00 : f32
    %18 = vector.broadcast %cst_13 : f32 to vector<128x128xf32>
    %19 = arith.select %17, %18, %2 : vector<128x128xi1>, vector<128x128xf32>
    %20 = arith.truncf %19 : vector<128x128xf32> to vector<128x128xbf16>
    %c0_14 = arith.constant 0 : index
    %c0_15 = arith.constant 0 : index
    %21 = vector.load %arg5[%c0_14, %c0_15] : memref<128x128xbf16, #tpu.memory_space<vmem>>, vector<128x128xbf16>
    tpu.vector_store %arg5[%c0_14, %c0_15], %20 {strides = array<i32>} : memref<128x128xbf16, #tpu.memory_space<vmem>>, vector<128x128xbf16>,
    return
  }
  func.func @transform_0(%arg0: i32) -> (i32, i32) {
    %c0_i32 = arith.constant 0 : i32
    %c0_i32_0 = arith.constant 0 : i32
    return %arg0, %c0_i32 : i32, i32
  }
  func.func @transform_1(%arg0: i32) -> (i32, i32) {
    %c0_i32 = arith.constant 0 : i32
    %c0_i32_0 = arith.constant 0 : i32
    %c0_i32_1 = arith.constant 0 : i32
    return %c0_i32, %c0_i32_0 : i32, i32
  }
  func.func @transform_2(%arg0: i32) -> (i32, i32) {
    %c0_i32 = arith.constant 0 : i32
    %c0_i32_0 = arith.constant 0 : i32
    %c0_i32_1 = arith.constant 0 : i32
    return %c0_i32, %c0_i32_0 : i32, i32
  }
  func.func @transform_3(%arg0: i32) -> (i32, i32) {
    %c0_i32 = arith.constant 0 : i32
    %c0_i32_0 = arith.constant 0 : i32
    %c0_i32_1 = arith.constant 0 : i32
    return %c0_i32, %c0_i32_0 : i32, i32
  }
  func.func @transform_4(%arg0: i32) -> (i32, i32) {
    %c0_i32 = arith.constant 0 : i32
    %c0_i32_0 = arith.constant 0 : i32
    return %arg0, %c0_i32 : i32, i32
  }
  func.func @transform_5(%arg0: i32) -> (i32, i32) {
    %c0_i32 = arith.constant 0 : i32
    %c0_i32_0 = arith.constant 0 : i32
    return %arg0, %c0_i32 : i32, i32
  }
  func.func @transform_6(%arg0: i32) -> (i32, i32) {
    %c0_i32 = arith.constant 0 : i32
    %c0_i32_0 = arith.constant 0 : i32
    return %arg0, %c0_i32 : i32, i32
  }
}

module attributes {stable_mosaic.version = 11 : i64} {
  func.func @_attn_kernel(%arg0: i32, %arg1: i32, %arg2: memref<128x1xf32, #tpu.memory_space<vmem>>, %arg3: memref<1x128xf32, #tpu.memory_space<vmem>>, %arg4: memref<128x128xbf16, #tpu.memory_space<vmem>>, %arg5: memref<128x128xbf16, #tpu.memory_space<vmem>>, %arg6: memref<1x128xf32, #tpu.memory_space<vmem>>, %arg7: memref<128x128xf32, #tpu.memory_space<vmem>>, %arg8: memref<128x1xf32, #tpu.memory_space<vmem>>, %arg9: memref<128x128xf32, #tpu.memory_space<vmem>>) attributes {dimension_semantics = [#tpu.dimension_semantics<parallel>, #tpu.dimension_semantics<arbitrary>], iteration_bounds = array<i64: 1, 1>, scalar_prefetch = 0 : i64, scratch_operands = 2 : i64, tpu.core_type = #tpu.core_type<tc>, window_params = [{transform_indices = @transform_0, window_bounds = array<i64: 128, 1>}, {transform_indices = @transform_1, window_bounds = array<i64: 1, 128>}, {transform_indices = @transform_2, window_bounds = array<i64: 128, 128>}, {transform_indices = @transform_3, window_bounds = array<i64: 128, 128>}, {pipeline_mode = #tpu.pipeline_mode<synchronous>, transform_indices = @transform_4, window_bounds = array<i64: 1, 128>}, {transform_indices = @transform_5, window_bounds = array<i64: 128, 128>}]} {
    %c0_i32 = arith.constant 0 : i32
    %0 = arith.cmpi eq, %arg1, %c0_i32 : i32
    %1 = arith.extui %0 : i1 to i32
    %c0_i32_0 = arith.constant 0 : i32
    %2 = arith.cmpi ne, %1, %c0_i32_0 : i32
    scf.if %2 {
      %cst_22 = arith.constant -1.2676506E+30 : f32
      %38 = vector.broadcast %cst_22 : f32 to vector<128x1xf32>
      %c0_23 = arith.constant 0 : index
      %c0_24 = arith.constant 0 : index
      %39 = vector.load %arg8[%c0_23, %c0_24] : memref<128x1xf32, #tpu.memory_space<vmem>>, vector<128x1xf32>
      tpu.vector_store %arg8[%c0_23, %c0_24], %38 {strides = array<i32>} : memref<128x1xf32, #tpu.memory_space<vmem>>, vector<128x1xf32>,
      %cst_25 = arith.constant 0.000000e+00 : f32
      %40 = vector.broadcast %cst_25 : f32 to vector<128x128xf32>
      %c0_26 = arith.constant 0 : index
      %c0_27 = arith.constant 0 : index
      %41 = vector.load %arg9[%c0_26, %c0_27] : memref<128x128xf32, #tpu.memory_space<vmem>>, vector<128x128xf32>
      tpu.vector_store %arg9[%c0_26, %c0_27], %40 {strides = array<i32>} : memref<128x128xf32, #tpu.memory_space<vmem>>, vector<128x128xf32>,
    } else {
    }
    %c0 = arith.constant 0 : index
    %c0_1 = arith.constant 0 : index
    %3 = vector.load %arg2[%c0, %c0_1] : memref<128x1xf32, #tpu.memory_space<vmem>>, vector<128x1xf32>
    %4 = arith.truncf %3 : vector<128x1xf32> to vector<128x1xbf16>
    %c0_2 = arith.constant 0 : index
    %c0_3 = arith.constant 0 : index
    %5 = vector.load %arg3[%c0_2, %c0_3] : memref<1x128xf32, #tpu.memory_space<vmem>>, vector<1x128xf32>
    %6 = arith.truncf %5 : vector<1x128xf32> to vector<1x128xbf16>
    %7 = vector.broadcast %4 : vector<128x1xbf16> to vector<128x128xbf16>
    %8 = vector.broadcast %6 : vector<1x128xbf16> to vector<128x128xbf16>
    %9 = arith.addf %7, %8 : vector<128x128xbf16>
    %cst = arith.constant 2.001950e-01 : bf16
    %10 = vector.broadcast %cst : bf16 to vector<128x128xbf16>
    %11 = arith.mulf %10, %9 : vector<128x128xbf16>
    %12 = arith.maximumf %9, %11 : vector<128x128xbf16>
    %c0_4 = arith.constant 0 : index
    %c0_5 = arith.constant 0 : index
    %13 = vector.load %arg5[%c0_4, %c0_5] : memref<128x128xbf16, #tpu.memory_space<vmem>>, vector<128x128xbf16>
    %14 = arith.addf %12, %13 : vector<128x128xbf16>
    %c0_6 = arith.constant 0 : index
    %c0_7 = arith.constant 0 : index
    %15 = vector.load %arg8[%c0_6, %c0_7] : memref<128x1xf32, #tpu.memory_space<vmem>>, vector<128x1xf32>
    %cst_8 = arith.constant dense<0xFF80> : vector<128xbf16>
    %16 = vector.multi_reduction <maximumf>, %14, %cst_8 [1] : vector<128x128xbf16> to vector<128xbf16>
    %17 = vector.shape_cast %16 : vector<128xbf16> to vector<128x1xbf16>
    %18 = arith.extf %17 : vector<128x1xbf16> to vector<128x1xf32>
    %19 = arith.maximumf %15, %18 : vector<128x1xf32>
    %c0_9 = arith.constant 0 : index
    %c0_10 = arith.constant 0 : index
    %20 = vector.load %arg8[%c0_9, %c0_10] : memref<128x1xf32, #tpu.memory_space<vmem>>, vector<128x1xf32>
    %21 = arith.subf %20, %19 : vector<128x1xf32>
    %22 = math.exp %21 : vector<128x1xf32>
    %23 = arith.truncf %19 : vector<128x1xf32> to vector<128x1xbf16>
    %24 = vector.broadcast %23 : vector<128x1xbf16> to vector<128x128xbf16>
    %25 = arith.subf %14, %24 : vector<128x128xbf16>
    %26 = math.exp %25 : vector<128x128xbf16>
    %c0_11 = arith.constant 0 : index
    %c0_12 = arith.constant 0 : index
    %27 = vector.load %arg9[%c0_11, %c0_12] : memref<128x128xf32, #tpu.memory_space<vmem>>, vector<128x128xf32>
    %28 = vector.broadcast %22 : vector<128x1xf32> to vector<128x128xf32>
    %29 = arith.mulf %28, %27 : vector<128x128xf32>
    %c0_13 = arith.constant 0 : index
    %c0_14 = arith.constant 0 : index
    %30 = vector.load %arg4[%c0_13, %c0_14] : memref<128x128xbf16, #tpu.memory_space<vmem>>, vector<128x128xbf16>
    %cst_15 = arith.constant dense<0.000000e+00> : vector<128x128xf32>
    %31 = tpu.matmul %26, %30, %cst_15 {dimension_numbers = #tpu.dot_dimension_numbers<[1], [0], [0], [1], [0, 0, 1, 1], [], []>} : vector<128x128xbf16>, vector<128x128xbf16>, vector<128x128xf32> -> vector<128x128xf32>
    %32 = arith.addf %29, %31 : vector<128x128xf32>
    %c0_16 = arith.constant 0 : index
    %c0_17 = arith.constant 0 : index
    %33 = vector.load %arg9[%c0_16, %c0_17] : memref<128x128xf32, #tpu.memory_space<vmem>>, vector<128x128xf32>
    tpu.vector_store %arg9[%c0_16, %c0_17], %32 {strides = array<i32>} : memref<128x128xf32, #tpu.memory_space<vmem>>, vector<128x128xf32>,
    %c0_18 = arith.constant 0 : index
    %c0_19 = arith.constant 0 : index
    %34 = vector.load %arg8[%c0_18, %c0_19] : memref<128x1xf32, #tpu.memory_space<vmem>>, vector<128x1xf32>
    tpu.vector_store %arg8[%c0_18, %c0_19], %19 {strides = array<i32>} : memref<128x1xf32, #tpu.memory_space<vmem>>, vector<128x1xf32>,
    %c0_i32_20 = arith.constant 0 : i32
    %35 = arith.cmpi eq, %arg1, %c0_i32_20 : i32
    %36 = arith.extui %35 : i1 to i32
    %c0_i32_21 = arith.constant 0 : i32
    %37 = arith.cmpi ne, %36, %c0_i32_21 : i32
    scf.if %37 {
      %c0_22 = arith.constant 0 : index
      %c0_23 = arith.constant 0 : index
      %38 = vector.load %arg9[%c0_22, %c0_23] : memref<128x128xf32, #tpu.memory_space<vmem>>, vector<128x128xf32>
      %39 = tpu.iota {dimensions = array<i32: 1>} : vector<128x128xi32>
      %c4_i32 = arith.constant 4 : i32
      %40 = vector.broadcast %c4_i32 : i32 to vector<128x128xi32>
      %41 = arith.cmpi eq, %39, %40 : vector<128x128xi32>
      %cst_24 = arith.constant 0.000000e+00 : f32
      %42 = vector.broadcast %cst_24 : f32 to vector<128x128xf32>
      %43 = arith.select %41, %38, %42 : vector<128x128xi1>, vector<128x128xf32>
      %cst_25 = arith.constant dense<0.000000e+00> : vector<128xf32>
      %44 = vector.multi_reduction <add>, %43, %cst_25 [1] : vector<128x128xf32> to vector<128xf32>
      %45 = vector.shape_cast %44 : vector<128xf32> to vector<128x1xf32>
      %46 = tpu.reciprocal %45 {approx = true} : vector<128x1xf32> -> vector<128x1xf32>
      %47 = vector.broadcast %46 : vector<128x1xf32> to vector<128x128xf32>
      %48 = arith.mulf %38, %47 : vector<128x128xf32>
      %c0_26 = arith.constant 0 : index
      %c0_27 = arith.constant 0 : index
      %49 = vector.load %arg6[%c0_26, %c0_27] : memref<1x128xf32, #tpu.memory_space<vmem>>, vector<1x128xf32>
      %50 = vector.broadcast %49 : vector<1x128xf32> to vector<128x128xf32>
      %51 = arith.addf %48, %50 : vector<128x128xf32>
      %c0_28 = arith.constant 0 : index
      %c0_29 = arith.constant 0 : index
      %52 = vector.load %arg7[%c0_28, %c0_29] : memref<128x128xf32, #tpu.memory_space<vmem>>, vector<128x128xf32>
      tpu.vector_store %arg7[%c0_28, %c0_29], %51 {strides = array<i32>} : memref<128x128xf32, #tpu.memory_space<vmem>>, vector<128x128xf32>,
    } else {
    }
    return
  }
  func.func @transform_0(%arg0: i32, %arg1: i32) -> (i32, i32) {
    %c0_i32 = arith.constant 0 : i32
    %c0_i32_0 = arith.constant 0 : i32
    return %arg0, %c0_i32 : i32, i32
  }
  func.func @transform_1(%arg0: i32, %arg1: i32) -> (i32, i32) {
    %c0_i32 = arith.constant 0 : i32
    %c0_i32_0 = arith.constant 0 : i32
    return %c0_i32, %arg1 : i32, i32
  }
  func.func @transform_2(%arg0: i32, %arg1: i32) -> (i32, i32) {
    %c0_i32 = arith.constant 0 : i32
    %c0_i32_0 = arith.constant 0 : i32
    return %arg1, %c0_i32 : i32, i32
  }
  func.func @transform_3(%arg0: i32, %arg1: i32) -> (i32, i32) {
    %c0_i32 = arith.constant 0 : i32
    return %arg0, %arg1 : i32, i32
  }
  func.func @transform_4(%arg0: i32, %arg1: i32) -> (i32, i32) {
    %c0_i32 = arith.constant 0 : i32
    %c0_i32_0 = arith.constant 0 : i32
    %c0_i32_1 = arith.constant 0 : i32
    return %c0_i32, %c0_i32_0 : i32, i32
  }
  func.func @transform_5(%arg0: i32, %arg1: i32) -> (i32, i32) {
    %c0_i32 = arith.constant 0 : i32
    %c0_i32_0 = arith.constant 0 : i32
    return %arg0, %c0_i32 : i32, i32
  }
}

</mosaic_0001>

<bundles_post_ra>
// kernel: pyg_gnn_forward.6
= control target key start
LH: loop header
LB: loop body
LE: loop exit
PB: predicated region body
PF: predicated region fallthrough
CT: control target
= control target key end

     0   :  { %v334_v18 = vlaneseq  ;;  %vm249_vm1 = vcmask 7168   ;;  %s867_s1 = inlined_call_operand.vmem [shape: bf16[128,128], index: 1, kind: input, shape index: {}]   ;;  %s868_s0 = inlined_call_operand.vmem [shape: bf16[128,128], index: 0, kind: input, shape index: {}]   ;;  %s869_s2 = inlined_call_operand.vmem [shape: f32[1,128], index: 2, kind: input, shape index: {}]   ;;  %s870_s3 = inlined_call_operand.vmem [shape: f32[1,128], index: 3, kind: input, shape index: {}]   ;;  %s871_s4 = inlined_call_operand.vmem [shape: bf16[128,128], index: 4, kind: output, shape index: {0}]   ;;  %s872_s6 = inlined_call_operand.vmem [shape: f32[128,1], index: 6, kind: output, shape index: {2}]   ;;  %s873_s5 = inlined_call_operand.vmem [shape: f32[128,1], index: 5, kind: output, shape index: {1}]  }
   0x1   :  { %v476_v0 = vld [vmem:[%s867_s1 + $0x38] sm:$0xff]  ;;  %v475_v1 = vld [vmem:[%s867_s1 + $0x30] sm:$0xff]  ;;  %v474_v2 = vld [vmem:[%s867_s1 + $0x28] sm:$0xff] }
   0x2   :  { %148 = vmatpush.bf16.msra.mxu0 %v476_v0  ;;  %524 = vmatpush.bf16.msra.mxu1 %v476_v0  ;;  %v473_v3 = vld [vmem:[%s867_s1 + $0x20] sm:$0xff]  ;;  %v472_v4 = vld [vmem:[%s867_s1 + $0x18] sm:$0xff]  ;;  %v471_v5 = vld [vmem:[%s867_s1 + $0x10] sm:$0xff]  ;;  %v645_v23 = vand.u32 127, %v334_v18 }
   0x3   :  { %526 = vmatpush.bf16.msra.mxu3 %v476_v0  ;;  %525 = vmatpush.bf16.msra.mxu2 %v476_v0  ;;  %v470_v6 = vld [vmem:[%s867_s1 + $0x8] sm:$0xff]  ;;  %v469_v7 = vld [vmem:[%s867_s1] sm:$0xff]  ;;  %v463_v9 = vld [vmem:[%s868_s0 + $0x10] sm:$0xff] }
   0x4   :  { %v461_v8 = vld [vmem:[%s868_s0] sm:$0xff]  ;;  %v467_v10 = vld [vmem:[%s868_s0 + $0x30] sm:$0xff]  ;;  %v462_v12 = vld [vmem:[%s868_s0 + $0x8] sm:$0xff]  ;;  %vm336_vm0 = vcmp.eq.s32.totalorder %v645_v23, 16 }
   0x5   :  { %v465_v11 = vld [vmem:[%s868_s0 + $0x20] sm:$0xff]  ;;  %v464_v13 = vld [vmem:[%s868_s0 + $0x18] sm:$0xff]  ;;  %v466_v14 = vld [vmem:[%s868_s0 + $0x28] sm:$0xff] }
   0x6   :  { %149 = vmatpush.bf16.msra.mxu0 %v475_v1  ;;  %527 = vmatpush.bf16.msra.mxu1 %v475_v1  ;;  %v468_v15 = vld [vmem:[%s868_s0 + $0x38] sm:$0xff]  ;;  %v636_v16 = vld [vmem:[%s869_s2] ss:$0 sm:$0xff] }
   0x7   :  { %529 = vmatpush.bf16.msra.mxu3 %v475_v1  ;;  %528 = vmatpush.bf16.msra.mxu2 %v475_v1  ;;  %v641_v17 = vld [vmem:[%s870_s3] ss:$0 sm:$0xff] }
   0xa   :  { %150 = vmatpush.bf16.msra.mxu0 %v474_v2  ;;  %530 = vmatpush.bf16.msra.mxu1 %v474_v2 }
   0xb   :  { %532 = vmatpush.bf16.msra.mxu3 %v474_v2  ;;  %531 = vmatpush.bf16.msra.mxu2 %v474_v2 }
   0xe   :  { %151 = vmatpush.bf16.msra.mxu0 %v473_v3  ;;  %533 = vmatpush.bf16.msra.mxu1 %v473_v3 }
   0xf   :  { %535 = vmatpush.bf16.msra.mxu3 %v473_v3  ;;  %534 = vmatpush.bf16.msra.mxu2 %v473_v3 }
  0x12   :  { %152 = vmatpush.bf16.msra.mxu0 %v472_v4  ;;  %536 = vmatpush.bf16.msra.mxu1 %v472_v4 }
  0x13   :  { %538 = vmatpush.bf16.msra.mxu3 %v472_v4  ;;  %537 = vmatpush.bf16.msra.mxu2 %v472_v4 }
  0x16   :  { %153 = vmatpush.bf16.msra.mxu0 %v471_v5  ;;  %539 = vmatpush.bf16.msra.mxu1 %v471_v5 }
  0x17   :  { %541 = vmatpush.bf16.msra.mxu3 %v471_v5  ;;  %540 = vmatpush.bf16.msra.mxu2 %v471_v5 }
  0x1a   :  { %154 = vmatpush.bf16.msra.mxu0 %v470_v6  ;;  %542 = vmatpush.bf16.msra.mxu1 %v470_v6 }
  0x1b   :  { %544 = vmatpush.bf16.msra.mxu3 %v470_v6  ;;  %543 = vmatpush.bf16.msra.mxu2 %v470_v6 }
  0x1e   :  { %155 = vmatpush.bf16.msra.mxu0 %v469_v7  ;;  %545 = vmatpush.bf16.msra.mxu1 %v469_v7 }
  0x1f   :  { %547 = vmatpush.bf16.msra.mxu3 %v469_v7  ;;  %546 = vmatpush.bf16.msra.mxu2 %v469_v7 }
  0x21   :  { %156 = vmatmul.bf16.vlgmr.msra.gmra.mxu0 %v461_v8  ;;  %166 = vmatmul.bf16.vlgmr.msra.gmra.mxu1 %v463_v9 }
  0x22   :  { %186 = vmatmul.bf16.vlgmr.msra.gmra.mxu3 %v467_v10  ;;  %176 = vmatmul.bf16.vlgmr.msra.gmra.mxu2 %v465_v11 }
  0x31   :  { %161 = vmatmul.bf16.gmra.mxu0 %v462_v12  ;;  %171 = vmatmul.bf16.gmra.mxu1 %v464_v13 }
  0x32   :  { %181 = vmatmul.bf16.gmra.mxu2 %v466_v14  ;;  %191 = vmatmul.bf16.gmra.mxu3 %v468_v15 }
  0x9e   :  { %v157_v19 = vpop.f32.mrf.mxu0  ;;  %v167_v20 = vpop.f32.mrf.mxu1 }
  0x9f   :  { %v205_v21 = vmul.f32 %v636_v16, %v167_v20  ;;  %v270_v22 = vmul.f32 %v641_v17, %v157_v19  ;;  %v201_v24 = vmul.f32 %v636_v16, %v157_v19  ;;  %v341_v25 = vsel %vm336_vm0, 1.0, %v167_v20 }
  0xa0   :  { %v274_v28 = vmul.f32 %v641_v17, %v167_v20  ;;  %v337_v33 = vsel %vm336_vm0, 1.0, %v157_v19 }
  0xa1   :  { %225 = vadd.xlane.f32.xlu2 %v205_v21  ;;  %286 = vadd.xlane.f32.xlu1 %v270_v22 }
  0xa2   :  { %217 = vadd.xlane.f32.xlu0 %v201_v24 }
  0xa5   :  { %v187_v26 = vpop.f32.mrf.mxu3  ;;  %v177_v27 = vpop.f32.mrf.mxu2 }
  0xa6   :  { %v159_v29 = vpop.f32.mrf.mxu0  ;;  %v169_v30 = vpop.f32.mrf.mxu1  ;;  %v282_v31 = vmul.f32 %v641_v17, %v187_v26  ;;  %v213_v32 = vmul.f32 %v636_v16, %v187_v26  ;;  %v345_v38 = vsel %vm336_vm0, 1.0, %v177_v27  ;;  %v209_v41 = vmul.f32 %v636_v16, %v177_v27 }
  0xa7   :  { %v338_v34 = vsel %vm336_vm0, 1.0, %v159_v29  ;;  %v342_v35 = vsel %vm336_vm0, 1.0, %v169_v30  ;;  %v349_v42 = vsel %vm336_vm0, 1.0, %v187_v26  ;;  %v278_v45 = vmul.f32 %v641_v17, %v177_v27 }
  0xa8   :  { %v480_v36 = vpack.c.bf16 %v338_v34, %v337_v33  ;;  %v490_v37 = vpack.c.bf16 %v342_v35, %v341_v25  ;;  %v206_v57 = vmul.f32 %v636_v16, %v169_v30  ;;  %v202_v61 = vmul.f32 %v636_v16, %v159_v29 }
  0xa9   :  { %294 = vadd.xlane.f32.xlu2 %v274_v28  ;;  %310 = vadd.xlane.f32.xlu1 %v282_v31  ;;  %v271_v7 = vmul.f32 %v641_v17, %v159_v29  ;;  %v275_v10 = vmul.f32 %v641_v17, %v169_v30 }
  0xaa   :  { %481 = vst [vmem:[%s871_s4] sm:$0xff] %v480_v36   ;;  %241 = vadd.xlane.f32.xlu0 %v213_v32 }
  0xab   :  { %518 = vst [vmem:[%s871_s4 + $0x10] sm:$0xff] %v490_v37  }
  0xad   :  { %v668_v39 = vpop.f32.mrf.mxu3  ;;  %v179_v40 = vpop.f32.mrf.mxu2 }
  0xae   :  { %v350_v43 = vsel %vm336_vm0, 1.0, %v668_v39  ;;  %v346_v44 = vsel %vm336_vm0, 1.0, %v179_v40  ;;  %v162_v46 = vpop.f32.mrf.mxu0  ;;  %v172_v47 = vpop.f32.mrf.mxu1  ;;  %v214_v50 = vmul.f32 %v636_v16, %v668_v39  ;;  %v279_v58 = vmul.f32 %v641_v17, %v179_v40 }
  0xaf   :  { %v510_v48 = vpack.c.bf16 %v350_v43, %v349_v42  ;;  %v500_v49 = vpack.c.bf16 %v346_v44, %v345_v38  ;;  %v339_v51 = vsel %vm336_vm0, 1.0, %v162_v46  ;;  %v343_v52 = vsel %vm336_vm0, 1.0, %v172_v47 }
  0xb0   :  { %v203_v2 = vmul.f32 %v636_v16, %v162_v46  ;;  %v276_v12 = vmul.f32 %v641_v17, %v172_v47  ;;  %v210_v13 = vmul.f32 %v636_v16, %v179_v40  ;;  %v207_v18 = vmul.f32 %v636_v16, %v172_v47 }
  0xb1   :  { %522 = vst [vmem:[%s871_s4 + $0x30] sm:$0xff] %v510_v48   ;;  %233 = vadd.xlane.f32.xlu2 %v209_v41  ;;  %243 = vadd.xlane.f32.xlu1 %v214_v50  ;;  %v272_v21 = vmul.f32 %v641_v17, %v162_v46  ;;  %v283_v25 = vmul.f32 %v641_v17, %v668_v39 }
  0xb2   :  { %520 = vst [vmem:[%s871_s4 + $0x20] sm:$0xff] %v500_v49   ;;  %302 = vadd.xlane.f32.xlu0 %v278_v45 }
  0xb5   :  { %v182_v53 = vpop.f32.mrf.mxu2  ;;  %v192_v54 = vpop.f32.mrf.mxu3 }
  0xb6   :  { %v164_v55 = vpop.f32.mrf.mxu0  ;;  %v174_v56 = vpop.f32.mrf.mxu1  ;;  %v347_v0 = vsel %vm336_vm0, 1.0, %v182_v53  ;;  %v351_v1 = vsel %vm336_vm0, 1.0, %v192_v54  ;;  %v215_v11 = vmul.f32 %v636_v16, %v192_v54  ;;  %v280_v14 = vmul.f32 %v641_v17, %v182_v53 }
  0xb7   :  { %v340_v59 = vsel %vm336_vm0, 1.0, %v164_v55  ;;  %v344_v60 = vsel %vm336_vm0, 1.0, %v174_v56  ;;  %v211_v15 = vmul.f32 %v636_v16, %v182_v53  ;;  %v277_v19 = vmul.f32 %v641_v17, %v174_v56 }
  0xb8   :  { %v485_v62 = vpack.c.bf16 %v340_v59, %v339_v51  ;;  %v495_v63 = vpack.c.bf16 %v344_v60, %v343_v52  ;;  %v204_v20 = vmul.f32 %v636_v16, %v164_v55  ;;  %v208_v23 = vmul.f32 %v636_v16, %v174_v56 }
  0xb9   :  { %227 = vadd.xlane.f32.xlu2 %v206_v57  ;;  %304 = vadd.xlane.f32.xlu1 %v279_v58  ;;  %v273_v26 = vmul.f32 %v641_v17, %v164_v55  ;;  %v284_v29 = vmul.f32 %v641_v17, %v192_v54 }
  0xba   :  { %219 = vadd.xlane.f32.xlu0 %v202_v61  ;;  %517 = vst [vmem:[%s871_s4 + $0x8] sm:$0xff] %v485_v62  }
  0xbb   :  { %519 = vst [vmem:[%s871_s4 + $0x18] sm:$0xff] %v495_v63  }
  0xbd   :  { %v184_v3 = vpop.f32.mrf.mxu2  ;;  %v194_v4 = vpop.f32.mrf.mxu3 }
  0xbe   :  { %v348_v5 = vsel %vm336_vm0, 1.0, %v184_v3  ;;  %v352_v6 = vsel %vm336_vm0, 1.0, %v194_v4  ;;  %v212_v22 = vmul.f32 %v636_v16, %v184_v3  ;;  %v216_v24 = vmul.f32 %v636_v16, %v194_v4 }
  0xbf   :  { %v505_v8 = vpack.c.bf16 %v348_v5, %v347_v0  ;;  %v515_v9 = vpack.c.bf16 %v352_v6, %v351_v1  ;;  %v281_v27 = vmul.f32 %v641_v17, %v184_v3  ;;  %v285_v28 = vmul.f32 %v641_v17, %v194_v4 }
  0xc1   :  { %288 = vadd.xlane.f32.xlu2 %v271_v7  ;;  %221 = vadd.xlane.f32.xlu1 %v203_v2  ;;  %521 = vst [vmem:[%s871_s4 + $0x28] sm:$0xff] %v505_v8  }
  0xc2   :  { %296 = vadd.xlane.f32.xlu0 %v275_v10  ;;  %523 = vst [vmem:[%s871_s4 + $0x38] sm:$0xff] %v515_v9  }
  0xc9   :  { %245 = vadd.xlane.f32.xlu2 %v215_v11  ;;  %298 = vadd.xlane.f32.xlu1 %v276_v12 }
  0xca   :  { %235 = vadd.xlane.f32.xlu0 %v210_v13 }
  0xd1   :  { %306 = vadd.xlane.f32.xlu2 %v280_v14  ;;  %237 = vadd.xlane.f32.xlu1 %v211_v15 }
  0xd2   :  { %229 = vadd.xlane.f32.xlu0 %v207_v18 }
  0xd9   :  { %300 = vadd.xlane.f32.xlu2 %v277_v19  ;;  %223 = vadd.xlane.f32.xlu1 %v204_v20 }
  0xda   :  { %290 = vadd.xlane.f32.xlu0 %v272_v21 }
  0xe1   :  { %239 = vadd.xlane.f32.xlu2 %v212_v22  ;;  %231 = vadd.xlane.f32.xlu1 %v208_v23 }
  0xe2   :  { %247 = vadd.xlane.f32.xlu0 %v216_v24 }
  0xe9   :  { %312 = vadd.xlane.f32.xlu2 %v283_v25  ;;  %292 = vadd.xlane.f32.xlu1 %v273_v26 }
  0xea   :  { %308 = vadd.xlane.f32.xlu0 %v281_v27 }
  0xf1   :  { %316 = vadd.xlane.f32.xlu1 %v285_v28 }
  0xf2   :  { %314 = vadd.xlane.f32.xlu0 %v284_v29 }
 0x114   :  { %v226_v16 = vpop.xlane.xlu2 %225  ;;  %v287_v30 = vpop.xlane.xlu1 %286 }
 0x115   :  { %254 = vst.msk [vmem:[%s873_s5 + $0x20] sm:$0xff] %vm249_vm1, %v226_v16  ;;  %v218_v31 = vpop.xlane.xlu0 %217 }
 0x116   :  { %318 = vst.msk [vmem:[%s872_s6] sm:$0xff] %vm249_vm1, %v287_v30 }
 0x117   :  { %250 = vst.msk [vmem:[%s873_s5] sm:$0xff] %vm249_vm1, %v218_v31 }
 0x11c   :  { %v295_v17 = vpop.xlane.xlu2 %294  ;;  %v311_v32 = vpop.xlane.xlu1 %310 }
 0x11d   :  { %322 = vst.msk [vmem:[%s872_s6 + $0x20] sm:$0xff] %vm249_vm1, %v295_v17  ;;  %v242_v33 = vpop.xlane.xlu0 %241 }
 0x11e   :  { %330 = vst.msk [vmem:[%s872_s6 + $0x60] sm:$0xff] %vm249_vm1, %v311_v32 }
 0x11f   :  { %262 = vst.msk [vmem:[%s873_s5 + $0x60] sm:$0xff] %vm249_vm1, %v242_v33 }
 0x124   :  { %v234_v34 = vpop.xlane.xlu2 %233  ;;  %v244_v35 = vpop.xlane.xlu1 %243 }
 0x125   :  { %258 = vst.msk [vmem:[%s873_s5 + $0x40] sm:$0xff] %vm249_vm1, %v234_v34  ;;  %v303_v36 = vpop.xlane.xlu0 %302 }
 0x126   :  { %263 = vst.msk [vmem:[%s873_s5 + $0x68] sm:$0xff] %vm249_vm1, %v244_v35 }
 0x127   :  { %326 = vst.msk [vmem:[%s872_s6 + $0x40] sm:$0xff] %vm249_vm1, %v303_v36 }
 0x12c   :  { %v228_v37 = vpop.xlane.xlu2 %227  ;;  %v305_v38 = vpop.xlane.xlu1 %304 }
 0x12d   :  { %255 = vst.msk [vmem:[%s873_s5 + $0x28] sm:$0xff] %vm249_vm1, %v228_v37  ;;  %v220_v39 = vpop.xlane.xlu0 %219 }
 0x12e   :  { %327 = vst.msk [vmem:[%s872_s6 + $0x48] sm:$0xff] %vm249_vm1, %v305_v38 }
 0x12f   :  { %251 = vst.msk [vmem:[%s873_s5 + $0x8] sm:$0xff] %vm249_vm1, %v220_v39 }
 0x134   :  { %v289_v40 = vpop.xlane.xlu2 %288  ;;  %v222_v41 = vpop.xlane.xlu1 %221 }
 0x135   :  { %319 = vst.msk [vmem:[%s872_s6 + $0x8] sm:$0xff] %vm249_vm1, %v289_v40  ;;  %v297_v42 = vpop.xlane.xlu0 %296 }
 0x136   :  { %323 = vst.msk [vmem:[%s872_s6 + $0x28] sm:$0xff] %vm249_vm1, %v297_v42 }
 0x137   :  { %252 = vst.msk [vmem:[%s873_s5 + $0x10] sm:$0xff] %vm249_vm1, %v222_v41 }
 0x13c   :  { %v246_v43 = vpop.xlane.xlu2 %245  ;;  %v299_v44 = vpop.xlane.xlu1 %298 }
 0x13d   :  { %264 = vst.msk [vmem:[%s873_s5 + $0x70] sm:$0xff] %vm249_vm1, %v246_v43  ;;  %v236_v45 = vpop.xlane.xlu0 %235 }
 0x13e   :  { %259 = vst.msk [vmem:[%s873_s5 + $0x48] sm:$0xff] %vm249_vm1, %v236_v45 }
 0x13f   :  { %324 = vst.msk [vmem:[%s872_s6 + $0x30] sm:$0xff] %vm249_vm1, %v299_v44 }
 0x144   :  { %v307_v46 = vpop.xlane.xlu2 %306  ;;  %v238_v47 = vpop.xlane.xlu1 %237 }
 0x145   :  { %328 = vst.msk [vmem:[%s872_s6 + $0x50] sm:$0xff] %vm249_vm1, %v307_v46  ;;  %v230_v48 = vpop.xlane.xlu0 %229 }
 0x146   :  { %256 = vst.msk [vmem:[%s873_s5 + $0x30] sm:$0xff] %vm249_vm1, %v230_v48 }
 0x147   :  { %260 = vst.msk [vmem:[%s873_s5 + $0x50] sm:$0xff] %vm249_vm1, %v238_v47 }
 0x14c   :  { %v301_v49 = vpop.xlane.xlu2 %300  ;;  %v224_v50 = vpop.xlane.xlu1 %223 }
 0x14d   :  { %325 = vst.msk [vmem:[%s872_s6 + $0x38] sm:$0xff] %vm249_vm1, %v301_v49  ;;  %v291_v51 = vpop.xlane.xlu0 %290 }
 0x14e   :  { %320 = vst.msk [vmem:[%s872_s6 + $0x10] sm:$0xff] %vm249_vm1, %v291_v51 }
 0x14f   :  { %253 = vst.msk [vmem:[%s873_s5 + $0x18] sm:$0xff] %vm249_vm1, %v224_v50 }
 0x154   :  { %v240_v52 = vpop.xlane.xlu2 %239  ;;  %v232_v53 = vpop.xlane.xlu1 %231 }
 0x155   :  { %261 = vst.msk [vmem:[%s873_s5 + $0x58] sm:$0xff] %vm249_vm1, %v240_v52  ;;  %v248_v54 = vpop.xlane.xlu0 %247 }
 0x156   :  { %265 = vst.msk [vmem:[%s873_s5 + $0x78] sm:$0xff] %vm249_vm1, %v248_v54 }
 0x157   :  { %257 = vst.msk [vmem:[%s873_s5 + $0x38] sm:$0xff] %vm249_vm1, %v232_v53 }
 0x15c   :  { %v313_v55 = vpop.xlane.xlu2 %312  ;;  %v293_v56 = vpop.xlane.xlu1 %292 }
 0x15d   :  { %331 = vst.msk [vmem:[%s872_s6 + $0x68] sm:$0xff] %vm249_vm1, %v313_v55  ;;  %v309_v57 = vpop.xlane.xlu0 %308 }
 0x15e   :  { %329 = vst.msk [vmem:[%s872_s6 + $0x58] sm:$0xff] %vm249_vm1, %v309_v57 }
 0x15f   :  { %321 = vst.msk [vmem:[%s872_s6 + $0x18] sm:$0xff] %vm249_vm1, %v293_v56 }
 0x164   :  { %v317_v58 = vpop.xlane.xlu1 %316 }
 0x165   :  { %v315_v59 = vpop.xlane.xlu0 %314  ;;  %333 = vst.msk [vmem:[%s872_s6 + $0x78] sm:$0xff] %vm249_vm1, %v317_v58 }
 0x166   :  { %332 = vst.msk [vmem:[%s872_s6 + $0x70] sm:$0xff] %vm249_vm1, %v315_v59 }

// kernel: pyg_gnn_forward.7
= control target key start
LH: loop header
LB: loop body
LE: loop exit
PB: predicated region body
PF: predicated region fallthrough
CT: control target
= control target key end

     0   :  { %v1693_v0 = vmov 0   ;;  %v1694_v35 = vmov 839922192   ;;  %vm24_vm0 = vcmask 7168   ;;  %s2323_s0 = inlined_call_operand.vmem [shape: f32[128,1], index: 0, kind: input, shape index: {}]   ;;  %s2324_s1 = inlined_call_operand.vmem [shape: f32[1,128], index: 1, kind: input, shape index: {}]   ;;  %s2325_s3 = inlined_call_operand.vmem [shape: bf16[128,128], index: 3, kind: input, shape index: {}]   ;;  %s2326_s2 = inlined_call_operand.vmem [shape: bf16[128,128], index: 2, kind: input, shape index: {}]   ;;  %s2327_s4 = inlined_call_operand.vmem [shape: f32[1,128], index: 4, kind: input, shape index: {}]   ;;  %s2328_s5 = inlined_call_operand.vmem [shape: bf16[128,128], index: 5, kind: output, shape index: {}]  }
   0x1   :  { %1563 = vset.pattern.permute.xlu2 %v1693_v0  ;;  %1562 = vset.pattern.permute.xlu1 %v1693_v0  ;;  %v65_v1 = vld [vmem:[%s2323_s0 + $0x40] sm:$0xff]  ;;  %v59_v2 = vld [vmem:[%s2323_s0 + $0x10] sm:$0xff]  ;;  %v66_v7 = vld [vmem:[%s2323_s0 + $0x48] sm:$0xff]  ;;  %v97_v36 = vunpack.c.l.s4 %v1694_v35 }
   0x2   :  { %v57_v3 = vld [vmem:[%s2323_s0] sm:$0xff]  ;;  %1561 = vset.pattern.permute.xlu0 %v1693_v0  ;;  %v81_v4 = vpack.c.bf16 %v65_v1, %v65_v1  ;;  %v75_v5 = vpack.c.bf16 %v59_v2, %v59_v2  ;;  %v60_v8 = vld [vmem:[%s2323_s0 + $0x18] sm:$0xff]  ;;  %v58_v9 = vld [vmem:[%s2323_s0 + $0x8] sm:$0xff]  ;;  %v82_v10 = vpack.c.bf16 %v66_v7, %v66_v7 }
   0x3   :  { %v73_v6 = vpack.c.bf16 %v57_v3, %v57_v3  ;;  %v76_v11 = vpack.c.bf16 %v60_v8, %v60_v8  ;;  %v74_v12 = vpack.c.bf16 %v58_v9, %v58_v9  ;;  %v61_v13 = vld [vmem:[%s2323_s0 + $0x20] sm:$0xff]  ;;  %v70_v14 = vld [vmem:[%s2323_s0 + $0x68] sm:$0xff]  ;;  %v68_v19 = vld [vmem:[%s2323_s0 + $0x58] sm:$0xff]  ;;  %v1777_v38 = vunpack.c.0.s8 %v97_v36 }
   0x4   :  { %165 = vperm.xlu2 %1563, %v81_v4   ;;  %111 = vperm.xlu1 %1562, %v75_v5   ;;  %v69_v15 = vld [vmem:[%s2323_s0 + $0x60] sm:$0xff]  ;;  %v77_v16 = vpack.c.bf16 %v61_v13, %v61_v13  ;;  %v86_v17 = vpack.c.bf16 %v70_v14, %v70_v14  ;;  %v67_v20 = vld [vmem:[%s2323_s0 + $0x50] sm:$0xff]  ;;  %v62_v21 = vld [vmem:[%s2323_s0 + $0x28] sm:$0xff]  ;;  %v84_v22 = vpack.c.bf16 %v68_v19, %v68_v19 }
   0x5   :  { %93 = vperm.xlu0 %1561, %v73_v6   ;;  %v85_v18 = vpack.c.bf16 %v69_v15, %v69_v15  ;;  %v83_v23 = vpack.c.bf16 %v67_v20, %v67_v20  ;;  %v78_v24 = vpack.c.bf16 %v62_v21, %v62_v21  ;;  %v63_v25 = vld [vmem:[%s2323_s0 + $0x30] sm:$0xff]  ;;  %v72_v26 = vld [vmem:[%s2323_s0 + $0x78] sm:$0xff]  ;;  %v89_v33 = vld [vmem:[%s2324_s1] sm:$0x1] }
   0x6   :  { %v71_v27 = vld [vmem:[%s2323_s0 + $0x70] sm:$0xff]  ;;  %v79_v28 = vpack.c.bf16 %v63_v25, %v63_v25  ;;  %v88_v29 = vpack.c.bf16 %v72_v26, %v72_v26  ;;  %v64_v31 = vld [vmem:[%s2323_s0 + $0x38] sm:$0xff]  ;;  %v90_v34 = vpack.c.bf16 %v89_v33, %v89_v33  ;;  %v1523_v51 = vld [vmem:[%s2325_s3 + $0x20] sm:$0xff]  }
   0x7   :  { %v87_v30 = vpack.c.bf16 %v71_v27, %v71_v27  ;;  %v80_v32 = vpack.c.bf16 %v64_v31, %v64_v31  ;;  %v1466_v56 = vunpack.c.l.bf16 %v1523_v51  ;;  %v1467_v4 = vunpack.c.h.bf16 %v1523_v51 }
   0x8   :  { %v236_v37 = vpack.i.b16 %v90_v34, %v90_v34 }
   0xa   :  { %v238_v39 = vperm.slane %v236_v37, 0 }
   0xc   :  { %174 = vperm.xlu2 %1563, %v82_v10   ;;  %120 = vperm.xlu1 %1562, %v76_v11   ;;  %v1779_v41 = vunpack.c.l.bf16 %v238_v39 }
   0xd   :  { %102 = vperm.xlu0 %1561, %v74_v12  }
  0x14   :  { %129 = vperm.xlu2 %1563, %v77_v16   ;;  %210 = vperm.xlu1 %1562, %v86_v17  }
  0x15   :  { %201 = vperm.xlu0 %1561, %v85_v18  }
  0x1c   :  { %192 = vperm.xlu2 %1563, %v84_v22   ;;  %183 = vperm.xlu1 %1562, %v83_v23  }
  0x1d   :  { %138 = vperm.xlu0 %1561, %v78_v24  }
  0x24   :  { %147 = vperm.xlu2 %1563, %v79_v28   ;;  %228 = vperm.xlu1 %1562, %v88_v29   ;;  %v1804_v28 = vld [vmem:[%s2325_s3] sm:$0xff]  }
  0x25   :  { %219 = vperm.xlu0 %1561, %v87_v30   ;;  %v1450_v36 = vunpack.c.l.bf16 %v1804_v28 }
  0x2d   :  { %156 = vperm.xlu0 %1561, %v80_v32  }
  0x5e   :  { %v166_v40 = vpop.permute.xlu2 %165 }
  0x5f   :  { %v171_v42 = vperm.slane %v166_v40, %v1777_v38 }
  0x61   :  { %v247_v43 = vunpack.c.l.bf16 %v171_v42 }
  0x63   :  { %v264_v44 = vadd.f32 %v1779_v41, %v247_v43 }
  0x65   :  { %v280_v45 = vpack.c.bf16 %v264_v44, %v264_v44 }
  0x66   :  { %v175_v46 = vpop.permute.xlu2 %174 }
  0x67   :  { %v296_v47 = vunpack.c.l.bf16 %v280_v45  ;;  %v180_v48 = vperm.slane %v175_v46, %v1777_v38  ;;  %v1815_v45 = vld [vmem:[%s2325_s3 + $0x10] sm:$0xff]  }
  0x69   :  { %v312_v49 = vmul.f32 0.20019531, %v296_v47  ;;  %v248_v50 = vunpack.c.l.bf16 %v180_v48 }
  0x6b   :  { %v265_v52 = vadd.f32 %v1779_v41, %v248_v50  ;;  %v360_v53 = vmax.f32 %v296_v47, %v312_v49 }
  0x6d   :  { %v281_v54 = vpack.c.bf16 %v265_v52, %v265_v52  ;;  %v376_v55 = vpack.c.bf16 %v360_v53, %v360_v53  ;;  %v1821_v53 = vld [vmem:[%s2325_s3 + $0x28] sm:$0xff]  }
  0x6e   :  { %v130_v59 = vpop.permute.xlu2 %129 }
  0x6f   :  { %v297_v57 = vunpack.c.l.bf16 %v281_v54  ;;  %v408_v58 = vunpack.c.l.bf16 %v376_v55  ;;  %v135_v61 = vperm.slane %v130_v59, %v1777_v38 }
  0x71   :  { %v313_v60 = vmul.f32 0.20019531, %v297_v57  ;;  %v440_v62 = vadd.f32 %v1466_v56, %v408_v58  ;;  %v243_v1 = vunpack.c.l.bf16 %v135_v61  ;;  %v1458_v56 = vunpack.c.l.bf16 %v1815_v45  ;;  %v1525_v61 = vld [vmem:[%s2325_s3 + $0x30] sm:$0xff]  }
  0x73   :  { %v456_v63 = vpack.c.bf16 %v440_v62, %v440_v62  ;;  %v361_v0 = vmax.f32 %v297_v57, %v313_v60  ;;  %v260_v9 = vadd.f32 %v1779_v41, %v243_v1  ;;  %v1471_v1 = vunpack.c.h.bf16 %v1821_v53 }
  0x75   :  { %v1789_v2 = vunpack.c.l.bf16 %v456_v63  ;;  %v377_v3 = vpack.c.bf16 %v361_v0, %v361_v0  ;;  %v276_v15 = vpack.c.bf16 %v260_v9, %v260_v9 }
  0x76   :  { %v112_v5 = vpop.permute.xlu1 %111  ;;  %v193_v13 = vpop.permute.xlu2 %192 }
  0x77   :  { %v94_v6 = vpop.permute.xlu0 %93  ;;  %512 = vmax.xlane.f32.xlu1 %v1789_v2  ;;  %v409_v7 = vunpack.c.l.bf16 %v377_v3  ;;  %v198_v19 = vperm.slane %v193_v13, %v1777_v38  ;;  %v117_v21 = vperm.slane %v112_v5, %v1777_v38  ;;  %v292_v24 = vunpack.c.l.bf16 %v276_v15 }
  0x78   :  { %v99_v8 = vperm.slane %v94_v6, %v1777_v38 }
  0x79   :  { %v441_v10 = vadd.f32 %v1467_v4, %v409_v7  ;;  %v250_v27 = vunpack.c.l.bf16 %v198_v19  ;;  %v241_v29 = vunpack.c.l.bf16 %v117_v21  ;;  %v308_v32 = vmul.f32 0.20019531, %v292_v24 }
  0x7a   :  { %v239_v11 = vunpack.c.l.bf16 %v99_v8  ;;  %v1451_v7 = vunpack.c.h.bf16 %v1804_v28 }
  0x7b   :  { %v457_v12 = vpack.c.bf16 %v441_v10, %v441_v10  ;;  %v267_v37 = vadd.f32 %v1779_v41, %v250_v27  ;;  %v258_v42 = vadd.f32 %v1779_v41, %v241_v29  ;;  %v356_v49 = vmax.f32 %v292_v24, %v308_v32 }
  0x7c   :  { %v256_v14 = vadd.f32 %v1779_v41, %v239_v11 }
  0x7d   :  { %v1795_v16 = vunpack.c.l.bf16 %v457_v12  ;;  %v283_v54 = vpack.c.bf16 %v267_v37, %v267_v37  ;;  %v274_v57 = vpack.c.bf16 %v258_v42, %v258_v42  ;;  %v372_v0 = vpack.c.bf16 %v356_v49, %v356_v49 }
  0x7e   :  { %v272_v17 = vpack.c.bf16 %v256_v14, %v256_v14  ;;  %v121_v18 = vpop.permute.xlu1 %120  ;;  %v148_v46 = vpop.permute.xlu2 %147  ;;  %v1475_v12 = vunpack.c.h.bf16 %v1525_v61 }
  0x7f   :  { %v103_v20 = vpop.permute.xlu0 %102  ;;  %514 = vmax.xlane.f32.xlu2 %v1795_v16  ;;  %v126_v50 = vperm.slane %v121_v18, %v1777_v38  ;;  %v153_v58 = vperm.slane %v148_v46, %v1777_v38  ;;  %v299_v8 = vunpack.c.l.bf16 %v283_v54  ;;  %v290_v13 = vunpack.c.l.bf16 %v274_v57 }
  0x80   :  { %v288_v22 = vunpack.c.l.bf16 %v272_v17  ;;  %v108_v23 = vperm.slane %v103_v20, %v1777_v38  ;;  %v404_v21 = vunpack.c.l.bf16 %v372_v0  ;;  %v1470_v46 = vunpack.c.l.bf16 %v1821_v53 }
  0x81   :  { %v242_v3 = vunpack.c.l.bf16 %v126_v50  ;;  %v245_v14 = vunpack.c.l.bf16 %v153_v58 }
  0x82   :  { %v304_v25 = vmul.f32 0.20019531, %v288_v22  ;;  %v240_v26 = vunpack.c.l.bf16 %v108_v23 }
  0x83   :  { %v262_v32 = vadd.f32 %v1779_v41, %v245_v14 }
  0x84   :  { %v257_v30 = vadd.f32 %v1779_v41, %v240_v26  ;;  %v352_v31 = vmax.f32 %v288_v22, %v304_v25  ;;  %v259_v22 = vadd.f32 %v1779_v41, %v242_v3  ;;  %v1474_v25 = vunpack.c.l.bf16 %v1525_v61 }
  0x85   :  { %v315_v26 = vmul.f32 0.20019531, %v299_v8 }
  0x86   :  { %v273_v33 = vpack.c.bf16 %v257_v30, %v257_v30  ;;  %v211_v34 = vpop.permute.xlu1 %210  ;;  %v368_v35 = vpack.c.bf16 %v352_v31, %v352_v31  ;;  %v1459_v30 = vunpack.c.h.bf16 %v1815_v45  ;;  %v306_v31 = vmul.f32 0.20019531, %v290_v13 }
  0x87   :  { %v216_v39 = vperm.slane %v211_v34, %v1777_v38  ;;  %v202_v40 = vpop.permute.xlu0 %201 }
  0x88   :  { %v207_v43 = vperm.slane %v202_v40, %v1777_v38  ;;  %v400_v44 = vunpack.c.l.bf16 %v368_v35  ;;  %v289_v47 = vunpack.c.l.bf16 %v273_v33  ;;  %v275_v40 = vpack.c.bf16 %v259_v22, %v259_v22 }
  0x89   :  { %v252_v48 = vunpack.c.l.bf16 %v216_v39  ;;  %v436_v39 = vadd.f32 %v1458_v56, %v404_v21  ;;  %v1847_v14 = vmax.f32 %v290_v13, %v306_v31 }
  0x8a   :  { %v251_v51 = vunpack.c.l.bf16 %v207_v43  ;;  %v432_v52 = vadd.f32 %v1450_v36, %v400_v44  ;;  %v305_v62 = vmul.f32 0.20019531, %v289_v47  ;;  %v291_v61 = vunpack.c.l.bf16 %v275_v40 }
  0x8b   :  { %v269_v55 = vadd.f32 %v1779_v41, %v252_v48 }
  0x8c   :  { %v268_v59 = vadd.f32 %v1779_v41, %v251_v51  ;;  %v448_v60 = vpack.c.bf16 %v432_v52, %v432_v52  ;;  %v353_v20 = vmax.f32 %v289_v47, %v305_v62  ;;  %v363_v51 = vmax.f32 %v299_v8, %v315_v26 }
  0x8d   :  { %v285_v63 = vpack.c.bf16 %v269_v55, %v269_v55  ;;  %v278_v52 = vpack.c.bf16 %v262_v32, %v262_v32  ;;  %v452_v26 = vpack.c.bf16 %v436_v39, %v436_v39  ;;  %v1695_v39 = vmov -1.2676506e+30  }
  0x8e   :  { %v284_v4 = vpack.c.bf16 %v268_v59, %v268_v59  ;;  %v184_v5 = vpop.permute.xlu1 %183  ;;  %v1831_v6 = vunpack.c.l.bf16 %v448_v60  ;;  %v369_v37 = vpack.c.bf16 %v353_v20, %v353_v20  ;;  %33 = vst.msk [vmem:[#allocation2 + $0x40] sm:$0xff] %vm24_vm0, %v1695_v39 }
  0x8f   :  { %v301_v9 = vunpack.c.l.bf16 %v285_v63  ;;  %v189_v10 = vperm.slane %v184_v5, %v1777_v38  ;;  %v139_v11 = vpop.permute.xlu0 %138  ;;  %v1865_v40 = vunpack.c.l.bf16 %v452_v26  ;;  %25 = vst.msk [vmem:[#allocation2] sm:$0xff] %vm24_vm0, %v1695_v39 }
  0x90   :  { %v300_v15 = vunpack.c.l.bf16 %v284_v4  ;;  %v144_v17 = vperm.slane %v139_v11, %v1777_v38  ;;  %496 = vmax.xlane.f32.xlu1 %v1831_v6  ;;  %v401_v60 = vunpack.c.l.bf16 %v369_v37  ;;  %26 = vst.msk [vmem:[#allocation2 + $0x8] sm:$0xff] %vm24_vm0, %v1695_v39 }
  0x91   :  { %v317_v18 = vmul.f32 0.20019531, %v301_v9  ;;  %v249_v19 = vunpack.c.l.bf16 %v189_v10  ;;  %27 = vst.msk [vmem:[#allocation2 + $0x10] sm:$0xff] %vm24_vm0, %v1695_v39 }
  0x92   :  { %v316_v23 = vmul.f32 0.20019531, %v300_v15  ;;  %v244_v24 = vunpack.c.l.bf16 %v144_v17  ;;  %28 = vst.msk [vmem:[#allocation2 + $0x18] sm:$0xff] %vm24_vm0, %v1695_v39 }
  0x93   :  { %v266_v27 = vadd.f32 %v1779_v41, %v249_v19  ;;  %v365_v29 = vmax.f32 %v301_v9, %v317_v18  ;;  %v379_v9 = vpack.c.bf16 %v363_v51, %v363_v51  ;;  %v307_v19 = vmul.f32 0.20019531, %v291_v61  ;;  %29 = vst.msk [vmem:[#allocation2 + $0x20] sm:$0xff] %vm24_vm0, %v1695_v39 }
  0x94   :  { %v261_v33 = vadd.f32 %v1779_v41, %v244_v24  ;;  %v364_v34 = vmax.f32 %v300_v15, %v316_v23  ;;  %v294_v23 = vunpack.c.l.bf16 %v278_v52  ;;  %30 = vst.msk [vmem:[#allocation2 + $0x28] sm:$0xff] %vm24_vm0, %v1695_v39 }
  0x95   :  { %v282_v35 = vpack.c.bf16 %v266_v27, %v266_v27  ;;  %v381_v36 = vpack.c.bf16 %v365_v29, %v365_v29  ;;  %v411_v13 = vunpack.c.l.bf16 %v379_v9  ;;  %v355_v37 = vmax.f32 %v291_v61, %v307_v19  ;;  %31 = vst.msk [vmem:[#allocation2 + $0x30] sm:$0xff] %vm24_vm0, %v1695_v39 }
  0x96   :  { %v277_v42 = vpack.c.bf16 %v261_v33, %v261_v33  ;;  %v229_v43 = vpop.permute.xlu1 %228  ;;  %v380_v44 = vpack.c.bf16 %v364_v34, %v364_v34  ;;  %32 = vst.msk [vmem:[#allocation2 + $0x38] sm:$0xff] %vm24_vm0, %v1695_v39 }
  0x97   :  { %v298_v47 = vunpack.c.l.bf16 %v282_v35  ;;  %v234_v48 = vperm.slane %v229_v43, %v1777_v38  ;;  %v220_v49 = vpop.permute.xlu0 %219  ;;  %v413_v50 = vunpack.c.l.bf16 %v381_v36  ;;  %v443_v52 = vadd.f32 %v1471_v1, %v411_v13  ;;  %34 = vst.msk [vmem:[#allocation2 + $0x48] sm:$0xff] %vm24_vm0, %v1695_v39 }
  0x98   :  { %v293_v54 = vunpack.c.l.bf16 %v277_v42  ;;  %v225_v55 = vperm.slane %v220_v49, %v1777_v38  ;;  %v412_v57 = vunpack.c.l.bf16 %v380_v44  ;;  %v370_v44 = vpack.c.bf16 %v1847_v14, %v1847_v14  ;;  %v1520_v49 = vld [vmem:[%s2325_s3 + $0x8] sm:$0xff]   ;;  %35 = vst.msk [vmem:[#allocation2 + $0x50] sm:$0xff] %vm24_vm0, %v1695_v39 }
  0x99   :  { %v314_v58 = vmul.f32 0.20019531, %v298_v47  ;;  %v254_v59 = vunpack.c.l.bf16 %v234_v48  ;;  %v445_v56 = vadd.f32 %v1475_v12, %v413_v50  ;;  %v433_v12 = vadd.f32 %v1451_v7, %v401_v60  ;;  %v1526_v7 = vld [vmem:[%s2325_s3 + $0x38] sm:$0xff]   ;;  %36 = vst.msk [vmem:[#allocation2 + $0x58] sm:$0xff] %vm24_vm0, %v1695_v39 }
  0x9a   :  { %v309_v62 = vmul.f32 0.20019531, %v293_v54  ;;  %v253_v63 = vunpack.c.l.bf16 %v225_v55  ;;  %v444_v0 = vadd.f32 %v1474_v25, %v412_v57  ;;  %v1478_v42 = vunpack.c.l.bf16 %v1526_v7  ;;  %37 = vst.msk [vmem:[#allocation2 + $0x60] sm:$0xff] %vm24_vm0, %v1695_v39 }
  0x9b   :  { %v271_v3 = vadd.f32 %v1779_v41, %v254_v59  ;;  %v461_v4 = vpack.c.bf16 %v445_v56, %v445_v56  ;;  %v362_v5 = vmax.f32 %v298_v47, %v314_v58  ;;  %v449_v32 = vpack.c.bf16 %v433_v12, %v433_v12  ;;  %38 = vst.msk [vmem:[#allocation2 + $0x68] sm:$0xff] %vm24_vm0, %v1695_v39 }
  0x9c   :  { %v270_v8 = vadd.f32 %v1779_v41, %v253_v63  ;;  %v460_v10 = vpack.c.bf16 %v444_v0, %v444_v0  ;;  %v357_v11 = vmax.f32 %v293_v54, %v309_v62  ;;  %v310_v47 = vmul.f32 0.20019531, %v294_v23  ;;  %39 = vst.msk [vmem:[#allocation2 + $0x70] sm:$0xff] %vm24_vm0, %v1695_v39 }
  0x9d   :  { %v287_v15 = vpack.c.bf16 %v271_v3, %v271_v3  ;;  %v1849_v17 = vunpack.c.l.bf16 %v461_v4  ;;  %v378_v18 = vpack.c.bf16 %v362_v5, %v362_v5  ;;  %v1877_v50 = vunpack.c.l.bf16 %v449_v32  ;;  %40 = vst.msk [vmem:[#allocation2 + $0x78] sm:$0xff] %vm24_vm0, %v1695_v39 }
  0x9e   :  { %v286_v20 = vpack.c.bf16 %v270_v8, %v270_v8  ;;  %v1853_v21 = vunpack.c.l.bf16 %v460_v10  ;;  %v373_v22 = vpack.c.bf16 %v357_v11, %v357_v11  ;;  %v371_v58 = vpack.c.bf16 %v355_v37, %v355_v37 }
  0x9f   :  { %v303_v24 = vunpack.c.l.bf16 %v287_v15  ;;  %v157_v25 = vpop.permute.xlu0 %156  ;;  %522 = vmax.xlane.f32.xlu2 %v1849_v17  ;;  %v410_v33 = vunpack.c.l.bf16 %v378_v18  ;;  %v1454_v59 = vunpack.c.l.bf16 %v1520_v49  ;;  %v1455_v56 = vunpack.c.h.bf16 %v1520_v49 }
  0xa0   :  { %v302_v27 = vunpack.c.l.bf16 %v286_v20  ;;  %v162_v29 = vperm.slane %v157_v25, %v1777_v38  ;;  %520 = vmax.xlane.f32.xlu0 %v1853_v21  ;;  %v405_v28 = vunpack.c.l.bf16 %v373_v22  ;;  %v459_v61 = vpack.c.bf16 %v443_v52, %v443_v52  ;;  %v1522_v20 = vld [vmem:[%s2325_s3 + $0x18] sm:$0xff]  }
  0xa1   :  { %v319_v31 = vmul.f32 0.20019531, %v303_v24  ;;  %v442_v51 = vadd.f32 %v1470_v46, %v410_v33  ;;  %v1479_v46 = vunpack.c.h.bf16 %v1526_v7  ;;  %v358_v63 = vmax.f32 %v294_v23, %v310_v47 }
  0xa2   :  { %v318_v34 = vmul.f32 0.20019531, %v302_v27  ;;  %v246_v35 = vunpack.c.l.bf16 %v162_v29  ;;  %v437_v36 = vadd.f32 %v1459_v30, %v405_v28  ;;  %v402_v4 = vunpack.c.l.bf16 %v370_v44 }
  0xa3   :  { %v367_v43 = vmax.f32 %v303_v24, %v319_v31  ;;  %v458_v60 = vpack.c.bf16 %v442_v51, %v442_v51  ;;  %v403_v5 = vunpack.c.l.bf16 %v371_v58  ;;  %v1906_v11 = vunpack.c.l.bf16 %v459_v61  ;;  %v1952_v51 = vld [vmem:[#allocation2 + $0x48] sm:$0xff] }
  0xa4   :  { %v263_v48 = vadd.f32 %v1779_v41, %v246_v35  ;;  %v453_v45 = vpack.c.bf16 %v437_v36, %v437_v36  ;;  %v366_v30 = vmax.f32 %v302_v27, %v318_v34  ;;  %v374_v15 = vpack.c.bf16 %v358_v63, %v358_v63 }
  0xa5   :  { %v383_v54 = vpack.c.bf16 %v367_v43, %v367_v43  ;;  %v1904_v10 = vunpack.c.l.bf16 %v458_v60  ;;  %v434_v18 = vadd.f32 %v1454_v59, %v402_v4  ;;  %v435_v19 = vadd.f32 %v1455_v56, %v403_v5  ;;  %v1941_v43 = vld [vmem:[#allocation2 + $0x40] sm:$0xff] }
  0xa6   :  { %v279_v41 = vpack.c.bf16 %v263_v48, %v263_v48  ;;  %v1885_v55 = vunpack.c.l.bf16 %v453_v45  ;;  %v382_v57 = vpack.c.bf16 %v366_v30, %v366_v30  ;;  %v1462_v24 = vunpack.c.l.bf16 %v1522_v20 }
  0xa7   :  { %498 = vmax.xlane.f32.xlu2 %v1877_v50  ;;  %v415_v62 = vunpack.c.l.bf16 %v383_v54  ;;  %v406_v25 = vunpack.c.l.bf16 %v374_v15  ;;  %v450_v26 = vpack.c.bf16 %v434_v18, %v434_v18  ;;  %v451_v13 = vpack.c.bf16 %v435_v19, %v435_v19 }
  0xa8   :  { %v295_v53 = vunpack.c.l.bf16 %v279_v41  ;;  %504 = vmax.xlane.f32.xlu0 %v1865_v40  ;;  %506 = vmax.xlane.f32.xlu1 %v1885_v55  ;;  %v414_v1 = vunpack.c.l.bf16 %v382_v57  ;;  %v1463_v27 = vunpack.c.h.bf16 %v1522_v20 }
  0xa9   :  { %v447_v14 = vadd.f32 %v1479_v46, %v415_v62  ;;  %v438_v7 = vadd.f32 %v1462_v24, %v406_v25  ;;  %v1928_v31 = vunpack.c.l.bf16 %v450_v26  ;;  %v1930_v32 = vunpack.c.l.bf16 %v451_v13  ;;  %v1970_v62 = vld [vmem:[#allocation2 + $0x68] sm:$0xff] }
  0xaa   :  { %v311_v0 = vmul.f32 0.20019531, %v295_v53  ;;  %v446_v3 = vadd.f32 %v1478_v42, %v414_v1  ;;  %v1992_v24 = vld [vmem:[#allocation2 + $0x8] sm:$0xff] }
  0xab   :  { %v463_v23 = vpack.c.bf16 %v447_v14, %v447_v14  ;;  %v454_v34 = vpack.c.bf16 %v438_v7, %v438_v7 }
  0xac   :  { %v462_v9 = vpack.c.bf16 %v446_v3, %v446_v3  ;;  %v359_v8 = vmax.f32 %v295_v53, %v311_v0  ;;  %v1963_v53 = vld [vmem:[#allocation2] sm:$0xff] }
  0xad   :  { %v1926_v28 = vunpack.c.l.bf16 %v463_v23  ;;  %v1935_v36 = vunpack.c.l.bf16 %v454_v34  ;;  %v1972_v3 = vld [vmem:[#allocation2 + $0x60] sm:$0xff] }
  0xae   :  { %v1910_v12 = vunpack.c.l.bf16 %v462_v9  ;;  %v375_v22 = vpack.c.bf16 %v359_v8, %v359_v8 }
  0xaf   :  { %516 = vmax.xlane.f32.xlu2 %v1904_v10 }
  0xb0   :  { %518 = vmax.xlane.f32.xlu0 %v1906_v11  ;;  %524 = vmax.xlane.f32.xlu1 %v1910_v12  ;;  %v407_v29 = vunpack.c.l.bf16 %v375_v22 }
  0xb2   :  { %v439_v33 = vadd.f32 %v1463_v27, %v407_v29  ;;  %v1994_v27 = vld [vmem:[#allocation2 + $0x28] sm:$0xff]  ;;  %v1996_v29 = vld [vmem:[#allocation2 + $0x20] sm:$0xff] }
  0xb4   :  { %v455_v35 = vpack.c.bf16 %v439_v33, %v439_v33 }
  0xb6   :  { %v1937_v37 = vunpack.c.l.bf16 %v455_v35 }
  0xb7   :  { %526 = vmax.xlane.f32.xlu2 %v1926_v28 }
  0xb8   :  { %500 = vmax.xlane.f32.xlu0 %v1928_v31  ;;  %502 = vmax.xlane.f32.xlu1 %v1930_v32 }
  0xbf   :  { %508 = vmax.xlane.f32.xlu2 %v1935_v36 }
  0xc0   :  { %510 = vmax.xlane.f32.xlu0 %v1937_v37 }
  0xea   :  { %v513_v39 = vpop.xlane.xlu1 %512 }
  0xeb   :  { %v536_v42 = vpack.c.bf16 %v513_v39, %v513_v39 }
  0xed   :  { %v552_v44 = vunpack.c.l.bf16 %v536_v42 }
  0xef   :  { %v1944_v47 = vmax.f32 %v1941_v43, %v552_v44 }
  0xf1   :  { %v584_v48 = vsub.f32 %v1941_v43, %v1944_v47  ;;  %1146 = vst.msk [vmem:[#allocation2 + $0x40] sm:$0xff] %vm24_vm0, %v1944_v47  ;;  %v632_v45 = vpack.c.bf16 %v1944_v47, %v1944_v47  ;;  %v1443_v47 = vld [vmem:[%s2326_s2 + $0x18] sm:$0xff] }
  0xf2   :  { %v515_v30 = vpop.xlane.xlu2 %514 }
  0xf3   :  { %v537_v49 = vpack.c.bf16 %v515_v30, %v515_v30  ;;  %714 = vperm.xlu1 %1562, %v632_v45  }
  0xf5   :  { %v553_v52 = vunpack.c.l.bf16 %v537_v49 }
  0xf7   :  { %v1955_v54 = vmax.f32 %v1952_v51, %v553_v52 }
  0xf9   :  { %v585_v41 = vsub.f32 %v1952_v51, %v1955_v54  ;;  %1147 = vst.msk [vmem:[#allocation2 + $0x48] sm:$0xff] %vm24_vm0, %v1955_v54  ;;  %v633_v57 = vpack.c.bf16 %v1955_v54, %v1955_v54  ;;  %v1441_v54 = vld [vmem:[%s2326_s2 + $0x8] sm:$0xff] }
  0xfb   :  { %723 = vperm.xlu2 %1563, %v633_v57  }
 0x103   :  { %v497_v58 = vpop.xlane.xlu1 %496 }
 0x104   :  { %v528_v59 = vpack.c.bf16 %v497_v58, %v497_v58  ;;  %v2019_v58 = vld [vmem:[#allocation2 + $0x50] sm:$0xff] }
 0x106   :  { %v544_v1 = vunpack.c.l.bf16 %v528_v59 }
 0x108   :  { %v1966_v46 = vmax.f32 %v1963_v53, %v544_v1 }
 0x10a   :  { %1138 = vst.msk [vmem:[#allocation2] sm:$0xff] %vm24_vm0, %v1966_v46  ;;  %v624_v45 = vpack.c.bf16 %v1966_v46, %v1966_v46 }
 0x112   :  { %v523_v56 = vpop.xlane.xlu2 %522 }
 0x113   :  { %v541_v60 = vpack.c.bf16 %v523_v56, %v523_v56  ;;  %v521_v61 = vpop.xlane.xlu0 %520 }
 0x114   :  { %v540_v63 = vpack.c.bf16 %v521_v61, %v521_v61  ;;  %v2023_v61 = vld [vmem:[#allocation2 + $0x58] sm:$0xff] }
 0x115   :  { %v557_v0 = vunpack.c.l.bf16 %v541_v60  ;;  %v2021_v60 = vld [vmem:[#allocation2 + $0x70] sm:$0xff] }
 0x116   :  { %v556_v4 = vunpack.c.l.bf16 %v540_v63 }
 0x117   :  { %v1975_v5 = vmax.f32 %v1970_v62, %v557_v0 }
 0x118   :  { %v1978_v9 = vmax.f32 %v1972_v3, %v556_v4 }
 0x119   :  { %1151 = vst.msk [vmem:[#allocation2 + $0x68] sm:$0xff] %vm24_vm0, %v1975_v5  ;;  %v637_v14 = vpack.c.bf16 %v1975_v5, %v1975_v5 }
 0x11a   :  { %1150 = vst.msk [vmem:[#allocation2 + $0x60] sm:$0xff] %vm24_vm0, %v1978_v9  ;;  %v499_v18 = vpop.xlane.xlu2 %498  ;;  %v636_v19 = vpack.c.bf16 %v1978_v9, %v1978_v9 }
 0x11b   :  { %v529_v20 = vpack.c.bf16 %v499_v18, %v499_v18  ;;  %v507_v22 = vpop.xlane.xlu1 %506  ;;  %v505_v23 = vpop.xlane.xlu0 %504  ;;  %759 = vperm.xlu1 %1562, %v637_v14  }
 0x11c   :  { %v533_v25 = vpack.c.bf16 %v507_v22, %v507_v22  ;;  %v532_v26 = vpack.c.bf16 %v505_v23, %v505_v23  ;;  %750 = vperm.xlu0 %1561, %v636_v19  }
 0x11d   :  { %v545_v13 = vunpack.c.l.bf16 %v529_v20 }
 0x11e   :  { %v549_v7 = vunpack.c.l.bf16 %v533_v25  ;;  %v548_v33 = vunpack.c.l.bf16 %v532_v26 }
 0x11f   :  { %v1999_v34 = vmax.f32 %v1992_v24, %v545_v13 }
 0x120   :  { %v2002_v35 = vmax.f32 %v1994_v27, %v549_v7  ;;  %v2005_v39 = vmax.f32 %v1996_v29, %v548_v33  ;;  %v2046_v7 = vld [vmem:[#allocation2 + $0x78] sm:$0xff] }
 0x121   :  { %1139 = vst.msk [vmem:[#allocation2 + $0x8] sm:$0xff] %vm24_vm0, %v1999_v34  ;;  %v625_v42 = vpack.c.bf16 %v1999_v34, %v1999_v34 }
 0x122   :  { %1143 = vst.msk [vmem:[#allocation2 + $0x28] sm:$0xff] %vm24_vm0, %v2002_v35  ;;  %v517_v44 = vpop.xlane.xlu2 %516  ;;  %v628_v30 = vpack.c.bf16 %v2005_v39, %v2005_v39  ;;  %v629_v22 = vpack.c.bf16 %v2002_v35, %v2002_v35 }
 0x123   :  { %1142 = vst.msk [vmem:[#allocation2 + $0x20] sm:$0xff] %vm24_vm0, %v2005_v39  ;;  %v538_v49 = vpack.c.bf16 %v517_v44, %v517_v44  ;;  %v525_v52 = vpop.xlane.xlu1 %524  ;;  %v519_v57 = vpop.xlane.xlu0 %518  ;;  %651 = vperm.xlu2 %1563, %v625_v42  }
 0x124   :  { %v542_v59 = vpack.c.bf16 %v525_v52, %v525_v52  ;;  %v539_v1 = vpack.c.bf16 %v519_v57, %v519_v57  ;;  %642 = vperm.xlu0 %1561, %v624_v45   ;;  %678 = vperm.xlu1 %1562, %v628_v30   ;;  %v467_v45 = vld [vmem:[#allocation2 + $0x18] sm:$0xff]  ;;  %v466_v30 = vld [vmem:[#allocation2 + $0x10] sm:$0xff] }
 0x125   :  { %v554_v56 = vunpack.c.l.bf16 %v538_v49 }
 0x126   :  { %v558_v63 = vunpack.c.l.bf16 %v542_v59  ;;  %v555_v0 = vunpack.c.l.bf16 %v539_v1 }
 0x127   :  { %v2026_v4 = vmax.f32 %v2019_v58, %v554_v56 }
 0x128   :  { %v2029_v14 = vmax.f32 %v2021_v60, %v558_v63  ;;  %v2032_v18 = vmax.f32 %v2023_v61, %v555_v0 }
 0x129   :  { %1148 = vst.msk [vmem:[#allocation2 + $0x50] sm:$0xff] %vm24_vm0, %v2026_v4  ;;  %v634_v19 = vpack.c.bf16 %v2026_v4, %v2026_v4 }
 0x12a   :  { %1152 = vst.msk [vmem:[#allocation2 + $0x70] sm:$0xff] %vm24_vm0, %v2029_v14  ;;  %v527_v20 = vpop.xlane.xlu2 %526  ;;  %v635_v23 = vpack.c.bf16 %v2032_v18, %v2032_v18  ;;  %v638_v0 = vpack.c.bf16 %v2029_v14, %v2029_v14  ;;  %v587_v43 = vsub.f32 %v2023_v61, %v2032_v18  ;;  %v1442_v61 = vld [vmem:[%s2326_s2 + $0x10] sm:$0xff]  ;;  %v590_v51 = vsub.f32 %v2021_v60, %v2029_v14  ;;  %v1440_v60 = vld [vmem:[%s2326_s2] sm:$0xff] }
 0x12b   :  { %1149 = vst.msk [vmem:[#allocation2 + $0x58] sm:$0xff] %vm24_vm0, %v2032_v18  ;;  %v543_v25 = vpack.c.bf16 %v527_v20, %v527_v20  ;;  %v503_v26 = vpop.xlane.xlu1 %502  ;;  %v501_v13 = vpop.xlane.xlu0 %500  ;;  %732 = vperm.xlu2 %1563, %v634_v19   ;;  %v576_v20 = vsub.f32 %v1963_v53, %v1966_v46 }
 0x12c   :  { %v531_v33 = vpack.c.bf16 %v503_v26, %v503_v26  ;;  %v530_v42 = vpack.c.bf16 %v501_v13, %v501_v13  ;;  %687 = vperm.xlu0 %1561, %v629_v22   ;;  %741 = vperm.xlu1 %1562, %v635_v23   ;;  %v470_v26 = vld [vmem:[#allocation2 + $0x30] sm:$0xff] }
 0x12d   :  { %v559_v44 = vunpack.c.l.bf16 %v543_v25  ;;  %v577_v25 = vsub.f32 %v1992_v24, %v1999_v34  ;;  %v581_v34 = vsub.f32 %v1994_v27, %v2002_v35 }
 0x12e   :  { %v547_v49 = vunpack.c.l.bf16 %v531_v33  ;;  %v546_v52 = vunpack.c.l.bf16 %v530_v42 }
 0x12f   :  { %v2049_v57 = vmax.f32 %v2046_v7, %v559_v44  ;;  %v471_v44 = vld [vmem:[#allocation2 + $0x38] sm:$0xff]  ;;  %v594_v8 = vmul.f32 1.442695, %v577_v25  ;;  %v602_v27 = vmul.f32 1.442695, %v581_v34 }
 0x130   :  { %v563_v59 = vmax.f32 %v467_v45, %v547_v49  ;;  %v562_v1 = vmax.f32 %v466_v30, %v546_v52  ;;  %v592_v52 = vmul.f32 1.442695, %v576_v20 }
 0x131   :  { %1153 = vst.msk [vmem:[#allocation2 + $0x78] sm:$0xff] %vm24_vm0, %v2049_v57  ;;  %v639_v56 = vpack.c.bf16 %v2049_v57, %v2049_v57 }
 0x132   :  { %1141 = vst.msk [vmem:[#allocation2 + $0x18] sm:$0xff] %vm24_vm0, %v563_v59  ;;  %v509_v63 = vpop.xlane.xlu2 %508  ;;  %v626_v19 = vpack.c.bf16 %v562_v1, %v562_v1  ;;  %v578_v33 = vsub.f32 %v466_v30, %v562_v1  ;;  %1565 = vpow2.f32 %v592_v52  ;;  %v580_v30 = vsub.f32 %v1996_v29, %v2005_v39 }
 0x133   :  { %1140 = vst.msk [vmem:[#allocation2 + $0x10] sm:$0xff] %vm24_vm0, %v562_v1  ;;  %v534_v22 = vpack.c.bf16 %v509_v63, %v509_v63  ;;  %v511_v23 = vpop.xlane.xlu0 %510  ;;  %777 = vperm.xlu2 %1563, %v639_v56   ;;  %v627_v56 = vpack.c.bf16 %v563_v59, %v563_v59  ;;  %1567 = vpow2.f32 %v594_v8  ;;  %v1447_v1 = vld [vmem:[%s2326_s2 + $0x38] sm:$0xff] }
 0x134   :  { %v535_v13 = vpack.c.bf16 %v511_v23, %v511_v23  ;;  %768 = vperm.xlu0 %1561, %v638_v0   ;;  %660 = vperm.xlu1 %1562, %v626_v19   ;;  %v596_v46 = vmul.f32 1.442695, %v578_v33  ;;  %v579_v0 = vsub.f32 %v467_v45, %v563_v59  ;;  %v1446_v19 = vld [vmem:[%s2326_s2 + $0x30] sm:$0xff]  ;;  %v600_v8 = vmul.f32 1.442695, %v580_v30  ;;  %v1445_v59 = vld [vmem:[%s2326_s2 + $0x28] sm:$0xff] }
 0x135   :  { %v550_v42 = vunpack.c.l.bf16 %v534_v22  ;;  %1535 = vmatpush.bf16.msra.mxu2 %v1447_v1  ;;  %1536 = vmatpush.bf16.msra.mxu3 %v1447_v1  ;;  %v608_v23 = vmul.f32 1.442695, %v584_v48  ;;  %v610_v48 = vmul.f32 1.442695, %v585_v41  ;;  %v2329_v41 = vsub.f32 %v1970_v62, %v1975_v5 }
 0x136   :  { %v551_v49 = vunpack.c.l.bf16 %v535_v13  ;;  %1569 = vpow2.f32 %v596_v46  ;;  %1056 = vmatpush.bf16.msra.mxu0 %v1447_v1  ;;  %1534 = vmatpush.bf16.msra.mxu1 %v1447_v1  ;;  %v598_v29 = vmul.f32 1.442695, %v579_v0  ;;  %v2330_v46 = vsub.f32 %v1972_v3, %v1978_v9 }
 0x137   :  { %v566_v15 = vmax.f32 %v470_v26, %v550_v42  ;;  %1571 = vpow2.f32 %v602_v27  ;;  %v591_v62 = vsub.f32 %v2046_v7, %v2049_v57 }
 0x138   :  { %v567_v53 = vmax.f32 %v471_v44, %v551_v49  ;;  %v1566_v35 = vpop.eup %1565  ;;  %1573 = vpow2.f32 %v600_v8 }
 0x139   :  { %1144 = vst.msk [vmem:[#allocation2 + $0x30] sm:$0xff] %vm24_vm0, %v566_v15  ;;  %v630_v63 = vpack.c.bf16 %v566_v15, %v566_v15  ;;  %v1568_v39 = vpop.eup %1567  ;;  %1538 = vmatpush.bf16.msra.mxu2 %v1446_v19  ;;  %1539 = vmatpush.bf16.msra.mxu3 %v1446_v19  ;;  %1575 = vpow2.f32 %v598_v29  ;;  %v582_v22 = vsub.f32 %v470_v26, %v566_v15  ;;  %v614_v26 = vmul.f32 1.442695, %v587_v43 }
 0x13a   :  { %1145 = vst.msk [vmem:[#allocation2 + $0x38] sm:$0xff] %vm24_vm0, %v567_v53  ;;  %v631_v24 = vpack.c.bf16 %v567_v53, %v567_v53  ;;  %1057 = vmatpush.bf16.msra.mxu0 %v1446_v19  ;;  %v583_v45 = vsub.f32 %v471_v44, %v567_v53  ;;  %1537 = vmatpush.bf16.msra.mxu1 %v1446_v19  ;;  %v1444_v44 = vld [vmem:[%s2326_s2 + $0x20] sm:$0xff]  ;;  %1577 = vpow2.f32 %v608_v23  ;;  %v618_v53 = vmul.f32 1.442695, %v2329_v41 }
 0x13b   :  { %696 = vperm.xlu2 %1563, %v630_v63   ;;  %v604_v33 = vmul.f32 1.442695, %v582_v22  ;;  %v586_v15 = vsub.f32 %v2019_v58, %v2026_v4  ;;  %v616_v63 = vmul.f32 1.442695, %v2330_v46  ;;  %v622_v9 = vmul.f32 1.442695, %v591_v62 }
 0x13c   :  { %669 = vperm.xlu0 %1561, %v627_v56   ;;  %705 = vperm.xlu1 %1562, %v631_v24   ;;  %v1570_v20 = vpop.eup %1569  ;;  %v606_v25 = vmul.f32 1.442695, %v583_v45  ;;  %v620_v24 = vmul.f32 1.442695, %v590_v51 }
 0x13d   :  { %1541 = vmatpush.bf16.msra.mxu2 %v1445_v59  ;;  %1542 = vmatpush.bf16.msra.mxu3 %v1445_v59  ;;  %v1572_v13 = vpop.eup %1571  ;;  %v612_v58 = vmul.f32 1.442695, %v586_v15 }
 0x13e   :  { %1058 = vmatpush.bf16.msra.mxu0 %v1445_v59  ;;  %1540 = vmatpush.bf16.msra.mxu1 %v1445_v59  ;;  %v1574_v42 = vpop.eup %1573  ;;  %1579 = vpow2.f32 %v606_v25 }
 0x13f   :  { %v1576_v49 = vpop.eup %1575  ;;  %1581 = vpow2.f32 %v604_v33 }
 0x140   :  { %v1578_v4 = vpop.eup %1577  ;;  %1583 = vpow2.f32 %v610_v48 }
 0x141   :  { %1544 = vmatpush.bf16.msra.mxu2 %v1444_v44  ;;  %1545 = vmatpush.bf16.msra.mxu3 %v1444_v44  ;;  %1585 = vpow2.f32 %v612_v58 }
 0x142   :  { %1059 = vmatpush.bf16.msra.mxu0 %v1444_v44  ;;  %1543 = vmatpush.bf16.msra.mxu1 %v1444_v44  ;;  %1587 = vpow2.f32 %v614_v26 }
 0x143   :  { %903 = vperm.xlu2 %1563, %v1568_v39   ;;  %1589 = vpow2.f32 %v618_v53 }
 0x144   :  { %898 = vperm.xlu0 %1561, %v1566_v35   ;;  %908 = vperm.xlu1 %1562, %v1570_v20   ;;  %v1580_v52 = vpop.eup %1579  ;;  %1591 = vpow2.f32 %v616_v63 }
 0x145   :  { %1547 = vmatpush.bf16.msra.mxu2 %v1443_v47  ;;  %1548 = vmatpush.bf16.msra.mxu3 %v1443_v47  ;;  %v1582_v18 = vpop.eup %1581  ;;  %1593 = vpow2.f32 %v620_v24 }
 0x146   :  { %1060 = vmatpush.bf16.msra.mxu0 %v1443_v47  ;;  %1546 = vmatpush.bf16.msra.mxu1 %v1443_v47  ;;  %v1584_v56 = vpop.eup %1583  ;;  %1595 = vpow2.f32 %v622_v9 }
 0x147   :  { %v1586_v14 = vpop.eup %1585 }
 0x148   :  { %v1588_v34 = vpop.eup %1587 }
 0x149   :  { %1550 = vmatpush.bf16.msra.mxu2 %v1442_v61  ;;  %1551 = vmatpush.bf16.msra.mxu3 %v1442_v61  ;;  %v1590_v5 = vpop.eup %1589 }
 0x14a   :  { %1061 = vmatpush.bf16.msra.mxu0 %v1442_v61  ;;  %1549 = vmatpush.bf16.msra.mxu1 %v1442_v61  ;;  %v1592_v30 = vpop.eup %1591 }
 0x14b   :  { %918 = vperm.xlu2 %1563, %v1574_v42   ;;  %v1594_v0 = vpop.eup %1593 }
 0x14c   :  { %913 = vperm.xlu0 %1561, %v1576_v49   ;;  %923 = vperm.xlu1 %1562, %v1572_v13   ;;  %v1596_v29 = vpop.eup %1595 }
 0x14d   :  { %1553 = vmatpush.bf16.msra.mxu2 %v1441_v54  ;;  %1554 = vmatpush.bf16.msra.mxu3 %v1441_v54 }
 0x14e   :  { %1062 = vmatpush.bf16.msra.mxu0 %v1441_v54  ;;  %1552 = vmatpush.bf16.msra.mxu1 %v1441_v54 }
 0x151   :  { %1556 = vmatpush.bf16.msra.mxu2 %v1440_v60  ;;  %1557 = vmatpush.bf16.msra.mxu3 %v1440_v60 }
 0x152   :  { %1063 = vmatpush.bf16.msra.mxu0 %v1440_v60  ;;  %1555 = vmatpush.bf16.msra.mxu1 %v1440_v60 }
 0x153   :  { %933 = vperm.xlu2 %1563, %v1580_v52  }
 0x154   :  { %928 = vperm.xlu0 %1561, %v1582_v18   ;;  %938 = vperm.xlu1 %1562, %v1578_v4  }
 0x155   :  { %v724_v3 = vpop.permute.xlu2 %723 }
 0x156   :  { %v729_v1 = vperm.slane %v724_v3, %v1777_v38 }
 0x158   :  { %v793_v27 = vunpack.c.l.bf16 %v729_v1 }
 0x15a   :  { %v809_v57 = vsub.f32 %v1795_v16, %v793_v27 }
 0x15b   :  { %948 = vperm.xlu2 %1563, %v1586_v14  }
 0x15c   :  { %943 = vperm.xlu0 %1561, %v1584_v56   ;;  %953 = vperm.xlu1 %1562, %v1588_v34  }
 0x163   :  { %963 = vperm.xlu2 %1563, %v1590_v5  }
 0x164   :  { %958 = vperm.xlu0 %1561, %v1592_v30   ;;  %968 = vperm.xlu1 %1562, %v1594_v0  }
 0x165   :  { %v715_v19 = vpop.permute.xlu1 %714 }
 0x166   :  { %v720_v8 = vperm.slane %v715_v19, %v1777_v38 }
 0x168   :  { %v792_v7 = vunpack.c.l.bf16 %v720_v8 }
 0x16a   :  { %v808_v35 = vsub.f32 %v1789_v2, %v792_v7 }
 0x16c   :  { %v820_v39 = vpack.c.bf16 %v809_v57, %v808_v35  ;;  %973 = vperm.xlu0 %1561, %v1596_v29  }
 0x16e   :  { %v832_v20 = vunpack.c.l.bf16 %v820_v39  ;;  %v833_v45 = vunpack.c.h.bf16 %v820_v39 }
 0x170   :  { %v856_v59 = vmul.f32 1.442695, %v832_v20  ;;  %v858_v22 = vmul.f32 1.442695, %v833_v45 }
 0x172   :  { %1597 = vpow2.f32 %v856_v59 }
 0x173   :  { %1599 = vpow2.f32 %v858_v22 }
 0x178   :  { %v1598_v23 = vpop.eup %1597 }
 0x179   :  { %v1600_v25 = vpop.eup %1599 }
 0x17a   :  { %v876_v13 = vpack.c.bf16 %v1600_v25, %v1598_v23 }
 0x17c   :  { %1084 = vmatmul.bf16.vlgmr.msra.gmra.mxu2 %v876_v13 }
 0x17d   :  { %v652_v33 = vpop.permute.xlu2 %651 }
 0x17e   :  { %v657_v47 = vperm.slane %v652_v33, %v1777_v38 }
 0x180   :  { %v785_v61 = vunpack.c.l.bf16 %v657_v47 }
 0x182   :  { %v801_v56 = vsub.f32 %v1877_v50, %v785_v61 }
 0x185   :  { %v733_v48 = vpop.permute.xlu2 %732 }
 0x186   :  { %v738_v63 = vperm.slane %v733_v48, %v1777_v38 }
 0x188   :  { %v794_v14 = vunpack.c.l.bf16 %v738_v63 }
 0x18d   :  { %v760_v42 = vpop.permute.xlu1 %759  ;;  %v778_v24 = vpop.permute.xlu2 %777 }
 0x18e   :  { %v765_v44 = vperm.slane %v760_v42, %v1777_v38  ;;  %v751_v16 = vpop.permute.xlu0 %750  ;;  %v783_v20 = vperm.slane %v778_v24, %v1777_v38 }
 0x18f   :  { %v756_v2 = vperm.slane %v751_v16, %v1777_v38 }
 0x190   :  { %v797_v49 = vunpack.c.l.bf16 %v765_v44 }
 0x191   :  { %v796_v15 = vunpack.c.l.bf16 %v756_v2 }
 0x192   :  { %v813_v43 = vsub.f32 %v1849_v17, %v797_v49 }
 0x193   :  { %v812_v58 = vsub.f32 %v1853_v21, %v796_v15 }
 0x195   :  { %v822_v4 = vpack.c.bf16 %v813_v43, %v812_v58  ;;  %v697_v25 = vpop.permute.xlu2 %696 }
 0x196   :  { %v679_v26 = vpop.permute.xlu1 %678  ;;  %v643_v52 = vpop.permute.xlu0 %642  ;;  %v702_v15 = vperm.slane %v697_v25, %v1777_v38 }
 0x197   :  { %v836_v18 = vunpack.c.l.bf16 %v822_v4  ;;  %v837_v51 = vunpack.c.h.bf16 %v822_v4  ;;  %v648_v54 = vperm.slane %v643_v52, %v1777_v38  ;;  %v684_v17 = vperm.slane %v679_v26, %v1777_v38 }
 0x198   :  { %v790_v52 = vunpack.c.l.bf16 %v702_v15 }
 0x199   :  { %v864_v41 = vmul.f32 1.442695, %v836_v18  ;;  %v866_v53 = vmul.f32 1.442695, %v837_v51  ;;  %v784_v46 = vunpack.c.l.bf16 %v648_v54  ;;  %v788_v34 = vunpack.c.l.bf16 %v684_v17 }
 0x19b   :  { %1601 = vpow2.f32 %v864_v41  ;;  %v800_v21 = vsub.f32 %v1831_v6, %v784_v46  ;;  %v810_v6 = vsub.f32 %v1904_v10, %v794_v14  ;;  %v804_v57 = vsub.f32 %v1865_v40, %v788_v34 }
 0x19c   :  { %1603 = vpow2.f32 %v866_v53  ;;  %v799_v40 = vunpack.c.l.bf16 %v783_v20 }
 0x19d   :  { %v816_v60 = vpack.c.bf16 %v801_v56, %v800_v21 }
 0x19e   :  { %v742_v62 = vpop.permute.xlu1 %741  ;;  %v688_v3 = vpop.permute.xlu0 %687  ;;  %v815_v4 = vsub.f32 %v1926_v28, %v799_v40 }
 0x19f   :  { %v824_v5 = vunpack.c.l.bf16 %v816_v60  ;;  %v825_v9 = vunpack.c.h.bf16 %v816_v60  ;;  %v747_v30 = vperm.slane %v742_v62, %v1777_v38  ;;  %v693_v1 = vperm.slane %v688_v3, %v1777_v38 }
 0x1a1   :  { %v1602_v0 = vpop.eup %1601  ;;  %v840_v19 = vmul.f32 1.442695, %v824_v5  ;;  %v842_v27 = vmul.f32 1.442695, %v825_v9  ;;  %v795_v50 = vunpack.c.l.bf16 %v747_v30  ;;  %v789_v8 = vunpack.c.l.bf16 %v693_v1 }
 0x1a2   :  { %v1604_v7 = vpop.eup %1603 }
 0x1a3   :  { %1605 = vpow2.f32 %v840_v19  ;;  %v811_v35 = vsub.f32 %v1906_v11, %v795_v50  ;;  %v805_v29 = vsub.f32 %v1885_v55, %v789_v8  ;;  %v878_v39 = vpack.c.bf16 %v1604_v7, %v1602_v0 }
 0x1a4   :  { %1607 = vpow2.f32 %v842_v27 }
 0x1a5   :  { %v821_v45 = vpack.c.bf16 %v811_v35, %v810_v6  ;;  %v818_v59 = vpack.c.bf16 %v805_v29, %v804_v57  ;;  %1094 = vmatmul.bf16.vlgmr.msra.gmra.mxu3 %v878_v39 }
 0x1a6   :  { %v661_v22 = vpop.permute.xlu1 %660  ;;  %v769_v23 = vpop.permute.xlu0 %768 }
 0x1a7   :  { %v834_v13 = vunpack.c.l.bf16 %v821_v45  ;;  %v835_v33 = vunpack.c.h.bf16 %v821_v45  ;;  %v828_v10 = vunpack.c.l.bf16 %v818_v59  ;;  %v829_v42 = vunpack.c.h.bf16 %v818_v59 }
 0x1a8   :  { %v774_v44 = vperm.slane %v769_v23, %v1777_v38  ;;  %v666_v48 = vperm.slane %v661_v22, %v1777_v38  ;;  %v1173_v23 = vlaneseq }
 0x1a9   :  { %v1606_v11 = vpop.eup %1605  ;;  %v860_v16 = vmul.f32 1.442695, %v834_v13  ;;  %v862_v55 = vmul.f32 1.442695, %v835_v33  ;;  %v848_v2 = vmul.f32 1.442695, %v828_v10 }
 0x1aa   :  { %v1608_v49 = vpop.eup %1607  ;;  %v850_v43 = vmul.f32 1.442695, %v829_v42  ;;  %v798_v47 = vunpack.c.l.bf16 %v774_v44  ;;  %v786_v54 = vunpack.c.l.bf16 %v666_v48  ;;  %v2145_v13 = vand.u32 127, %v1173_v23 }
 0x1ab   :  { %1609 = vpow2.f32 %v860_v16  ;;  %v872_v58 = vpack.c.bf16 %v1608_v49, %v1606_v11 }
 0x1ac   :  { %1611 = vpow2.f32 %v862_v55  ;;  %v814_v26 = vsub.f32 %v1910_v12, %v798_v47  ;;  %v806_v12 = vsub.f32 %v1935_v36, %v790_v52  ;;  %v802_v34 = vsub.f32 %v1928_v31, %v786_v54  ;;  %v904_v55 = vpop.permute.xlu2 %903 }
 0x1ad   :  { %1613 = vpow2.f32 %v848_v2  ;;  %1064 = vmatmul.bf16.vlgmr.msra.gmra.mxu0 %v872_v58  ;;  %vm1175_vm1 = vcmp.eq.s32.totalorder %v2145_v13, 16 }
 0x1ae   :  { %1615 = vpow2.f32 %v850_v43  ;;  %v823_v61 = vpack.c.bf16 %v815_v4, %v814_v26  ;;  %v706_v18 = vpop.permute.xlu1 %705  ;;  %v670_v51 = vpop.permute.xlu0 %669 }
 0x1af   :  { %v711_v41 = vperm.slane %v706_v18, %v1777_v38  ;;  %v675_v53 = vperm.slane %v670_v51, %v1777_v38 }
 0x1b0   :  { %v838_v46 = vunpack.c.l.bf16 %v823_v61  ;;  %v839_v63 = vunpack.c.h.bf16 %v823_v61 }
 0x1b1   :  { %v1610_v17 = vpop.eup %1609  ;;  %v791_v56 = vunpack.c.l.bf16 %v711_v41  ;;  %v787_v28 = vunpack.c.l.bf16 %v675_v53 }
 0x1b2   :  { %v1612_v21 = vpop.eup %1611  ;;  %v868_v24 = vmul.f32 1.442695, %v838_v46  ;;  %v870_v60 = vmul.f32 1.442695, %v839_v63 }
 0x1b3   :  { %v1614_v14 = vpop.eup %1613  ;;  %v807_v62 = vsub.f32 %v1937_v37, %v791_v56  ;;  %v803_v3 = vsub.f32 %v1930_v32, %v787_v28  ;;  %v877_v5 = vpack.c.bf16 %v1612_v21, %v1610_v17  ;;  %v977_v56 = vmul.f32 0.0, %v904_v55 }
 0x1b4   :  { %v1616_v9 = vpop.eup %1615  ;;  %1617 = vpow2.f32 %v868_v24  ;;  %v919_v15 = vpop.permute.xlu2 %918 }
 0x1b5   :  { %1619 = vpow2.f32 %v870_v60  ;;  %v819_v38 = vpack.c.bf16 %v807_v62, %v806_v12  ;;  %v817_v30 = vpack.c.bf16 %v803_v3, %v802_v34  ;;  %v874_v1 = vpack.c.bf16 %v1616_v9, %v1614_v14  ;;  %1089 = vmatmul.bf16.gmra.mxu2 %v877_v5 }
 0x1b6   :  { %v909_v59 = vpop.permute.xlu1 %908  ;;  %v899_v44 = vpop.permute.xlu0 %898  ;;  %v980_v61 = vmul.f32 0.0, %v919_v15 }
 0x1b7   :  { %v830_v0 = vunpack.c.l.bf16 %v819_v38  ;;  %v831_v19 = vunpack.c.h.bf16 %v819_v38  ;;  %v826_v36 = vunpack.c.l.bf16 %v817_v30  ;;  %v827_v27 = vunpack.c.h.bf16 %v817_v30  ;;  %1074 = vmatmul.bf16.vlgmr.msra.gmra.mxu1 %v874_v1 }
 0x1b8   :  { %v976_v49 = vmul.f32 0.0, %v899_v44  ;;  %v978_v30 = vmul.f32 0.0, %v909_v59 }
 0x1b9   :  { %v852_v50 = vmul.f32 1.442695, %v830_v0  ;;  %v854_v8 = vmul.f32 1.442695, %v831_v19  ;;  %v844_v31 = vmul.f32 1.442695, %v826_v36 }
 0x1ba   :  { %v1618_v7 = vpop.eup %1617  ;;  %v846_v37 = vmul.f32 1.442695, %v827_v27 }
 0x1bb   :  { %v1620_v6 = vpop.eup %1619  ;;  %1621 = vpow2.f32 %v852_v50 }
 0x1bc   :  { %1623 = vpow2.f32 %v854_v8  ;;  %v879_v32 = vpack.c.bf16 %v1620_v6, %v1618_v7  ;;  %v934_v18 = vpop.permute.xlu2 %933 }
 0x1bd   :  { %1625 = vpow2.f32 %v844_v31 }
 0x1be   :  { %1627 = vpow2.f32 %v846_v37  ;;  %1099 = vmatmul.bf16.gmra.mxu3 %v879_v32  ;;  %v924_v22 = vpop.permute.xlu1 %923  ;;  %v914_v11 = vpop.permute.xlu0 %913 }
 0x1bf   :  { %v981_v21 = vmul.f32 0.0, %v924_v22 }
 0x1c1   :  { %v1622_v57 = vpop.eup %1621 }
 0x1c2   :  { %v1624_v35 = vpop.eup %1623 }
 0x1c3   :  { %v1626_v29 = vpop.eup %1625  ;;  %v875_v39 = vpack.c.bf16 %v1624_v35, %v1622_v57  ;;  %v983_v35 = vmul.f32 0.0, %v934_v18 }
 0x1c4   :  { %v1628_v20 = vpop.eup %1627  ;;  %v949_v34 = vpop.permute.xlu2 %948 }
 0x1c5   :  { %v873_v45 = vpack.c.bf16 %v1628_v20, %v1626_v29  ;;  %v986_v38 = vmul.f32 0.0, %v949_v34  ;;  %v979_v29 = vmul.f32 0.0, %v914_v11 }
 0x1c6   :  { %v939_v25 = vpop.permute.xlu1 %938  ;;  %v929_v16 = vpop.permute.xlu0 %928 }
 0x1c7   :  { %1069 = vmatmul.bf16.gmra.mxu0 %v873_v45  ;;  %1079 = vmatmul.bf16.gmra.mxu1 %v875_v39  ;;  %v984_v33 = vmul.f32 0.0, %v939_v25  ;;  %v982_v1 = vmul.f32 0.0, %v929_v16 }
 0x1cc   :  { %v964_v23 = vpop.permute.xlu2 %963 }
 0x1cd   :  { %v989_v11 = vmul.f32 0.0, %v964_v23 }
 0x1ce   :  { %v944_v2 = vpop.permute.xlu0 %943  ;;  %v954_v0 = vpop.permute.xlu1 %953 }
 0x1cf   :  { %v985_v46 = vmul.f32 0.0, %v944_v2  ;;  %v987_v57 = vmul.f32 0.0, %v954_v0 }
 0x1d6   :  { %v959_v48 = vpop.permute.xlu0 %958  ;;  %v969_v25 = vpop.permute.xlu1 %968 }
 0x1d7   :  { %v988_v26 = vmul.f32 0.0, %v959_v48  ;;  %v990_v16 = vmul.f32 0.0, %v969_v25 }
 0x1ff   :  { %v1085_v10 = vpop.f32.mrf.mxu2 }
 0x200   :  { %v2148_v42 = vadd.f32 %v1085_v10, %v984_v33  ;;  %v974_v33 = vpop.permute.xlu0 %973 }
 0x201   :  { %v991_v2 = vmul.f32 0.0, %v974_v33 }
 0x202   :  { %v1184_v40 = vsel %vm1175_vm1, %v2148_v42, 0.0 }
 0x203   :  { %1208 = vadd.xlane.f32.xlu0 %v1184_v40 }
 0x207   :  { %v1087_v53 = vpop.f32.mrf.mxu2 }
 0x208   :  { %v2168_v28 = vadd.f32 %v1087_v53, %v985_v46 }
 0x20a   :  { %v1185_v14 = vsel %vm1175_vm1, %v2168_v28, 0.0 }
 0x228   :  { %v1095_v4 = vpop.f32.mrf.mxu3 }
 0x229   :  { %v2158_v52 = vadd.f32 %v1095_v4, %v988_v26 }
 0x22a   :  { %v1065_v43 = vpop.f32.mrf.mxu0 }
 0x22b   :  { %v2153_v47 = vadd.f32 %v1065_v43, %v976_v49  ;;  %v1188_v41 = vsel %vm1175_vm1, %v2158_v52, 0.0 }
 0x22d   :  { %v1176_v58 = vsel %vm1175_vm1, %v2153_v47, 0.0 }
 0x22e   :  { %1192 = vadd.xlane.f32.xlu2 %v1176_v58 }
 0x230   :  { %v1097_v3 = vpop.f32.mrf.mxu3 }
 0x231   :  { %v2213_v49 = vadd.f32 %v1097_v3, %v989_v11 }
 0x232   :  { %v1067_v17 = vpop.f32.mrf.mxu0 }
 0x233   :  { %v2170_v12 = vadd.f32 %v1067_v17, %v977_v56  ;;  %v1189_v48 = vsel %vm1175_vm1, %v2213_v49, 0.0 }
 0x234   :  { %v1075_v51 = vpop.f32.mrf.mxu1 }
 0x235   :  { %v2160_v54 = vadd.f32 %v1075_v51, %v980_v61  ;;  %v1177_v5 = vsel %vm1175_vm1, %v2170_v12, 0.0 }
 0x236   :  { %1216 = vadd.xlane.f32.xlu2 %v1188_v41  ;;  %v2231_v41 = vld [vmem:[%s2327_s4] ss:$0 sm:$0xff] }
 0x237   :  { %v1180_v63 = vsel %vm1175_vm1, %v2160_v54, 0.0 }
 0x238   :  { %1200 = vadd.xlane.f32.xlu1 %v1180_v63  ;;  %v1090_v62 = vpop.f32.mrf.mxu2 }
 0x239   :  { %v2183_v19 = vadd.f32 %v1090_v62, %v986_v38 }
 0x23b   :  { %v1186_v7 = vsel %vm1175_vm1, %v2183_v19, 0.0 }
 0x23c   :  { %v1077_v24 = vpop.f32.mrf.mxu1 }
 0x23d   :  { %v2172_v60 = vadd.f32 %v1077_v24, %v981_v21 }
 0x23e   :  { %1210 = vadd.xlane.f32.xlu2 %v1185_v14 }
 0x23f   :  { %v1181_v9 = vsel %vm1175_vm1, %v2172_v60, 0.0 }
 0x240   :  { %1194 = vadd.xlane.f32.xlu1 %v1177_v5  ;;  %1202 = vadd.xlane.f32.xlu0 %v1181_v9  ;;  %v1092_v32 = vpop.f32.mrf.mxu2 }
 0x241   :  { %v1100_v31 = vpop.f32.mrf.mxu3  ;;  %v2198_v39 = vadd.f32 %v1092_v32, %v987_v57 }
 0x242   :  { %v2215_v15 = vadd.f32 %v1100_v31, %v990_v16 }
 0x243   :  { %v1187_v40 = vsel %vm1175_vm1, %v2198_v39, 0.0 }
 0x244   :  { %v1070_v36 = vpop.f32.mrf.mxu0  ;;  %v1080_v27 = vpop.f32.mrf.mxu1  ;;  %v1190_v58 = vsel %vm1175_vm1, %v2215_v15, 0.0 }
 0x245   :  { %v2185_v50 = vadd.f32 %v1070_v36, %v978_v30  ;;  %v2187_v8 = vadd.f32 %v1080_v27, %v982_v1 }
 0x247   :  { %v1178_v37 = vsel %vm1175_vm1, %v2185_v50, 0.0  ;;  %v1182_v6 = vsel %vm1175_vm1, %v2187_v8, 0.0 }
 0x248   :  { %1212 = vadd.xlane.f32.xlu1 %v1186_v7  ;;  %1196 = vadd.xlane.f32.xlu0 %v1178_v37 }
 0x249   :  { %1204 = vadd.xlane.f32.xlu2 %v1182_v6  ;;  %v1102_v55 = vpop.f32.mrf.mxu3 }
 0x24a   :  { %v2217_v43 = vadd.f32 %v1102_v55, %v991_v2 }
 0x24c   :  { %v1072_v20 = vpop.f32.mrf.mxu0  ;;  %v1082_v45 = vpop.f32.mrf.mxu1  ;;  %v1191_v4 = vsel %vm1175_vm1, %v2217_v43, 0.0 }
 0x24d   :  { %v2200_v59 = vadd.f32 %v1072_v20, %v979_v29  ;;  %v2202_v22 = vadd.f32 %v1082_v45, %v983_v35 }
 0x24f   :  { %v1183_v10 = vsel %vm1175_vm1, %v2202_v22, 0.0  ;;  %v1179_v44 = vsel %vm1175_vm1, %v2200_v59, 0.0 }
 0x250   :  { %1206 = vadd.xlane.f32.xlu1 %v1183_v10  ;;  %1214 = vadd.xlane.f32.xlu0 %v1187_v40 }
 0x251   :  { %1198 = vadd.xlane.f32.xlu2 %v1179_v44 }
 0x258   :  { %1218 = vadd.xlane.f32.xlu1 %v1189_v48  ;;  %1220 = vadd.xlane.f32.xlu0 %v1190_v58 }
 0x259   :  { %1222 = vadd.xlane.f32.xlu2 %v1191_v4 }
 0x276   :  { %v1209_v26 = vpop.xlane.xlu0 %1208 }
 0x277   :  { %1629 = vrcp.f32 %v1209_v26 }
 0x27d   :  { %v1630_v18 = vpop.eup %1629 }
 0x27e   :  { %v1248_v53 = vmul.f32 %v1630_v18, %v2148_v42 }
 0x280   :  { %v1268_v13 = vadd.f32 %v2231_v41, %v1248_v53 }
 0x282   :  { %v1308_v24 = vmul.f32 1.442695, %v1268_v13  ;;  %vm1284_vm2 = vcmp.gt.f32.partialorder %v1268_v13, 0.0 }
 0x2a1   :  { %v1193_v61 = vpop.xlane.xlu2 %1192 }
 0x2a2   :  { %1631 = vrcp.f32 %v1193_v61 }
 0x2a8   :  { %v1632_v46 = vpop.eup %1631 }
 0x2a9   :  { %v1217_v51 = vpop.xlane.xlu2 %1216  ;;  %v1240_v17 = vmul.f32 %v1632_v46, %v2153_v47 }
 0x2ab   :  { %v1201_v63 = vpop.xlane.xlu1 %1200  ;;  %v2237_v14 = vadd.f32 %v2231_v41, %v1240_v17 }
 0x2ac   :  { %1633 = vrcp.f32 %v1201_v63 }
 0x2ad   :  { %v1292_v5 = vmul.f32 1.442695, %v2237_v14  ;;  %vm1276_vm3 = vcmp.gt.f32.partialorder %v2237_v14, 0.0 }
 0x2b1   :  { %v1211_v56 = vpop.xlane.xlu2 %1210 }
 0x2b2   :  { %v1634_v21 = vpop.eup %1633  ;;  %1635 = vrcp.f32 %v1211_v56 }
 0x2b3   :  { %v1244_v34 = vmul.f32 %v1634_v21, %v2160_v54  ;;  %v1195_v62 = vpop.xlane.xlu1 %1194  ;;  %v1203_v3 = vpop.xlane.xlu0 %1202 }
 0x2b4   :  { %1637 = vrcp.f32 %v1195_v62 }
 0x2b5   :  { %v2241_v42 = vadd.f32 %v2231_v41, %v1244_v34  ;;  %1639 = vrcp.f32 %v1203_v3 }
 0x2b6   :  { %1641 = vpow2.f32 %v1308_v24 }
 0x2b7   :  { %v1300_v47 = vmul.f32 1.442695, %v2241_v42  ;;  %1643 = vrcp.f32 %v1217_v51  ;;  %vm1280_vm4 = vcmp.gt.f32.partialorder %v2241_v42, 0.0 }
 0x2b8   :  { %v1636_v9 = vpop.eup %1635  ;;  %1645 = vpow2.f32 %v1292_v5 }
 0x2b9   :  { %v1249_v38 = vmul.f32 %v1636_v9, %v2168_v28  ;;  %1647 = vpow2.f32 %v1300_v47 }
 0x2ba   :  { %v1638_v30 = vpop.eup %1637 }
 0x2bb   :  { %v1640_v1 = vpop.eup %1639  ;;  %v1241_v54 = vmul.f32 %v1638_v30, %v2170_v12  ;;  %v1269_v0 = vadd.f32 %v2231_v41, %v1249_v38  ;;  %v1213_v36 = vpop.xlane.xlu1 %1212 }
 0x2bc   :  { %v1197_v27 = vpop.xlane.xlu0 %1196  ;;  %v1642_v31 = vpop.eup %1641  ;;  %v1245_v7 = vmul.f32 %v1640_v1, %v2172_v60  ;;  %1649 = vrcp.f32 %v1213_v36 }
 0x2bd   :  { %v1205_v37 = vpop.xlane.xlu2 %1204  ;;  %v1261_v6 = vadd.f32 %v2231_v41, %v1241_v54  ;;  %v1310_v32 = vmul.f32 1.442695, %v1269_v0  ;;  %v1644_v57 = vpop.eup %1643  ;;  %v1432_v35 = vadd.f32 -1.0, %v1642_v31  ;;  %vm1285_vm5 = vcmp.gt.f32.partialorder %v1269_v0, 0.0 }
 0x2be   :  { %1651 = vrcp.f32 %v1205_v37  ;;  %v1265_v28 = vadd.f32 %v2231_v41, %v1245_v7  ;;  %v1646_v12 = vpop.eup %1645  ;;  %v1252_v48 = vmul.f32 %v1644_v57, %v2158_v52 }
 0x2bf   :  { %1653 = vrcp.f32 %v1197_v27  ;;  %v1294_v29 = vmul.f32 1.442695, %v1261_v6  ;;  %v1648_v45 = vpop.eup %1647  ;;  %v1348_v25 = vsel %vm1284_vm2, %v1268_v13, %v1432_v35  ;;  %v1424_v11 = vadd.f32 -1.0, %v1646_v12 }
 0x2c0   :  { %1655 = vpow2.f32 %v1310_v32  ;;  %v1302_v20 = vmul.f32 1.442695, %v1265_v28  ;;  %vm1277_vm6 = vcmp.gt.f32.partialorder %v1261_v6, 0.0  ;;  %vm1281_vm7 = vcmp.gt.f32.partialorder %v1265_v28, 0.0 }
 0x2c1   :  { %1657 = vpow2.f32 %v1294_v29  ;;  %v2279_v54 = vadd.f32 %v2231_v41, %v1252_v48 }
 0x2c2   :  { %v1650_v23 = vpop.eup %1649  ;;  %1659 = vpow2.f32 %v1302_v20 }
 0x2c3   :  { %v1250_v33 = vmul.f32 %v1650_v23, %v2183_v19  ;;  %v1207_v10 = vpop.xlane.xlu1 %1206  ;;  %v1428_v19 = vadd.f32 -1.0, %v1648_v45  ;;  %vm1288_vm14 = vcmp.gt.f32.partialorder %v2279_v54, 0.0 }
 0x2c4   :  { %v1652_v60 = vpop.eup %1651  ;;  %v1215_v40 = vpop.xlane.xlu0 %1214  ;;  %1661 = vrcp.f32 %v1207_v10 }
 0x2c5   :  { %v1654_v44 = vpop.eup %1653  ;;  %v1246_v16 = vmul.f32 %v1652_v60, %v2187_v8  ;;  %v1199_v55 = vpop.xlane.xlu2 %1198  ;;  %v2256_v58 = vadd.f32 %v2231_v41, %v1250_v33  ;;  %v1344_v21 = vsel %vm1280_vm4, %v2241_v42, %v1428_v19 }
 0x2c6   :  { %v1656_v2 = vpop.eup %1655  ;;  %v1242_v4 = vmul.f32 %v1654_v44, %v2185_v50  ;;  %1663 = vrcp.f32 %v1199_v55  ;;  %v1340_v50 = vsel %vm1276_vm3, %v2237_v14, %v1424_v11 }
 0x2c7   :  { %v1433_v26 = vadd.f32 -1.0, %v1656_v2  ;;  %v2260_v61 = vadd.f32 %v2231_v41, %v1246_v16  ;;  %1665 = vrcp.f32 %v1215_v40  ;;  %v1658_v18 = vpop.eup %1657  ;;  %v1312_v8 = vmul.f32 1.442695, %v2256_v58 }
 0x2c8   :  { %v2265_v52 = vadd.f32 %v2231_v41, %v1242_v4  ;;  %v1660_v51 = vpop.eup %1659  ;;  %v1425_v53 = vadd.f32 -1.0, %v1658_v18  ;;  %vm1286_vm8 = vcmp.gt.f32.partialorder %v2256_v58, 0.0 }
 0x2c9   :  { %v1349_v46 = vsel %vm1285_vm5, %v1269_v0, %v1433_v26  ;;  %v1304_v63 = vmul.f32 1.442695, %v2260_v61  ;;  %v1429_v17 = vadd.f32 -1.0, %v1660_v51  ;;  %1667 = vpow2.f32 %v1312_v8 }
 0x2ca   :  { %v1503_v13 = vpack.c.bf16 %v1349_v46, %v1348_v25  ;;  %v1662_v56 = vpop.eup %1661  ;;  %v1341_v24 = vsel %vm1277_vm6, %v1261_v6, %v1425_v53  ;;  %v1296_v34 = vmul.f32 1.442695, %v2265_v52  ;;  %v1316_v6 = vmul.f32 1.442695, %v2279_v54 }
 0x2cb   :  { %v1483_v3 = vpack.c.bf16 %v1341_v24, %v1340_v50  ;;  %v1345_v14 = vsel %vm1281_vm7, %v1265_v28, %v1429_v17  ;;  %1669 = vpow2.f32 %v1304_v63  ;;  %v1247_v5 = vmul.f32 %v1662_v56, %v2202_v22  ;;  %v1219_v47 = vpop.xlane.xlu1 %1218 }
 0x2cc   :  { %v1664_v62 = vpop.eup %1663  ;;  %1530 = vst [vmem:[%s2328_s5 + $0x20] sm:$0xff] %v1503_v13   ;;  %v1493_v38 = vpack.c.bf16 %v1345_v14, %v1344_v21  ;;  %1671 = vpow2.f32 %v1296_v34  ;;  %v1221_v1 = vpop.xlane.xlu0 %1220  ;;  %vm1282_vm9 = vcmp.gt.f32.partialorder %v2260_v61, 0.0  ;;  %vm1278_vm10 = vcmp.gt.f32.partialorder %v2265_v52, 0.0 }
 0x2cd   :  { %v1666_v9 = vpop.eup %1665  ;;  %v1243_v42 = vmul.f32 %v1664_v62, %v2200_v59  ;;  %v1223_v30 = vpop.xlane.xlu2 %1222  ;;  %1484 = vst [vmem:[%s2328_s5] sm:$0xff] %v1483_v3   ;;  %v1267_v0 = vadd.f32 %v2231_v41, %v1247_v5  ;;  %1673 = vrcp.f32 %v1219_v47 }
 0x2ce   :  { %v1251_v36 = vmul.f32 %v1666_v9, %v2198_v39  ;;  %1528 = vst [vmem:[%s2328_s5 + $0x10] sm:$0xff] %v1493_v38   ;;  %1675 = vrcp.f32 %v1223_v30 }
 0x2cf   :  { %v1263_v59 = vadd.f32 %v2231_v41, %v1243_v42  ;;  %v1306_v22 = vmul.f32 1.442695, %v1267_v0  ;;  %1677 = vrcp.f32 %v1221_v1  ;;  %v1668_v31 = vpop.eup %1667  ;;  %vm1283_vm11 = vcmp.gt.f32.partialorder %v1267_v0, 0.0 }
 0x2d0   :  { %v1271_v27 = vadd.f32 %v2231_v41, %v1251_v36  ;;  %v1434_v33 = vadd.f32 -1.0, %v1668_v31 }
 0x2d1   :  { %v1298_v7 = vmul.f32 1.442695, %v1263_v59  ;;  %v1670_v37 = vpop.eup %1669  ;;  %1679 = vpow2.f32 %v1306_v22  ;;  %vm1279_vm12 = vcmp.gt.f32.partialorder %v1263_v59, 0.0 }
 0x2d2   :  { %v1314_v32 = vmul.f32 1.442695, %v1271_v27  ;;  %v1672_v39 = vpop.eup %1671  ;;  %v1430_v12 = vadd.f32 -1.0, %v1670_v37  ;;  %vm1287_vm13 = vcmp.gt.f32.partialorder %v1271_v27, 0.0 }
 0x2d3   :  { %1681 = vpow2.f32 %v1298_v7  ;;  %v1674_v28 = vpop.eup %1673  ;;  %v1426_v45 = vadd.f32 -1.0, %v1672_v39 }
 0x2d4   :  { %1683 = vpow2.f32 %v1314_v32  ;;  %v1676_v57 = vpop.eup %1675  ;;  %v1253_v35 = vmul.f32 %v1674_v28, %v2213_v49  ;;  %v1346_v16 = vsel %vm1282_vm9, %v2260_v61, %v1430_v12 }
 0x2d5   :  { %v1678_v29 = vpop.eup %1677  ;;  %1685 = vpow2.f32 %v1316_v6  ;;  %v1255_v20 = vmul.f32 %v1676_v57, %v2217_v43 }
 0x2d6   :  { %v1273_v23 = vadd.f32 %v2231_v41, %v1253_v35  ;;  %v1254_v60 = vmul.f32 %v1678_v29, %v2215_v15  ;;  %v1342_v15 = vsel %vm1278_vm10, %v2265_v52, %v1426_v45 }
 0x2d7   :  { %v1680_v25 = vpop.eup %1679  ;;  %v1275_v49 = vadd.f32 %v2231_v41, %v1255_v20 }
 0x2d8   :  { %v1431_v40 = vadd.f32 -1.0, %v1680_v25  ;;  %v1318_v44 = vmul.f32 1.442695, %v1273_v23  ;;  %v1274_v43 = vadd.f32 %v2231_v41, %v1254_v60  ;;  %v1350_v41 = vsel %vm1286_vm8, %v2256_v58, %v1434_v33 }
 0x2d9   :  { %v1682_v10 = vpop.eup %1681  ;;  %v1322_v2 = vmul.f32 1.442695, %v1275_v49  ;;  %vm1289_vm15 = vcmp.gt.f32.partialorder %v1273_v23, 0.0  ;;  %vm1291_vm0 = vcmp.gt.f32.partialorder %v1275_v49, 0.0 }
 0x2da   :  { %v1684_v11 = vpop.eup %1683  ;;  %v1427_v55 = vadd.f32 -1.0, %v1682_v10  ;;  %v1347_v48 = vsel %vm1283_vm11, %v1267_v0, %v1431_v40  ;;  %1687 = vpow2.f32 %v1318_v44  ;;  %v1320_v8 = vmul.f32 1.442695, %v1274_v43 }
 0x2db   :  { %v1435_v4 = vadd.f32 -1.0, %v1684_v11  ;;  %v1686_v19 = vpop.eup %1685  ;;  %v1498_v26 = vpack.c.bf16 %v1347_v48, %v1346_v16  ;;  %1689 = vpow2.f32 %v1322_v2  ;;  %vm1290_vm1 = vcmp.gt.f32.partialorder %v1274_v43, 0.0 }
 0x2dc   :  { %v1343_v18 = vsel %vm1279_vm12, %v1263_v59, %v1427_v55  ;;  %1691 = vpow2.f32 %v1320_v8  ;;  %v1436_v52 = vadd.f32 -1.0, %v1686_v19 }
 0x2dd   :  { %v1488_v51 = vpack.c.bf16 %v1343_v18, %v1342_v15  ;;  %v1351_v50 = vsel %vm1287_vm13, %v1271_v27, %v1435_v4  ;;  %1529 = vst [vmem:[%s2328_s5 + $0x18] sm:$0xff] %v1498_v26  }
 0x2de   :  { %v1508_v61 = vpack.c.bf16 %v1351_v50, %v1350_v41  ;;  %v1352_v17 = vsel %vm1288_vm14, %v2279_v54, %v1436_v52 }
 0x2df   :  { %1527 = vst [vmem:[%s2328_s5 + $0x8] sm:$0xff] %v1488_v51  }
 0x2e0   :  { %1531 = vst [vmem:[%s2328_s5 + $0x28] sm:$0xff] %v1508_v61   ;;  %v1688_v53 = vpop.eup %1687 }
 0x2e1   :  { %v1690_v46 = vpop.eup %1689  ;;  %v1437_v58 = vadd.f32 -1.0, %v1688_v53 }
 0x2e2   :  { %v1439_v63 = vadd.f32 -1.0, %v1690_v46  ;;  %v1692_v13 = vpop.eup %1691 }
 0x2e3   :  { %v1353_v56 = vsel %vm1289_vm15, %v1273_v23, %v1437_v58  ;;  %v1438_v34 = vadd.f32 -1.0, %v1692_v13 }
 0x2e4   :  { %v1513_v21 = vpack.c.bf16 %v1353_v56, %v1352_v17  ;;  %v1355_v24 = vsel %vm1291_vm0, %v1275_v49, %v1439_v63 }
 0x2e5   :  { %v1354_v62 = vsel %vm1290_vm1, %v1274_v43, %v1438_v34 }
 0x2e6   :  { %1532 = vst [vmem:[%s2328_s5 + $0x30] sm:$0xff] %v1513_v21   ;;  %v1518_v3 = vpack.c.bf16 %v1355_v24, %v1354_v62 }
 0x2e8   :  { %1533 = vst [vmem:[%s2328_s5 + $0x38] sm:$0xff] %v1518_v3  }

// kernel: pyg_gnn_forward.10
= control target key start
LH: loop header
LB: loop body
LE: loop exit
PB: predicated region body
PF: predicated region fallthrough
CT: control target
= control target key end

     0   :  { %v334_v18 = vlaneseq  ;;  %vm249_vm1 = vcmask 7168   ;;  %s867_s1 = inlined_call_operand.vmem [shape: bf16[128,128], index: 1, kind: input, shape index: {}]   ;;  %s868_s0 = inlined_call_operand.vmem [shape: bf16[128,128], index: 0, kind: input, shape index: {}]   ;;  %s869_s2 = inlined_call_operand.vmem [shape: f32[1,128], index: 2, kind: input, shape index: {}]   ;;  %s870_s3 = inlined_call_operand.vmem [shape: f32[1,128], index: 3, kind: input, shape index: {}]   ;;  %s871_s4 = inlined_call_operand.vmem [shape: bf16[128,128], index: 4, kind: output, shape index: {0}]   ;;  %s872_s6 = inlined_call_operand.vmem [shape: f32[128,1], index: 6, kind: output, shape index: {2}]   ;;  %s873_s5 = inlined_call_operand.vmem [shape: f32[128,1], index: 5, kind: output, shape index: {1}]  }
   0x1   :  { %v476_v0 = vld [vmem:[%s867_s1 + $0x38] sm:$0xff]  ;;  %v475_v1 = vld [vmem:[%s867_s1 + $0x30] sm:$0xff]  ;;  %v474_v2 = vld [vmem:[%s867_s1 + $0x28] sm:$0xff] }
   0x2   :  { %148 = vmatpush.bf16.msra.mxu0 %v476_v0  ;;  %524 = vmatpush.bf16.msra.mxu1 %v476_v0  ;;  %v473_v3 = vld [vmem:[%s867_s1 + $0x20] sm:$0xff]  ;;  %v472_v4 = vld [vmem:[%s867_s1 + $0x18] sm:$0xff]  ;;  %v471_v5 = vld [vmem:[%s867_s1 + $0x10] sm:$0xff]  ;;  %v645_v23 = vand.u32 127, %v334_v18 }
   0x3   :  { %526 = vmatpush.bf16.msra.mxu3 %v476_v0  ;;  %525 = vmatpush.bf16.msra.mxu2 %v476_v0  ;;  %v470_v6 = vld [vmem:[%s867_s1 + $0x8] sm:$0xff]  ;;  %v469_v7 = vld [vmem:[%s867_s1] sm:$0xff]  ;;  %v463_v9 = vld [vmem:[%s868_s0 + $0x10] sm:$0xff] }
   0x4   :  { %v461_v8 = vld [vmem:[%s868_s0] sm:$0xff]  ;;  %v467_v10 = vld [vmem:[%s868_s0 + $0x30] sm:$0xff]  ;;  %v462_v12 = vld [vmem:[%s868_s0 + $0x8] sm:$0xff]  ;;  %vm336_vm0 = vcmp.eq.s32.totalorder %v645_v23, 4 }
   0x5   :  { %v465_v11 = vld [vmem:[%s868_s0 + $0x20] sm:$0xff]  ;;  %v464_v13 = vld [vmem:[%s868_s0 + $0x18] sm:$0xff]  ;;  %v466_v14 = vld [vmem:[%s868_s0 + $0x28] sm:$0xff] }
   0x6   :  { %149 = vmatpush.bf16.msra.mxu0 %v475_v1  ;;  %527 = vmatpush.bf16.msra.mxu1 %v475_v1  ;;  %v468_v15 = vld [vmem:[%s868_s0 + $0x38] sm:$0xff]  ;;  %v636_v16 = vld [vmem:[%s869_s2] ss:$0 sm:$0xff] }
   0x7   :  { %529 = vmatpush.bf16.msra.mxu3 %v475_v1  ;;  %528 = vmatpush.bf16.msra.mxu2 %v475_v1  ;;  %v641_v17 = vld [vmem:[%s870_s3] ss:$0 sm:$0xff] }
   0xa   :  { %150 = vmatpush.bf16.msra.mxu0 %v474_v2  ;;  %530 = vmatpush.bf16.msra.mxu1 %v474_v2 }
   0xb   :  { %532 = vmatpush.bf16.msra.mxu3 %v474_v2  ;;  %531 = vmatpush.bf16.msra.mxu2 %v474_v2 }
   0xe   :  { %151 = vmatpush.bf16.msra.mxu0 %v473_v3  ;;  %533 = vmatpush.bf16.msra.mxu1 %v473_v3 }
   0xf   :  { %535 = vmatpush.bf16.msra.mxu3 %v473_v3  ;;  %534 = vmatpush.bf16.msra.mxu2 %v473_v3 }
  0x12   :  { %152 = vmatpush.bf16.msra.mxu0 %v472_v4  ;;  %536 = vmatpush.bf16.msra.mxu1 %v472_v4 }
  0x13   :  { %538 = vmatpush.bf16.msra.mxu3 %v472_v4  ;;  %537 = vmatpush.bf16.msra.mxu2 %v472_v4 }
  0x16   :  { %153 = vmatpush.bf16.msra.mxu0 %v471_v5  ;;  %539 = vmatpush.bf16.msra.mxu1 %v471_v5 }
  0x17   :  { %541 = vmatpush.bf16.msra.mxu3 %v471_v5  ;;  %540 = vmatpush.bf16.msra.mxu2 %v471_v5 }
  0x1a   :  { %154 = vmatpush.bf16.msra.mxu0 %v470_v6  ;;  %542 = vmatpush.bf16.msra.mxu1 %v470_v6 }
  0x1b   :  { %544 = vmatpush.bf16.msra.mxu3 %v470_v6  ;;  %543 = vmatpush.bf16.msra.mxu2 %v470_v6 }
  0x1e   :  { %155 = vmatpush.bf16.msra.mxu0 %v469_v7  ;;  %545 = vmatpush.bf16.msra.mxu1 %v469_v7 }
  0x1f   :  { %547 = vmatpush.bf16.msra.mxu3 %v469_v7  ;;  %546 = vmatpush.bf16.msra.mxu2 %v469_v7 }
  0x21   :  { %156 = vmatmul.bf16.vlgmr.msra.gmra.mxu0 %v461_v8  ;;  %166 = vmatmul.bf16.vlgmr.msra.gmra.mxu1 %v463_v9 }
  0x22   :  { %186 = vmatmul.bf16.vlgmr.msra.gmra.mxu3 %v467_v10  ;;  %176 = vmatmul.bf16.vlgmr.msra.gmra.mxu2 %v465_v11 }
  0x31   :  { %161 = vmatmul.bf16.gmra.mxu0 %v462_v12  ;;  %171 = vmatmul.bf16.gmra.mxu1 %v464_v13 }
  0x32   :  { %181 = vmatmul.bf16.gmra.mxu2 %v466_v14  ;;  %191 = vmatmul.bf16.gmra.mxu3 %v468_v15 }
  0x9e   :  { %v157_v19 = vpop.f32.mrf.mxu0  ;;  %v167_v20 = vpop.f32.mrf.mxu1 }
  0x9f   :  { %v205_v21 = vmul.f32 %v636_v16, %v167_v20  ;;  %v270_v22 = vmul.f32 %v641_v17, %v157_v19  ;;  %v201_v24 = vmul.f32 %v636_v16, %v157_v19  ;;  %v341_v25 = vsel %vm336_vm0, 1.0, %v167_v20 }
  0xa0   :  { %v274_v28 = vmul.f32 %v641_v17, %v167_v20  ;;  %v337_v33 = vsel %vm336_vm0, 1.0, %v157_v19 }
  0xa1   :  { %225 = vadd.xlane.f32.xlu2 %v205_v21  ;;  %286 = vadd.xlane.f32.xlu1 %v270_v22 }
  0xa2   :  { %217 = vadd.xlane.f32.xlu0 %v201_v24 }
  0xa5   :  { %v187_v26 = vpop.f32.mrf.mxu3  ;;  %v177_v27 = vpop.f32.mrf.mxu2 }
  0xa6   :  { %v159_v29 = vpop.f32.mrf.mxu0  ;;  %v169_v30 = vpop.f32.mrf.mxu1  ;;  %v282_v31 = vmul.f32 %v641_v17, %v187_v26  ;;  %v213_v32 = vmul.f32 %v636_v16, %v187_v26  ;;  %v345_v38 = vsel %vm336_vm0, 1.0, %v177_v27  ;;  %v209_v41 = vmul.f32 %v636_v16, %v177_v27 }
  0xa7   :  { %v338_v34 = vsel %vm336_vm0, 1.0, %v159_v29  ;;  %v342_v35 = vsel %vm336_vm0, 1.0, %v169_v30  ;;  %v349_v42 = vsel %vm336_vm0, 1.0, %v187_v26  ;;  %v278_v45 = vmul.f32 %v641_v17, %v177_v27 }
  0xa8   :  { %v480_v36 = vpack.c.bf16 %v338_v34, %v337_v33  ;;  %v490_v37 = vpack.c.bf16 %v342_v35, %v341_v25  ;;  %v206_v57 = vmul.f32 %v636_v16, %v169_v30  ;;  %v202_v61 = vmul.f32 %v636_v16, %v159_v29 }
  0xa9   :  { %294 = vadd.xlane.f32.xlu2 %v274_v28  ;;  %310 = vadd.xlane.f32.xlu1 %v282_v31  ;;  %v271_v7 = vmul.f32 %v641_v17, %v159_v29  ;;  %v275_v10 = vmul.f32 %v641_v17, %v169_v30 }
  0xaa   :  { %481 = vst [vmem:[%s871_s4] sm:$0xff] %v480_v36   ;;  %241 = vadd.xlane.f32.xlu0 %v213_v32 }
  0xab   :  { %518 = vst [vmem:[%s871_s4 + $0x10] sm:$0xff] %v490_v37  }
  0xad   :  { %v668_v39 = vpop.f32.mrf.mxu3  ;;  %v179_v40 = vpop.f32.mrf.mxu2 }
  0xae   :  { %v350_v43 = vsel %vm336_vm0, 1.0, %v668_v39  ;;  %v346_v44 = vsel %vm336_vm0, 1.0, %v179_v40  ;;  %v162_v46 = vpop.f32.mrf.mxu0  ;;  %v172_v47 = vpop.f32.mrf.mxu1  ;;  %v214_v50 = vmul.f32 %v636_v16, %v668_v39  ;;  %v279_v58 = vmul.f32 %v641_v17, %v179_v40 }
  0xaf   :  { %v510_v48 = vpack.c.bf16 %v350_v43, %v349_v42  ;;  %v500_v49 = vpack.c.bf16 %v346_v44, %v345_v38  ;;  %v339_v51 = vsel %vm336_vm0, 1.0, %v162_v46  ;;  %v343_v52 = vsel %vm336_vm0, 1.0, %v172_v47 }
  0xb0   :  { %v203_v2 = vmul.f32 %v636_v16, %v162_v46  ;;  %v276_v12 = vmul.f32 %v641_v17, %v172_v47  ;;  %v210_v13 = vmul.f32 %v636_v16, %v179_v40  ;;  %v207_v18 = vmul.f32 %v636_v16, %v172_v47 }
  0xb1   :  { %522 = vst [vmem:[%s871_s4 + $0x30] sm:$0xff] %v510_v48   ;;  %233 = vadd.xlane.f32.xlu2 %v209_v41  ;;  %243 = vadd.xlane.f32.xlu1 %v214_v50  ;;  %v272_v21 = vmul.f32 %v641_v17, %v162_v46  ;;  %v283_v25 = vmul.f32 %v641_v17, %v668_v39 }
  0xb2   :  { %520 = vst [vmem:[%s871_s4 + $0x20] sm:$0xff] %v500_v49   ;;  %302 = vadd.xlane.f32.xlu0 %v278_v45 }
  0xb5   :  { %v182_v53 = vpop.f32.mrf.mxu2  ;;  %v192_v54 = vpop.f32.mrf.mxu3 }
  0xb6   :  { %v164_v55 = vpop.f32.mrf.mxu0  ;;  %v174_v56 = vpop.f32.mrf.mxu1  ;;  %v347_v0 = vsel %vm336_vm0, 1.0, %v182_v53  ;;  %v351_v1 = vsel %vm336_vm0, 1.0, %v192_v54  ;;  %v215_v11 = vmul.f32 %v636_v16, %v192_v54  ;;  %v280_v14 = vmul.f32 %v641_v17, %v182_v53 }
  0xb7   :  { %v340_v59 = vsel %vm336_vm0, 1.0, %v164_v55  ;;  %v344_v60 = vsel %vm336_vm0, 1.0, %v174_v56  ;;  %v211_v15 = vmul.f32 %v636_v16, %v182_v53  ;;  %v277_v19 = vmul.f32 %v641_v17, %v174_v56 }
  0xb8   :  { %v485_v62 = vpack.c.bf16 %v340_v59, %v339_v51  ;;  %v495_v63 = vpack.c.bf16 %v344_v60, %v343_v52  ;;  %v204_v20 = vmul.f32 %v636_v16, %v164_v55  ;;  %v208_v23 = vmul.f32 %v636_v16, %v174_v56 }
  0xb9   :  { %227 = vadd.xlane.f32.xlu2 %v206_v57  ;;  %304 = vadd.xlane.f32.xlu1 %v279_v58  ;;  %v273_v26 = vmul.f32 %v641_v17, %v164_v55  ;;  %v284_v29 = vmul.f32 %v641_v17, %v192_v54 }
  0xba   :  { %219 = vadd.xlane.f32.xlu0 %v202_v61  ;;  %517 = vst [vmem:[%s871_s4 + $0x8] sm:$0xff] %v485_v62  }
  0xbb   :  { %519 = vst [vmem:[%s871_s4 + $0x18] sm:$0xff] %v495_v63  }
  0xbd   :  { %v184_v3 = vpop.f32.mrf.mxu2  ;;  %v194_v4 = vpop.f32.mrf.mxu3 }
  0xbe   :  { %v348_v5 = vsel %vm336_vm0, 1.0, %v184_v3  ;;  %v352_v6 = vsel %vm336_vm0, 1.0, %v194_v4  ;;  %v212_v22 = vmul.f32 %v636_v16, %v184_v3  ;;  %v216_v24 = vmul.f32 %v636_v16, %v194_v4 }
  0xbf   :  { %v505_v8 = vpack.c.bf16 %v348_v5, %v347_v0  ;;  %v515_v9 = vpack.c.bf16 %v352_v6, %v351_v1  ;;  %v281_v27 = vmul.f32 %v641_v17, %v184_v3  ;;  %v285_v28 = vmul.f32 %v641_v17, %v194_v4 }
  0xc1   :  { %288 = vadd.xlane.f32.xlu2 %v271_v7  ;;  %221 = vadd.xlane.f32.xlu1 %v203_v2  ;;  %521 = vst [vmem:[%s871_s4 + $0x28] sm:$0xff] %v505_v8  }
  0xc2   :  { %296 = vadd.xlane.f32.xlu0 %v275_v10  ;;  %523 = vst [vmem:[%s871_s4 + $0x38] sm:$0xff] %v515_v9  }
  0xc9   :  { %245 = vadd.xlane.f32.xlu2 %v215_v11  ;;  %298 = vadd.xlane.f32.xlu1 %v276_v12 }
  0xca   :  { %235 = vadd.xlane.f32.xlu0 %v210_v13 }
  0xd1   :  { %306 = vadd.xlane.f32.xlu2 %v280_v14  ;;  %237 = vadd.xlane.f32.xlu1 %v211_v15 }
  0xd2   :  { %229 = vadd.xlane.f32.xlu0 %v207_v18 }
  0xd9   :  { %300 = vadd.xlane.f32.xlu2 %v277_v19  ;;  %223 = vadd.xlane.f32.xlu1 %v204_v20 }
  0xda   :  { %290 = vadd.xlane.f32.xlu0 %v272_v21 }
  0xe1   :  { %239 = vadd.xlane.f32.xlu2 %v212_v22  ;;  %231 = vadd.xlane.f32.xlu1 %v208_v23 }
  0xe2   :  { %247 = vadd.xlane.f32.xlu0 %v216_v24 }
  0xe9   :  { %312 = vadd.xlane.f32.xlu2 %v283_v25  ;;  %292 = vadd.xlane.f32.xlu1 %v273_v26 }
  0xea   :  { %308 = vadd.xlane.f32.xlu0 %v281_v27 }
  0xf1   :  { %316 = vadd.xlane.f32.xlu1 %v285_v28 }
  0xf2   :  { %314 = vadd.xlane.f32.xlu0 %v284_v29 }
 0x114   :  { %v226_v16 = vpop.xlane.xlu2 %225  ;;  %v287_v30 = vpop.xlane.xlu1 %286 }
 0x115   :  { %254 = vst.msk [vmem:[%s873_s5 + $0x20] sm:$0xff] %vm249_vm1, %v226_v16  ;;  %v218_v31 = vpop.xlane.xlu0 %217 }
 0x116   :  { %318 = vst.msk [vmem:[%s872_s6] sm:$0xff] %vm249_vm1, %v287_v30 }
 0x117   :  { %250 = vst.msk [vmem:[%s873_s5] sm:$0xff] %vm249_vm1, %v218_v31 }
 0x11c   :  { %v295_v17 = vpop.xlane.xlu2 %294  ;;  %v311_v32 = vpop.xlane.xlu1 %310 }
 0x11d   :  { %322 = vst.msk [vmem:[%s872_s6 + $0x20] sm:$0xff] %vm249_vm1, %v295_v17  ;;  %v242_v33 = vpop.xlane.xlu0 %241 }
 0x11e   :  { %330 = vst.msk [vmem:[%s872_s6 + $0x60] sm:$0xff] %vm249_vm1, %v311_v32 }
 0x11f   :  { %262 = vst.msk [vmem:[%s873_s5 + $0x60] sm:$0xff] %vm249_vm1, %v242_v33 }
 0x124   :  { %v234_v34 = vpop.xlane.xlu2 %233  ;;  %v244_v35 = vpop.xlane.xlu1 %243 }
 0x125   :  { %258 = vst.msk [vmem:[%s873_s5 + $0x40] sm:$0xff] %vm249_vm1, %v234_v34  ;;  %v303_v36 = vpop.xlane.xlu0 %302 }
 0x126   :  { %263 = vst.msk [vmem:[%s873_s5 + $0x68] sm:$0xff] %vm249_vm1, %v244_v35 }
 0x127   :  { %326 = vst.msk [vmem:[%s872_s6 + $0x40] sm:$0xff] %vm249_vm1, %v303_v36 }
 0x12c   :  { %v228_v37 = vpop.xlane.xlu2 %227  ;;  %v305_v38 = vpop.xlane.xlu1 %304 }
 0x12d   :  { %255 = vst.msk [vmem:[%s873_s5 + $0x28] sm:$0xff] %vm249_vm1, %v228_v37  ;;  %v220_v39 = vpop.xlane.xlu0 %219 }
 0x12e   :  { %327 = vst.msk [vmem:[%s872_s6 + $0x48] sm:$0xff] %vm249_vm1, %v305_v38 }
 0x12f   :  { %251 = vst.msk [vmem:[%s873_s5 + $0x8] sm:$0xff] %vm249_vm1, %v220_v39 }
 0x134   :  { %v289_v40 = vpop.xlane.xlu2 %288  ;;  %v222_v41 = vpop.xlane.xlu1 %221 }
 0x135   :  { %319 = vst.msk [vmem:[%s872_s6 + $0x8] sm:$0xff] %vm249_vm1, %v289_v40  ;;  %v297_v42 = vpop.xlane.xlu0 %296 }
 0x136   :  { %323 = vst.msk [vmem:[%s872_s6 + $0x28] sm:$0xff] %vm249_vm1, %v297_v42 }
 0x137   :  { %252 = vst.msk [vmem:[%s873_s5 + $0x10] sm:$0xff] %vm249_vm1, %v222_v41 }
 0x13c   :  { %v246_v43 = vpop.xlane.xlu2 %245  ;;  %v299_v44 = vpop.xlane.xlu1 %298 }
 0x13d   :  { %264 = vst.msk [vmem:[%s873_s5 + $0x70] sm:$0xff] %vm249_vm1, %v246_v43  ;;  %v236_v45 = vpop.xlane.xlu0 %235 }
 0x13e   :  { %259 = vst.msk [vmem:[%s873_s5 + $0x48] sm:$0xff] %vm249_vm1, %v236_v45 }
 0x13f   :  { %324 = vst.msk [vmem:[%s872_s6 + $0x30] sm:$0xff] %vm249_vm1, %v299_v44 }
 0x144   :  { %v307_v46 = vpop.xlane.xlu2 %306  ;;  %v238_v47 = vpop.xlane.xlu1 %237 }
 0x145   :  { %328 = vst.msk [vmem:[%s872_s6 + $0x50] sm:$0xff] %vm249_vm1, %v307_v46  ;;  %v230_v48 = vpop.xlane.xlu0 %229 }
 0x146   :  { %256 = vst.msk [vmem:[%s873_s5 + $0x30] sm:$0xff] %vm249_vm1, %v230_v48 }
 0x147   :  { %260 = vst.msk [vmem:[%s873_s5 + $0x50] sm:$0xff] %vm249_vm1, %v238_v47 }
 0x14c   :  { %v301_v49 = vpop.xlane.xlu2 %300  ;;  %v224_v50 = vpop.xlane.xlu1 %223 }
 0x14d   :  { %325 = vst.msk [vmem:[%s872_s6 + $0x38] sm:$0xff] %vm249_vm1, %v301_v49  ;;  %v291_v51 = vpop.xlane.xlu0 %290 }
 0x14e   :  { %320 = vst.msk [vmem:[%s872_s6 + $0x10] sm:$0xff] %vm249_vm1, %v291_v51 }
 0x14f   :  { %253 = vst.msk [vmem:[%s873_s5 + $0x18] sm:$0xff] %vm249_vm1, %v224_v50 }
 0x154   :  { %v240_v52 = vpop.xlane.xlu2 %239  ;;  %v232_v53 = vpop.xlane.xlu1 %231 }
 0x155   :  { %261 = vst.msk [vmem:[%s873_s5 + $0x58] sm:$0xff] %vm249_vm1, %v240_v52  ;;  %v248_v54 = vpop.xlane.xlu0 %247 }
 0x156   :  { %265 = vst.msk [vmem:[%s873_s5 + $0x78] sm:$0xff] %vm249_vm1, %v248_v54 }
 0x157   :  { %257 = vst.msk [vmem:[%s873_s5 + $0x38] sm:$0xff] %vm249_vm1, %v232_v53 }
 0x15c   :  { %v313_v55 = vpop.xlane.xlu2 %312  ;;  %v293_v56 = vpop.xlane.xlu1 %292 }
 0x15d   :  { %331 = vst.msk [vmem:[%s872_s6 + $0x68] sm:$0xff] %vm249_vm1, %v313_v55  ;;  %v309_v57 = vpop.xlane.xlu0 %308 }
 0x15e   :  { %329 = vst.msk [vmem:[%s872_s6 + $0x58] sm:$0xff] %vm249_vm1, %v309_v57 }
 0x15f   :  { %321 = vst.msk [vmem:[%s872_s6 + $0x18] sm:$0xff] %vm249_vm1, %v293_v56 }
 0x164   :  { %v317_v58 = vpop.xlane.xlu1 %316 }
 0x165   :  { %v315_v59 = vpop.xlane.xlu0 %314  ;;  %333 = vst.msk [vmem:[%s872_s6 + $0x78] sm:$0xff] %vm249_vm1, %v317_v58 }
 0x166   :  { %332 = vst.msk [vmem:[%s872_s6 + $0x70] sm:$0xff] %vm249_vm1, %v315_v59 }

// kernel: pyg_gnn_forward.11
= control target key start
LH: loop header
LB: loop body
LE: loop exit
PB: predicated region body
PF: predicated region fallthrough
CT: control target
= control target key end

     0   :  { %v1502_v0 = vmov 0   ;;  %v1503_v35 = vmov 839922192   ;;  %vm24_vm0 = vcmask 7168   ;;  %s2120_s0 = inlined_call_operand.vmem [shape: f32[128,1], index: 0, kind: input, shape index: {}]   ;;  %s2121_s1 = inlined_call_operand.vmem [shape: f32[1,128], index: 1, kind: input, shape index: {}]   ;;  %s2122_s3 = inlined_call_operand.vmem [shape: bf16[128,128], index: 3, kind: input, shape index: {}]   ;;  %s2123_s2 = inlined_call_operand.vmem [shape: bf16[128,128], index: 2, kind: input, shape index: {}]   ;;  %s2124_s4 = inlined_call_operand.vmem [shape: f32[1,128], index: 4, kind: input, shape index: {}]   ;;  %s2125_s5 = inlined_call_operand.vmem [shape: f32[128,128], index: 5, kind: output, shape index: {}]  }
   0x1   :  { %1404 = vset.pattern.permute.xlu2 %v1502_v0  ;;  %1403 = vset.pattern.permute.xlu1 %v1502_v0  ;;  %v61_v1 = vld [vmem:[%s2120_s0 + $0x20] sm:$0xff]  ;;  %v59_v2 = vld [vmem:[%s2120_s0 + $0x10] sm:$0xff]  ;;  %v62_v7 = vld [vmem:[%s2120_s0 + $0x28] sm:$0xff]  ;;  %v97_v36 = vunpack.c.l.s4 %v1503_v35 }
   0x2   :  { %v57_v3 = vld [vmem:[%s2120_s0] sm:$0xff]  ;;  %1402 = vset.pattern.permute.xlu0 %v1502_v0  ;;  %v77_v4 = vpack.c.bf16 %v61_v1, %v61_v1  ;;  %v75_v5 = vpack.c.bf16 %v59_v2, %v59_v2  ;;  %v60_v8 = vld [vmem:[%s2120_s0 + $0x18] sm:$0xff]  ;;  %v58_v9 = vld [vmem:[%s2120_s0 + $0x8] sm:$0xff]  ;;  %v78_v10 = vpack.c.bf16 %v62_v7, %v62_v7 }
   0x3   :  { %v73_v6 = vpack.c.bf16 %v57_v3, %v57_v3  ;;  %v76_v11 = vpack.c.bf16 %v60_v8, %v60_v8  ;;  %v74_v12 = vpack.c.bf16 %v58_v9, %v58_v9  ;;  %v69_v13 = vld [vmem:[%s2120_s0 + $0x60] sm:$0xff]  ;;  %v66_v14 = vld [vmem:[%s2120_s0 + $0x48] sm:$0xff]  ;;  %v68_v19 = vld [vmem:[%s2120_s0 + $0x58] sm:$0xff]  ;;  %v1586_v37 = vunpack.c.0.s8 %v97_v36 }
   0x4   :  { %129 = vperm.xlu2 %1404, %v77_v4   ;;  %111 = vperm.xlu1 %1403, %v75_v5   ;;  %v65_v15 = vld [vmem:[%s2120_s0 + $0x40] sm:$0xff]  ;;  %v85_v16 = vpack.c.bf16 %v69_v13, %v69_v13  ;;  %v82_v17 = vpack.c.bf16 %v66_v14, %v66_v14  ;;  %v67_v20 = vld [vmem:[%s2120_s0 + $0x50] sm:$0xff]  ;;  %v70_v21 = vld [vmem:[%s2120_s0 + $0x68] sm:$0xff]  ;;  %v84_v22 = vpack.c.bf16 %v68_v19, %v68_v19 }
   0x5   :  { %93 = vperm.xlu0 %1402, %v73_v6   ;;  %v81_v18 = vpack.c.bf16 %v65_v15, %v65_v15  ;;  %v83_v23 = vpack.c.bf16 %v67_v20, %v67_v20  ;;  %v86_v24 = vpack.c.bf16 %v70_v21, %v70_v21  ;;  %v63_v25 = vld [vmem:[%s2120_s0 + $0x30] sm:$0xff]  ;;  %v72_v26 = vld [vmem:[%s2120_s0 + $0x78] sm:$0xff]  ;;  %v89_v33 = vld [vmem:[%s2121_s1] sm:$0x1] }
   0x6   :  { %v71_v27 = vld [vmem:[%s2120_s0 + $0x70] sm:$0xff]  ;;  %v79_v28 = vpack.c.bf16 %v63_v25, %v63_v25  ;;  %v88_v29 = vpack.c.bf16 %v72_v26, %v72_v26  ;;  %v64_v31 = vld [vmem:[%s2120_s0 + $0x38] sm:$0xff]  ;;  %v90_v34 = vpack.c.bf16 %v89_v33, %v89_v33 }
   0x7   :  { %v87_v30 = vpack.c.bf16 %v71_v27, %v71_v27  ;;  %v80_v32 = vpack.c.bf16 %v64_v31, %v64_v31  ;;  %v1603_v7 = vld [vmem:[%s2122_s3 + $0x30] sm:$0xff]  }
   0x8   :  { %v236_v38 = vpack.i.b16 %v90_v34, %v90_v34  ;;  %v1362_v15 = vunpack.c.l.bf16 %v1603_v7 }
   0xa   :  { %v238_v41 = vperm.slane %v236_v38, 0 }
   0xc   :  { %138 = vperm.xlu2 %1404, %v78_v10   ;;  %120 = vperm.xlu1 %1403, %v76_v11   ;;  %v1589_v43 = vunpack.c.l.bf16 %v238_v41  ;;  %v1623_v41 = vld [vmem:[%s2122_s3 + $0x28] sm:$0xff]  }
   0xd   :  { %102 = vperm.xlu0 %1402, %v74_v12   ;;  %v1608_v12 = vld [vmem:[%s2122_s3 + $0x10] sm:$0xff]  }
   0xe   :  { %v1346_v21 = vunpack.c.l.bf16 %v1608_v12 }
  0x14   :  { %201 = vperm.xlu2 %1404, %v85_v16   ;;  %174 = vperm.xlu1 %1403, %v82_v17  }
  0x15   :  { %165 = vperm.xlu0 %1402, %v81_v18  }
  0x1c   :  { %192 = vperm.xlu2 %1404, %v84_v22   ;;  %183 = vperm.xlu1 %1403, %v83_v23  }
  0x1d   :  { %210 = vperm.xlu0 %1402, %v86_v24  }
  0x24   :  { %147 = vperm.xlu2 %1404, %v79_v28   ;;  %228 = vperm.xlu1 %1403, %v88_v29  }
  0x25   :  { %219 = vperm.xlu0 %1402, %v87_v30  }
  0x2d   :  { %156 = vperm.xlu0 %1402, %v80_v32  }
  0x5e   :  { %v130_v39 = vpop.permute.xlu2 %129 }
  0x5f   :  { %v135_v40 = vperm.slane %v130_v39, %v1586_v37 }
  0x61   :  { %v243_v42 = vunpack.c.l.bf16 %v135_v40 }
  0x63   :  { %v260_v45 = vadd.f32 %v1589_v43, %v243_v42 }
  0x65   :  { %v276_v46 = vpack.c.bf16 %v260_v45, %v260_v45 }
  0x66   :  { %v139_v44 = vpop.permute.xlu2 %138 }
  0x67   :  { %v292_v49 = vunpack.c.l.bf16 %v276_v46  ;;  %v144_v54 = vperm.slane %v139_v44, %v1586_v37 }
  0x69   :  { %v308_v52 = vmul.f32 0.20019531, %v292_v49  ;;  %v244_v2 = vunpack.c.l.bf16 %v144_v54 }
  0x6b   :  { %v356_v62 = vmax.f32 %v292_v49, %v308_v52  ;;  %v261_v13 = vadd.f32 %v1589_v43, %v244_v2 }
  0x6d   :  { %v372_v8 = vpack.c.bf16 %v356_v62, %v356_v62  ;;  %v277_v25 = vpack.c.bf16 %v261_v13, %v261_v13 }
  0x6e   :  { %v202_v47 = vpop.permute.xlu2 %201 }
  0x6f   :  { %v207_v48 = vperm.slane %v202_v47, %v1586_v37  ;;  %v404_v22 = vunpack.c.l.bf16 %v372_v8  ;;  %v293_v33 = vunpack.c.l.bf16 %v277_v25 }
  0x71   :  { %v251_v50 = vunpack.c.l.bf16 %v207_v48  ;;  %v436_v31 = vadd.f32 %v1346_v21, %v404_v22  ;;  %v309_v48 = vmul.f32 0.20019531, %v293_v33 }
  0x73   :  { %v268_v51 = vadd.f32 %v1589_v43, %v251_v50  ;;  %v452_v44 = vpack.c.bf16 %v436_v31, %v436_v31  ;;  %v1359_v50 = vunpack.c.h.bf16 %v1623_v41 }
  0x75   :  { %v284_v53 = vpack.c.bf16 %v268_v51, %v268_v51 }
  0x76   :  { %v193_v55 = vpop.permute.xlu2 %192  ;;  %v112_v56 = vpop.permute.xlu1 %111 }
  0x77   :  { %v300_v57 = vunpack.c.l.bf16 %v284_v53  ;;  %v198_v58 = vperm.slane %v193_v55, %v1586_v37  ;;  %v117_v59 = vperm.slane %v112_v56, %v1586_v37  ;;  %v94_v60 = vpop.permute.xlu0 %93  ;;  %v1631_v55 = vunpack.c.l.bf16 %v452_v44 }
  0x78   :  { %v99_v61 = vperm.slane %v94_v60, %v1586_v37 }
  0x79   :  { %v316_v63 = vmul.f32 0.20019531, %v300_v57  ;;  %v250_v0 = vunpack.c.l.bf16 %v198_v58  ;;  %v241_v1 = vunpack.c.l.bf16 %v117_v59  ;;  %v1636_v59 = vld [vmem:[%s2122_s3 + $0x8] sm:$0xff]  }
  0x7a   :  { %v239_v5 = vunpack.c.l.bf16 %v99_v61 }
  0x7b   :  { %v267_v3 = vadd.f32 %v1589_v43, %v250_v0  ;;  %v258_v4 = vadd.f32 %v1589_v43, %v241_v1  ;;  %v364_v6 = vmax.f32 %v300_v57, %v316_v63  ;;  %v1641_v63 = vld [vmem:[%s2122_s3] sm:$0xff]   ;;  %v1643_v0 = vmax.f32 %v293_v33, %v309_v48 }
  0x7c   :  { %v256_v17 = vadd.f32 %v1589_v43, %v239_v5 }
  0x7d   :  { %v283_v9 = vpack.c.bf16 %v267_v3, %v267_v3  ;;  %v274_v10 = vpack.c.bf16 %v258_v4, %v258_v4  ;;  %v380_v11 = vpack.c.bf16 %v364_v6, %v364_v6 }
  0x7e   :  { %v1611_v14 = vpop.permute.xlu1 %120  ;;  %v272_v27 = vpack.c.bf16 %v256_v17, %v256_v17  ;;  %v148_v21 = vpop.permute.xlu2 %147 }
  0x7f   :  { %v299_v16 = vunpack.c.l.bf16 %v283_v9  ;;  %v103_v18 = vpop.permute.xlu0 %102  ;;  %v290_v19 = vunpack.c.l.bf16 %v274_v10  ;;  %v412_v20 = vunpack.c.l.bf16 %v380_v11  ;;  %v126_v1 = vperm.slane %v1611_v14, %v1586_v37  ;;  %v1371_v14 = vld [vmem:[%s2122_s3 + $0x20] sm:$0xff]  }
  0x80   :  { %v108_v24 = vperm.slane %v103_v18, %v1586_v37  ;;  %v288_v38 = vunpack.c.l.bf16 %v272_v27  ;;  %v1342_v9 = vunpack.c.l.bf16 %v1636_v59  ;;  %v1355_v27 = vunpack.c.h.bf16 %v1371_v14 }
  0x81   :  { %v315_v23 = vmul.f32 0.20019531, %v299_v16  ;;  %v444_v26 = vadd.f32 %v1362_v15, %v412_v20  ;;  %v306_v29 = vmul.f32 0.20019531, %v290_v19  ;;  %v373_v20 = vpack.c.bf16 %v1643_v0, %v1643_v0 }
  0x82   :  { %v240_v32 = vunpack.c.l.bf16 %v108_v24  ;;  %v304_v52 = vmul.f32 0.20019531, %v288_v38  ;;  %v242_v22 = vunpack.c.l.bf16 %v126_v1  ;;  %v1354_v33 = vunpack.c.l.bf16 %v1371_v14 }
  0x83   :  { %v363_v28 = vmax.f32 %v299_v16, %v315_v23  ;;  %v460_v30 = vpack.c.bf16 %v444_v26, %v444_v26  ;;  %v354_v45 = vmax.f32 %v290_v19, %v306_v29  ;;  %v1338_v16 = vunpack.c.l.bf16 %v1641_v63 }
  0x84   :  { %v257_v46 = vadd.f32 %v1589_v43, %v240_v32  ;;  %v352_v5 = vmax.f32 %v288_v38, %v304_v52 }
  0x85   :  { %v1617_v35 = vunpack.c.l.bf16 %v460_v30  ;;  %v379_v36 = vpack.c.bf16 %v363_v28, %v363_v28  ;;  %v370_v56 = vpack.c.bf16 %v354_v45, %v354_v45 }
  0x86   :  { %v175_v34 = vpop.permute.xlu1 %174  ;;  %v273_v57 = vpack.c.bf16 %v257_v46, %v257_v46  ;;  %v368_v25 = vpack.c.bf16 %v352_v5, %v352_v5 }
  0x87   :  { %v180_v39 = vperm.slane %v175_v34, %v1586_v37  ;;  %v166_v40 = vpop.permute.xlu0 %165  ;;  %520 = vmax.xlane.f32.xlu0 %v1617_v35  ;;  %v411_v51 = vunpack.c.l.bf16 %v379_v36  ;;  %v402_v10 = vunpack.c.l.bf16 %v370_v56  ;;  %v153_v34 = vperm.slane %v148_v21, %v1586_v37 }
  0x88   :  { %v171_v42 = vperm.slane %v166_v40, %v1586_v37  ;;  %v289_v11 = vunpack.c.l.bf16 %v273_v57 }
  0x89   :  { %v248_v47 = vunpack.c.l.bf16 %v180_v39  ;;  %v443_v62 = vadd.f32 %v1359_v50, %v411_v51  ;;  %v434_v28 = vadd.f32 %v1342_v9, %v402_v10 }
  0x8a   :  { %v247_v49 = vunpack.c.l.bf16 %v171_v42  ;;  %v305_v30 = vmul.f32 0.20019531, %v289_v11  ;;  %v259_v42 = vadd.f32 %v1589_v43, %v242_v22 }
  0x8b   :  { %v265_v53 = vadd.f32 %v1589_v43, %v248_v47  ;;  %v459_v19 = vpack.c.bf16 %v443_v62, %v443_v62  ;;  %v400_v47 = vunpack.c.l.bf16 %v368_v25  ;;  %v450_v50 = vpack.c.bf16 %v434_v28, %v434_v28 }
  0x8c   :  { %v264_v54 = vadd.f32 %v1589_v43, %v247_v49  ;;  %v353_v56 = vmax.f32 %v289_v11, %v305_v30  ;;  %v245_v62 = vunpack.c.l.bf16 %v153_v34  ;;  %v275_v0 = vpack.c.bf16 %v259_v42, %v259_v42 }
  0x8d   :  { %v281_v58 = vpack.c.bf16 %v265_v53, %v265_v53  ;;  %v1660_v39 = vunpack.c.l.bf16 %v459_v19  ;;  %v432_v5 = vadd.f32 %v1338_v16, %v400_v47  ;;  %v1671_v10 = vunpack.c.l.bf16 %v450_v50 }
  0x8e   :  { %v280_v60 = vpack.c.bf16 %v264_v54, %v264_v54  ;;  %v184_v61 = vpop.permute.xlu1 %183  ;;  %v369_v11 = vpack.c.bf16 %v353_v56, %v353_v56  ;;  %v405_v19 = vunpack.c.l.bf16 %v373_v20  ;;  %v1339_v16 = vunpack.c.h.bf16 %v1641_v63 }
  0x8f   :  { %v297_v2 = vunpack.c.l.bf16 %v281_v58  ;;  %v189_v3 = vperm.slane %v184_v61, %v1586_v37  ;;  %v211_v4 = vpop.permute.xlu0 %210  ;;  %504 = vmax.xlane.f32.xlu0 %v1631_v55  ;;  %v1363_v61 = vunpack.c.h.bf16 %v1603_v7  ;;  %v262_v21 = vadd.f32 %v1589_v43, %v245_v62 }
  0x90   :  { %v296_v6 = vunpack.c.l.bf16 %v280_v60  ;;  %v216_v8 = vperm.slane %v211_v4, %v1586_v37  ;;  %v291_v25 = vunpack.c.l.bf16 %v275_v0  ;;  %v1504_v56 = vmov -1.2676506e+30  }
  0x91   :  { %v313_v13 = vmul.f32 0.20019531, %v297_v2  ;;  %v249_v15 = vunpack.c.l.bf16 %v189_v3  ;;  %v278_v63 = vpack.c.bf16 %v262_v21, %v262_v21  ;;  %37 = vst.msk [vmem:[#allocation2 + $0x60] sm:$0xff] %vm24_vm0, %v1504_v56 }
  0x92   :  { %v312_v17 = vmul.f32 0.20019531, %v296_v6  ;;  %v252_v18 = vunpack.c.l.bf16 %v216_v8  ;;  %25 = vst.msk [vmem:[#allocation2] sm:$0xff] %vm24_vm0, %v1504_v56 }
  0x93   :  { %v266_v23 = vadd.f32 %v1589_v43, %v249_v15  ;;  %v361_v24 = vmax.f32 %v297_v2, %v313_v13  ;;  %26 = vst.msk [vmem:[#allocation2 + $0x8] sm:$0xff] %vm24_vm0, %v1504_v56 }
  0x94   :  { %v269_v26 = vadd.f32 %v1589_v43, %v252_v18  ;;  %v360_v29 = vmax.f32 %v296_v6, %v312_v17  ;;  %v1347_v18 = vunpack.c.h.bf16 %v1608_v12  ;;  %27 = vst.msk [vmem:[#allocation2 + $0x10] sm:$0xff] %vm24_vm0, %v1504_v56 }
  0x95   :  { %v282_v31 = vpack.c.bf16 %v266_v23, %v266_v23  ;;  %v377_v32 = vpack.c.bf16 %v361_v24, %v361_v24  ;;  %28 = vst.msk [vmem:[#allocation2 + $0x18] sm:$0xff] %vm24_vm0, %v1504_v56 }
  0x96   :  { %v285_v36 = vpack.c.bf16 %v269_v26, %v269_v26  ;;  %v229_v38 = vpop.permute.xlu1 %228  ;;  %v376_v40 = vpack.c.bf16 %v360_v29, %v360_v29  ;;  %v448_v26 = vpack.c.bf16 %v432_v5, %v432_v5  ;;  %29 = vst.msk [vmem:[#allocation2 + $0x20] sm:$0xff] %vm24_vm0, %v1504_v56 }
  0x97   :  { %v234_v44 = vperm.slane %v229_v38, %v1586_v37  ;;  %v220_v45 = vpop.permute.xlu0 %219  ;;  %v409_v46 = vunpack.c.l.bf16 %v377_v32  ;;  %518 = vmax.xlane.f32.xlu0 %v1660_v39  ;;  %v298_v52 = vunpack.c.l.bf16 %v282_v31  ;;  %v437_v31 = vadd.f32 %v1347_v18, %v405_v19  ;;  %30 = vst.msk [vmem:[#allocation2 + $0x28] sm:$0xff] %vm24_vm0, %v1504_v56 }
  0x98   :  { %v301_v48 = vunpack.c.l.bf16 %v285_v36  ;;  %v225_v49 = vperm.slane %v220_v45, %v1586_v37  ;;  %v408_v51 = vunpack.c.l.bf16 %v376_v40  ;;  %v307_v36 = vmul.f32 0.20019531, %v291_v25  ;;  %31 = vst.msk [vmem:[#allocation2 + $0x30] sm:$0xff] %vm24_vm0, %v1504_v56 }
  0x99   :  { %v254_v53 = vunpack.c.l.bf16 %v234_v44  ;;  %v441_v54 = vadd.f32 %v1355_v27, %v409_v46  ;;  %v314_v8 = vmul.f32 0.20019531, %v298_v52  ;;  %v401_v27 = vunpack.c.l.bf16 %v369_v11  ;;  %32 = vst.msk [vmem:[#allocation2 + $0x38] sm:$0xff] %vm24_vm0, %v1504_v56 }
  0x9a   :  { %v317_v57 = vmul.f32 0.20019531, %v301_v48  ;;  %v253_v58 = vunpack.c.l.bf16 %v225_v49  ;;  %v440_v60 = vadd.f32 %v1354_v33, %v408_v51  ;;  %v1683_v38 = vunpack.c.l.bf16 %v448_v26  ;;  %33 = vst.msk [vmem:[#allocation2 + $0x40] sm:$0xff] %vm24_vm0, %v1504_v56 }
  0x9b   :  { %v271_v1 = vadd.f32 %v1589_v43, %v254_v53  ;;  %v457_v2 = vpack.c.bf16 %v441_v54, %v441_v54  ;;  %v362_v28 = vmax.f32 %v298_v52, %v314_v8  ;;  %v433_v40 = vadd.f32 %v1339_v16, %v401_v27  ;;  %34 = vst.msk [vmem:[#allocation2 + $0x48] sm:$0xff] %vm24_vm0, %v1504_v56 }
  0x9c   :  { %v270_v3 = vadd.f32 %v1589_v43, %v253_v58  ;;  %v456_v4 = vpack.c.bf16 %v440_v60, %v440_v60  ;;  %v365_v6 = vmax.f32 %v301_v48, %v317_v57  ;;  %v1374_v48 = vld [vmem:[%s2122_s3 + $0x38] sm:$0xff]   ;;  %v453_v49 = vpack.c.bf16 %v437_v31, %v437_v31  ;;  %35 = vst.msk [vmem:[#allocation2 + $0x50] sm:$0xff] %vm24_vm0, %v1504_v56 }
  0x9d   :  { %v1669_v9 = vunpack.c.l.bf16 %v457_v2  ;;  %v287_v13 = vpack.c.bf16 %v271_v1, %v271_v1  ;;  %v378_v42 = vpack.c.bf16 %v362_v28, %v362_v28  ;;  %v294_v51 = vunpack.c.l.bf16 %v278_v63  ;;  %36 = vst.msk [vmem:[#allocation2 + $0x58] sm:$0xff] %vm24_vm0, %v1504_v56 }
  0x9e   :  { %v286_v15 = vpack.c.bf16 %v270_v3, %v270_v3  ;;  %v1673_v14 = vunpack.c.l.bf16 %v456_v4  ;;  %v381_v7 = vpack.c.bf16 %v365_v6, %v365_v6  ;;  %v449_v52 = vpack.c.bf16 %v433_v40, %v433_v40  ;;  %38 = vst.msk [vmem:[#allocation2 + $0x68] sm:$0xff] %vm24_vm0, %v1504_v56 }
  0x9f   :  { %v157_v17 = vpop.permute.xlu0 %156  ;;  %514 = vmax.xlane.f32.xlu2 %v1669_v9  ;;  %500 = vmax.xlane.f32.xlu0 %v1671_v10  ;;  %v303_v29 = vunpack.c.l.bf16 %v287_v13  ;;  %v1366_v53 = vunpack.c.l.bf16 %v1374_v48  ;;  %v355_v54 = vmax.f32 %v291_v25, %v307_v36  ;;  %v410_v58 = vunpack.c.l.bf16 %v378_v42  ;;  %39 = vst.msk [vmem:[#allocation2 + $0x70] sm:$0xff] %vm24_vm0, %v1504_v56  ;;  %v1737_v42 = vld [vmem:[#allocation2 + $0x60] sm:$0xff] }
  0xa0   :  { %v302_v22 = vunpack.c.l.bf16 %v286_v15  ;;  %v162_v23 = vperm.slane %v157_v17, %v1586_v37  ;;  %512 = vmax.xlane.f32.xlu1 %v1673_v14  ;;  %v413_v24 = vunpack.c.l.bf16 %v381_v7  ;;  %v1696_v62 = vunpack.c.l.bf16 %v453_v49  ;;  %40 = vst.msk [vmem:[#allocation2 + $0x78] sm:$0xff] %vm24_vm0, %v1504_v56 }
  0xa1   :  { %v319_v44 = vmul.f32 0.20019531, %v303_v29  ;;  %v310_v1 = vmul.f32 0.20019531, %v294_v51  ;;  %v1702_v2 = vunpack.c.l.bf16 %v449_v52  ;;  %v371_v4 = vpack.c.bf16 %v355_v54, %v355_v54 }
  0xa2   :  { %v318_v30 = vmul.f32 0.20019531, %v302_v22  ;;  %v246_v12 = vunpack.c.l.bf16 %v162_v23  ;;  %v445_v20 = vadd.f32 %v1363_v61, %v413_v24  ;;  %v1367_v15 = vunpack.c.h.bf16 %v1374_v48 }
  0xa3   :  { %v367_v61 = vmax.f32 %v303_v29, %v319_v44  ;;  %v1343_v7 = vunpack.c.h.bf16 %v1636_v59  ;;  %v403_v17 = vunpack.c.l.bf16 %v371_v4  ;;  %v358_v18 = vmax.f32 %v294_v51, %v310_v1  ;;  %v1766_v4 = vld [vmem:[#allocation2 + $0x48] sm:$0xff] }
  0xa4   :  { %v263_v32 = vadd.f32 %v1589_v43, %v246_v12  ;;  %v461_v33 = vpack.c.bf16 %v445_v20, %v445_v20  ;;  %v366_v34 = vmax.f32 %v302_v22, %v318_v30  ;;  %v1358_v43 = vunpack.c.l.bf16 %v1623_v41  ;;  %v1370_v41 = vld [vmem:[%s2122_s3 + $0x18] sm:$0xff]  }
  0xa5   :  { %v1351_v3 = vunpack.c.h.bf16 %v1370_v41  ;;  %v383_v11 = vpack.c.bf16 %v367_v61, %v367_v61  ;;  %v435_v24 = vadd.f32 %v1343_v7, %v403_v17  ;;  %v374_v25 = vpack.c.bf16 %v358_v18, %v358_v18 }
  0xa6   :  { %v279_v45 = vpack.c.bf16 %v263_v32, %v263_v32  ;;  %v1685_v46 = vunpack.c.l.bf16 %v461_v33  ;;  %v382_v47 = vpack.c.bf16 %v366_v34, %v366_v34  ;;  %v442_v5 = vadd.f32 %v1358_v43, %v410_v58  ;;  %v1748_v43 = vld [vmem:[#allocation2 + $0x20] sm:$0xff] }
  0xa7   :  { %v415_v22 = vunpack.c.l.bf16 %v383_v11  ;;  %v451_v30 = vpack.c.bf16 %v435_v24, %v435_v24  ;;  %v1350_v12 = vunpack.c.l.bf16 %v1370_v41  ;;  %v406_v20 = vunpack.c.l.bf16 %v374_v25  ;;  %v1768_v11 = vld [vmem:[#allocation2 + $0x40] sm:$0xff] }
  0xa8   :  { %v295_v50 = vunpack.c.l.bf16 %v279_v45  ;;  %496 = vmax.xlane.f32.xlu1 %v1683_v38  ;;  %522 = vmax.xlane.f32.xlu2 %v1685_v46  ;;  %v414_v60 = vunpack.c.l.bf16 %v382_v47  ;;  %v458_v19 = vpack.c.bf16 %v442_v5, %v442_v5 }
  0xa9   :  { %v447_v28 = vadd.f32 %v1367_v15, %v415_v22  ;;  %v1730_v63 = vunpack.c.l.bf16 %v451_v30  ;;  %v438_v32 = vadd.f32 %v1350_v12, %v406_v20 }
  0xaa   :  { %v311_v57 = vmul.f32 0.20019531, %v295_v50  ;;  %v446_v6 = vadd.f32 %v1366_v53, %v414_v60  ;;  %v1716_v59 = vunpack.c.l.bf16 %v458_v19 }
  0xab   :  { %v463_v29 = vpack.c.bf16 %v447_v28, %v447_v28  ;;  %v454_v33 = vpack.c.bf16 %v438_v32, %v438_v32  ;;  %v1791_v28 = vld [vmem:[#allocation2] sm:$0xff] }
  0xac   :  { %v359_v0 = vmax.f32 %v295_v50, %v311_v57  ;;  %v462_v16 = vpack.c.bf16 %v446_v6, %v446_v6  ;;  %v1757_v57 = vld [vmem:[#allocation2 + $0x58] sm:$0xff] }
  0xad   :  { %v1728_v31 = vunpack.c.l.bf16 %v463_v29  ;;  %v1734_v34 = vunpack.c.l.bf16 %v454_v33  ;;  %v1793_v29 = vld [vmem:[#allocation2 + $0x68] sm:$0xff] }
  0xae   :  { %v375_v8 = vpack.c.bf16 %v359_v0, %v359_v0  ;;  %v1718_v26 = vunpack.c.l.bf16 %v462_v16 }
  0xb0   :  { %506 = vmax.xlane.f32.xlu1 %v1696_v62  ;;  %498 = vmax.xlane.f32.xlu2 %v1702_v2  ;;  %v407_v13 = vunpack.c.l.bf16 %v375_v8 }
  0xb2   :  { %v439_v21 = vadd.f32 %v1351_v3, %v407_v13  ;;  %v1770_v13 = vld [vmem:[#allocation2 + $0x10] sm:$0xff] }
  0xb4   :  { %v455_v23 = vpack.c.bf16 %v439_v21, %v439_v21 }
  0xb6   :  { %v1720_v27 = vunpack.c.l.bf16 %v455_v23 }
  0xb8   :  { %516 = vmax.xlane.f32.xlu2 %v1716_v59  ;;  %524 = vmax.xlane.f32.xlu1 %v1718_v26 }
  0xb9   :  { %510 = vmax.xlane.f32.xlu0 %v1720_v27 }
  0xc0   :  { %526 = vmax.xlane.f32.xlu2 %v1728_v31  ;;  %502 = vmax.xlane.f32.xlu1 %v1730_v63 }
  0xc8   :  { %508 = vmax.xlane.f32.xlu2 %v1734_v34 }
  0xfa   :  { %v521_v36 = vpop.xlane.xlu0 %520 }
  0xfb   :  { %v540_v40 = vpack.c.bf16 %v521_v36, %v521_v36 }
  0xfd   :  { %v556_v44 = vunpack.c.l.bf16 %v540_v40 }
  0xff   :  { %v1740_v45 = vmax.f32 %v1737_v42, %v556_v44 }
 0x101   :  { %v588_v47 = vsub.f32 %v1737_v42, %v1740_v45  ;;  %1150 = vst.msk [vmem:[#allocation2 + $0x60] sm:$0xff] %vm24_vm0, %v1740_v45  ;;  %v636_v48 = vpack.c.bf16 %v1740_v45, %v1740_v45 }
 0x102   :  { %v505_v49 = vpop.xlane.xlu0 %504 }
 0x103   :  { %v532_v50 = vpack.c.bf16 %v505_v49, %v505_v49  ;;  %750 = vperm.xlu0 %1402, %v636_v48  }
 0x105   :  { %v548_v51 = vunpack.c.l.bf16 %v532_v50 }
 0x107   :  { %v1751_v52 = vmax.f32 %v1748_v43, %v548_v51  ;;  %v1806_v51 = vld [vmem:[#allocation2 + $0x28] sm:$0xff] }
 0x109   :  { %v580_v53 = vsub.f32 %v1748_v43, %v1751_v52  ;;  %1142 = vst.msk [vmem:[#allocation2 + $0x20] sm:$0xff] %vm24_vm0, %v1751_v52 }
 0x10a   :  { %v519_v54 = vpop.xlane.xlu0 %518 }
 0x10b   :  { %v539_v56 = vpack.c.bf16 %v519_v54, %v519_v54  ;;  %v1808_v54 = vld [vmem:[#allocation2 + $0x8] sm:$0xff] }
 0x10d   :  { %v555_v58 = vunpack.c.l.bf16 %v539_v56 }
 0x10f   :  { %v1760_v60 = vmax.f32 %v1757_v57, %v555_v58 }
 0x111   :  { %1149 = vst.msk [vmem:[#allocation2 + $0x58] sm:$0xff] %vm24_vm0, %v1760_v60 }
 0x112   :  { %v515_v0 = vpop.xlane.xlu2 %514  ;;  %v501_v3 = vpop.xlane.xlu0 %500 }
 0x113   :  { %v537_v41 = vpack.c.bf16 %v515_v0, %v515_v0  ;;  %v513_v1 = vpop.xlane.xlu1 %512  ;;  %v530_v6 = vpack.c.bf16 %v501_v3, %v501_v3 }
 0x114   :  { %v536_v5 = vpack.c.bf16 %v513_v1, %v513_v1 }
 0x115   :  { %v553_v8 = vunpack.c.l.bf16 %v537_v41  ;;  %v546_v7 = vunpack.c.l.bf16 %v530_v6 }
 0x116   :  { %v552_v15 = vunpack.c.l.bf16 %v536_v5 }
 0x117   :  { %v1773_v17 = vmax.f32 %v1766_v4, %v553_v8  ;;  %v1779_v19 = vmax.f32 %v1770_v13, %v546_v7  ;;  %v628_v8 = vpack.c.bf16 %v1751_v52, %v1751_v52 }
 0x118   :  { %v1776_v18 = vmax.f32 %v1768_v11, %v552_v15 }
 0x119   :  { %1147 = vst.msk [vmem:[#allocation2 + $0x48] sm:$0xff] %vm24_vm0, %v1773_v17  ;;  %v633_v16 = vpack.c.bf16 %v1773_v17, %v1773_v17 }
 0x11a   :  { %1146 = vst.msk [vmem:[#allocation2 + $0x40] sm:$0xff] %vm24_vm0, %v1776_v18  ;;  %v632_v21 = vpack.c.bf16 %v1776_v18, %v1776_v18  ;;  %v584_v43 = vsub.f32 %v1768_v11, %v1776_v18  ;;  %v616_v11 = vmul.f32 1.442695, %v588_v47 }
 0x11b   :  { %1140 = vst.msk [vmem:[#allocation2 + $0x10] sm:$0xff] %vm24_vm0, %v1779_v19  ;;  %v497_v22 = vpop.xlane.xlu1 %496  ;;  %v523_v23 = vpop.xlane.xlu2 %522  ;;  %723 = vperm.xlu2 %1404, %v633_v16  }
 0x11c   :  { %v528_v24 = vpack.c.bf16 %v497_v22, %v497_v22  ;;  %v541_v25 = vpack.c.bf16 %v523_v23, %v523_v23  ;;  %714 = vperm.xlu1 %1403, %v632_v21   ;;  %v1821_v21 = vld [vmem:[#allocation2 + $0x50] sm:$0xff] }
 0x11d   :  { %v1823_v22 = vld [vmem:[#allocation2 + $0x70] sm:$0xff] }
 0x11e   :  { %v544_v30 = vunpack.c.l.bf16 %v528_v24  ;;  %v557_v12 = vunpack.c.l.bf16 %v541_v25 }
 0x120   :  { %v560_v20 = vmax.f32 %v1791_v28, %v544_v30  ;;  %v1797_v32 = vmax.f32 %v1793_v29, %v557_v12  ;;  %v1825_v30 = vld [vmem:[#allocation2 + $0x38] sm:$0xff] }
 0x122   :  { %1138 = vst.msk [vmem:[#allocation2] sm:$0xff] %vm24_vm0, %v560_v20  ;;  %v637_v36 = vpack.c.bf16 %v1797_v32, %v1797_v32  ;;  %v624_v40 = vpack.c.bf16 %v560_v20, %v560_v20  ;;  %v2127_v47 = vsub.f32 %v1793_v29, %v1797_v32  ;;  %v1333_v29 = vld [vmem:[%s2123_s2 + $0x28] sm:$0xff] }
 0x123   :  { %1151 = vst.msk [vmem:[#allocation2 + $0x68] sm:$0xff] %vm24_vm0, %v1797_v32  ;;  %v507_v44 = vpop.xlane.xlu1 %506  ;;  %v499_v48 = vpop.xlane.xlu2 %498 }
 0x124   :  { %v533_v49 = vpack.c.bf16 %v507_v44, %v507_v44  ;;  %v529_v50 = vpack.c.bf16 %v499_v48, %v499_v48  ;;  %759 = vperm.xlu1 %1403, %v637_v36   ;;  %642 = vperm.xlu0 %1402, %v624_v40  }
 0x126   :  { %v549_v56 = vunpack.c.l.bf16 %v533_v49  ;;  %v545_v58 = vunpack.c.l.bf16 %v529_v50 }
 0x128   :  { %v1811_v0 = vmax.f32 %v1806_v51, %v549_v56  ;;  %v561_v41 = vmax.f32 %v1808_v54, %v545_v58  ;;  %v635_v58 = vpack.c.bf16 %v1760_v60, %v1760_v60 }
 0x12a   :  { %1143 = vst.msk [vmem:[#allocation2 + $0x28] sm:$0xff] %vm24_vm0, %v1811_v0  ;;  %v625_v1 = vpack.c.bf16 %v561_v41, %v561_v41  ;;  %v629_v3 = vpack.c.bf16 %v1811_v0, %v1811_v0 }
 0x12b   :  { %1139 = vst.msk [vmem:[#allocation2 + $0x8] sm:$0xff] %vm24_vm0, %v561_v41  ;;  %v517_v5 = vpop.xlane.xlu2 %516  ;;  %v525_v6 = vpop.xlane.xlu1 %524 }
 0x12c   :  { %v538_v15 = vpack.c.bf16 %v517_v5, %v517_v5  ;;  %v542_v7 = vpack.c.bf16 %v525_v6, %v525_v6  ;;  %v511_v16 = vpop.xlane.xlu0 %510  ;;  %651 = vperm.xlu2 %1404, %v625_v1   ;;  %687 = vperm.xlu0 %1402, %v629_v3   ;;  %v576_v5 = vsub.f32 %v1791_v28, %v560_v20  ;;  %v1849_v6 = vld [vmem:[#allocation2 + $0x78] sm:$0xff] }
 0x12d   :  { %v535_v23 = vpack.c.bf16 %v511_v16, %v511_v16  ;;  %678 = vperm.xlu1 %1403, %v628_v8   ;;  %v467_v8 = vld [vmem:[#allocation2 + $0x18] sm:$0xff]  ;;  %v626_v20 = vpack.c.bf16 %v1779_v19, %v1779_v19 }
 0x12e   :  { %v554_v24 = vunpack.c.l.bf16 %v538_v15  ;;  %v558_v25 = vunpack.c.l.bf16 %v542_v7 }
 0x12f   :  { %v551_v12 = vunpack.c.l.bf16 %v535_v23 }
 0x130   :  { %v1828_v36 = vmax.f32 %v1821_v21, %v554_v24  ;;  %v1831_v40 = vmax.f32 %v1823_v22, %v558_v25  ;;  %v592_v24 = vmul.f32 1.442695, %v576_v5 }
 0x131   :  { %v1834_v44 = vmax.f32 %v1825_v30, %v551_v12 }
 0x132   :  { %1148 = vst.msk [vmem:[#allocation2 + $0x50] sm:$0xff] %vm24_vm0, %v1828_v36  ;;  %v634_v48 = vpack.c.bf16 %v1828_v36, %v1828_v36  ;;  %v638_v49 = vpack.c.bf16 %v1831_v40, %v1831_v40  ;;  %1406 = vpow2.f32 %v592_v24  ;;  %v590_v45 = vsub.f32 %v1823_v22, %v1831_v40  ;;  %v1334_v22 = vld [vmem:[%s2123_s2 + $0x30] sm:$0xff] }
 0x133   :  { %1152 = vst.msk [vmem:[#allocation2 + $0x70] sm:$0xff] %vm24_vm0, %v1831_v40  ;;  %v527_v50 = vpop.xlane.xlu2 %526  ;;  %v503_v56 = vpop.xlane.xlu1 %502 }
 0x134   :  { %1145 = vst.msk [vmem:[#allocation2 + $0x38] sm:$0xff] %vm24_vm0, %v1834_v44  ;;  %v543_v1 = vpack.c.bf16 %v527_v50, %v527_v50  ;;  %v531_v3 = vpack.c.bf16 %v503_v56, %v503_v56  ;;  %732 = vperm.xlu2 %1404, %v634_v48   ;;  %768 = vperm.xlu0 %1402, %v638_v49   ;;  %v470_v56 = vld [vmem:[#allocation2 + $0x30] sm:$0xff] }
 0x135   :  { %741 = vperm.xlu1 %1403, %v635_v58   ;;  %v577_v48 = vsub.f32 %v1808_v54, %v561_v41  ;;  %v578_v58 = vsub.f32 %v1770_v13, %v1779_v19  ;;  %v631_v54 = vpack.c.bf16 %v1834_v44, %v1834_v44  ;;  %v581_v13 = vsub.f32 %v1806_v51, %v1811_v0 }
 0x136   :  { %v559_v15 = vunpack.c.l.bf16 %v543_v1  ;;  %v547_v7 = vunpack.c.l.bf16 %v531_v3  ;;  %v600_v19 = vmul.f32 1.442695, %v580_v53  ;;  %v608_v0 = vmul.f32 1.442695, %v584_v43 }
 0x137   :  { %v594_v3 = vmul.f32 1.442695, %v577_v48  ;;  %v602_v24 = vmul.f32 1.442695, %v581_v13 }
 0x138   :  { %v1852_v16 = vmax.f32 %v1849_v6, %v559_v15  ;;  %v563_v23 = vmax.f32 %v467_v8, %v547_v7  ;;  %v596_v7 = vmul.f32 1.442695, %v578_v58  ;;  %v1407_v61 = vpop.eup %1406 }
 0x139   :  { %1408 = vpow2.f32 %v594_v3  ;;  %v1330_v3 = vld [vmem:[%s2123_s2 + $0x10] sm:$0xff] }
 0x13a   :  { %1153 = vst.msk [vmem:[#allocation2 + $0x78] sm:$0xff] %vm24_vm0, %v1852_v16  ;;  %v639_v25 = vpack.c.bf16 %v1852_v16, %v1852_v16  ;;  %v627_v12 = vpack.c.bf16 %v563_v23, %v563_v23  ;;  %v579_v50 = vsub.f32 %v467_v8, %v563_v23  ;;  %v591_v42 = vsub.f32 %v1849_v6, %v1852_v16  ;;  %v1332_v16 = vld [vmem:[%s2123_s2 + $0x20] sm:$0xff] }
 0x13b   :  { %1141 = vst.msk [vmem:[#allocation2 + $0x18] sm:$0xff] %vm24_vm0, %v563_v23  ;;  %v509_v28 = vpop.xlane.xlu2 %508 }
 0x13c   :  { %v534_v49 = vpack.c.bf16 %v509_v28, %v509_v28  ;;  %777 = vperm.xlu2 %1404, %v639_v25   ;;  %669 = vperm.xlu0 %1402, %v627_v12   ;;  %v598_v15 = vmul.f32 1.442695, %v579_v50 }
 0x13d   :  { %660 = vperm.xlu1 %1403, %v626_v20  }
 0x13e   :  { %v550_v1 = vunpack.c.l.bf16 %v534_v49  ;;  %1410 = vpow2.f32 %v598_v15  ;;  %v1335_v49 = vld [vmem:[%s2123_s2 + $0x38] sm:$0xff]  ;;  %v1328_v15 = vld [vmem:[%s2123_s2] sm:$0xff] }
 0x13f   :  { %1412 = vpow2.f32 %v596_v7  ;;  %v1409_v23 = vpop.eup %1408  ;;  %1376 = vmatpush.bf16.msra.mxu2 %v1335_v49  ;;  %1056 = vmatpush.bf16.msra.mxu0 %v1335_v49 }
 0x140   :  { %v566_v5 = vmax.f32 %v470_v56, %v550_v1  ;;  %1414 = vpow2.f32 %v600_v19  ;;  %1377 = vmatpush.bf16.msra.mxu3 %v1335_v49  ;;  %1375 = vmatpush.bf16.msra.mxu1 %v1335_v49  ;;  %v1331_v1 = vld [vmem:[%s2123_s2 + $0x18] sm:$0xff] }
 0x142   :  { %1144 = vst.msk [vmem:[#allocation2 + $0x30] sm:$0xff] %vm24_vm0, %v566_v5  ;;  %v630_v33 = vpack.c.bf16 %v566_v5, %v566_v5  ;;  %v582_v41 = vsub.f32 %v470_v56, %v566_v5  ;;  %v1329_v5 = vld [vmem:[%s2123_s2 + $0x8] sm:$0xff] }
 0x143   :  { %1379 = vmatpush.bf16.msra.mxu2 %v1334_v22  ;;  %1057 = vmatpush.bf16.msra.mxu0 %v1334_v22 }
 0x144   :  { %696 = vperm.xlu2 %1404, %v630_v33   ;;  %898 = vperm.xlu0 %1402, %v1407_v61   ;;  %v604_v8 = vmul.f32 1.442695, %v582_v41  ;;  %v1411_v25 = vpop.eup %1410  ;;  %v585_v61 = vsub.f32 %v1766_v4, %v1773_v17  ;;  %v583_v33 = vsub.f32 %v1825_v30, %v1834_v44  ;;  %v586_v4 = vsub.f32 %v1821_v21, %v1828_v36 }
 0x145   :  { %705 = vperm.xlu1 %1403, %v631_v54   ;;  %v1413_v12 = vpop.eup %1412  ;;  %v2126_v30 = vsub.f32 %v1757_v57, %v1760_v60  ;;  %v618_v57 = vmul.f32 1.442695, %v2127_v47  ;;  %v622_v60 = vmul.f32 1.442695, %v591_v42  ;;  %v620_v36 = vmul.f32 1.442695, %v590_v45  ;;  %1380 = vmatpush.bf16.msra.mxu3 %v1334_v22 }
 0x146   :  { %1416 = vpow2.f32 %v604_v8  ;;  %v610_v52 = vmul.f32 1.442695, %v585_v61  ;;  %v606_v53 = vmul.f32 1.442695, %v583_v33  ;;  %v1415_v51 = vpop.eup %1414  ;;  %v612_v17 = vmul.f32 1.442695, %v586_v4  ;;  %1378 = vmatpush.bf16.msra.mxu1 %v1334_v22 }
 0x147   :  { %1418 = vpow2.f32 %v602_v24  ;;  %v614_v44 = vmul.f32 1.442695, %v2126_v30  ;;  %1382 = vmatpush.bf16.msra.mxu2 %v1333_v29  ;;  %1058 = vmatpush.bf16.msra.mxu0 %v1333_v29 }
 0x148   :  { %1420 = vpow2.f32 %v610_v52 }
 0x149   :  { %1422 = vpow2.f32 %v606_v53  ;;  %1383 = vmatpush.bf16.msra.mxu3 %v1333_v29 }
 0x14a   :  { %1424 = vpow2.f32 %v608_v0  ;;  %1381 = vmatpush.bf16.msra.mxu1 %v1333_v29 }
 0x14b   :  { %1426 = vpow2.f32 %v616_v11  ;;  %1385 = vmatpush.bf16.msra.mxu2 %v1332_v16  ;;  %1059 = vmatpush.bf16.msra.mxu0 %v1332_v16 }
 0x14c   :  { %903 = vperm.xlu2 %1404, %v1409_v23   ;;  %913 = vperm.xlu0 %1402, %v1411_v25   ;;  %v1417_v28 = vpop.eup %1416  ;;  %1428 = vpow2.f32 %v612_v17 }
 0x14d   :  { %908 = vperm.xlu1 %1403, %v1413_v12   ;;  %v1419_v20 = vpop.eup %1418  ;;  %1430 = vpow2.f32 %v614_v44  ;;  %1386 = vmatpush.bf16.msra.mxu3 %v1332_v16 }
 0x14e   :  { %v1421_v18 = vpop.eup %1420  ;;  %1432 = vpow2.f32 %v618_v57  ;;  %1384 = vmatpush.bf16.msra.mxu1 %v1332_v16 }
 0x14f   :  { %v1423_v48 = vpop.eup %1422  ;;  %1434 = vpow2.f32 %v622_v60  ;;  %1388 = vmatpush.bf16.msra.mxu2 %v1331_v1  ;;  %1060 = vmatpush.bf16.msra.mxu0 %v1331_v1 }
 0x150   :  { %v1425_v50 = vpop.eup %1424  ;;  %1436 = vpow2.f32 %v620_v36 }
 0x151   :  { %v1427_v21 = vpop.eup %1426  ;;  %1389 = vmatpush.bf16.msra.mxu3 %v1331_v1 }
 0x152   :  { %v1429_v56 = vpop.eup %1428  ;;  %1387 = vmatpush.bf16.msra.mxu1 %v1331_v1 }
 0x153   :  { %v1431_v58 = vpop.eup %1430  ;;  %1391 = vmatpush.bf16.msra.mxu2 %v1330_v3  ;;  %1061 = vmatpush.bf16.msra.mxu0 %v1330_v3 }
 0x154   :  { %928 = vperm.xlu0 %1402, %v1417_v28   ;;  %918 = vperm.xlu2 %1404, %v1415_v51   ;;  %v1433_v40 = vpop.eup %1432 }
 0x155   :  { %923 = vperm.xlu1 %1403, %v1419_v20   ;;  %v1435_v6 = vpop.eup %1434  ;;  %1392 = vmatpush.bf16.msra.mxu3 %v1330_v3 }
 0x156   :  { %v1437_v32 = vpop.eup %1436  ;;  %1390 = vmatpush.bf16.msra.mxu1 %v1330_v3 }
 0x157   :  { %1394 = vmatpush.bf16.msra.mxu2 %v1329_v5  ;;  %1062 = vmatpush.bf16.msra.mxu0 %v1329_v5 }
 0x159   :  { %1395 = vmatpush.bf16.msra.mxu3 %v1329_v5 }
 0x15a   :  { %1393 = vmatpush.bf16.msra.mxu1 %v1329_v5 }
 0x15b   :  { %1397 = vmatpush.bf16.msra.mxu2 %v1328_v15  ;;  %1063 = vmatpush.bf16.msra.mxu0 %v1328_v15 }
 0x15c   :  { %943 = vperm.xlu0 %1402, %v1421_v18   ;;  %933 = vperm.xlu2 %1404, %v1423_v48  }
 0x15d   :  { %938 = vperm.xlu1 %1403, %v1425_v50   ;;  %1398 = vmatpush.bf16.msra.mxu3 %v1328_v15 }
 0x15e   :  { %1396 = vmatpush.bf16.msra.mxu1 %v1328_v15 }
 0x164   :  { %958 = vperm.xlu0 %1402, %v1427_v21   ;;  %948 = vperm.xlu2 %1404, %v1429_v56  }
 0x165   :  { %953 = vperm.xlu1 %1403, %v1431_v58  }
 0x16c   :  { %973 = vperm.xlu0 %1402, %v1435_v6   ;;  %963 = vperm.xlu2 %1404, %v1433_v40  }
 0x16d   :  { %968 = vperm.xlu1 %1403, %v1437_v32  }
 0x175   :  { %v724_v7 = vpop.permute.xlu2 %723  ;;  %v751_v8 = vpop.permute.xlu0 %750 }
 0x176   :  { %v729_v54 = vperm.slane %v724_v7, %v1586_v37  ;;  %v756_v12 = vperm.slane %v751_v8, %v1586_v37 }
 0x178   :  { %v793_v19 = vunpack.c.l.bf16 %v729_v54  ;;  %v796_v51 = vunpack.c.l.bf16 %v756_v12 }
 0x17a   :  { %v809_v25 = vsub.f32 %v1669_v9, %v793_v19 }
 0x186   :  { %v652_v41 = vpop.permute.xlu2 %651 }
 0x187   :  { %v657_v33 = vperm.slane %v652_v41, %v1586_v37 }
 0x189   :  { %v785_v11 = vunpack.c.l.bf16 %v657_v33 }
 0x18b   :  { %v801_v49 = vsub.f32 %v1702_v2, %v785_v11 }
 0x18e   :  { %v715_v13 = vpop.permute.xlu1 %714  ;;  %v733_v52 = vpop.permute.xlu2 %732 }
 0x18f   :  { %v720_v23 = vperm.slane %v715_v13, %v1586_v37  ;;  %v738_v1 = vperm.slane %v733_v52, %v1586_v37 }
 0x191   :  { %v792_v24 = vunpack.c.l.bf16 %v720_v23  ;;  %v794_v41 = vunpack.c.l.bf16 %v738_v1 }
 0x193   :  { %v808_v61 = vsub.f32 %v1673_v14, %v792_v24  ;;  %v812_v14 = vsub.f32 %v1617_v35, %v796_v51  ;;  %v810_v51 = vsub.f32 %v1716_v59, %v794_v41 }
 0x195   :  { %v820_v43 = vpack.c.bf16 %v809_v25, %v808_v61 }
 0x196   :  { %v760_v53 = vpop.permute.xlu1 %759  ;;  %v643_v4 = vpop.permute.xlu0 %642 }
 0x197   :  { %v832_v0 = vunpack.c.l.bf16 %v820_v43  ;;  %v833_v28 = vunpack.c.h.bf16 %v820_v43  ;;  %v765_v20 = vperm.slane %v760_v53, %v1586_v37  ;;  %v648_v17 = vperm.slane %v643_v4, %v1586_v37  ;;  %v778_v36 = vpop.permute.xlu2 %777 }
 0x198   :  { %v783_v3 = vperm.slane %v778_v36, %v1586_v37 }
 0x199   :  { %v856_v18 = vmul.f32 1.442695, %v832_v0  ;;  %v858_v9 = vmul.f32 1.442695, %v833_v28  ;;  %v797_v30 = vunpack.c.l.bf16 %v765_v20  ;;  %v784_v44 = vunpack.c.l.bf16 %v648_v17 }
 0x19a   :  { %v799_v13 = vunpack.c.l.bf16 %v783_v3 }
 0x19b   :  { %1438 = vpow2.f32 %v856_v18  ;;  %v813_v48 = vsub.f32 %v1685_v46, %v797_v30  ;;  %v800_v50 = vsub.f32 %v1683_v38, %v784_v44 }
 0x19c   :  { %1440 = vpow2.f32 %v858_v9  ;;  %v815_v20 = vsub.f32 %v1728_v31, %v799_v13 }
 0x19d   :  { %v822_v42 = vpack.c.bf16 %v813_v48, %v812_v14  ;;  %v816_v45 = vpack.c.bf16 %v801_v49, %v800_v50 }
 0x19e   :  { %v688_v21 = vpop.permute.xlu0 %687 }
 0x19f   :  { %v836_v47 = vunpack.c.l.bf16 %v822_v42  ;;  %v837_v57 = vunpack.c.h.bf16 %v822_v42  ;;  %v679_v60 = vpop.permute.xlu1 %678  ;;  %v824_v56 = vunpack.c.l.bf16 %v816_v45  ;;  %v825_v58 = vunpack.c.h.bf16 %v816_v45  ;;  %v697_v50 = vpop.permute.xlu2 %696 }
 0x1a0   :  { %v684_v22 = vperm.slane %v679_v60, %v1586_v37  ;;  %v693_v35 = vperm.slane %v688_v21, %v1586_v37 }
 0x1a1   :  { %v1439_v40 = vpop.eup %1438  ;;  %v864_v46 = vmul.f32 1.442695, %v836_v47  ;;  %v866_v6 = vmul.f32 1.442695, %v837_v57  ;;  %v840_v29 = vmul.f32 1.442695, %v824_v56  ;;  %v702_v56 = vperm.slane %v697_v50, %v1586_v37 }
 0x1a2   :  { %v1441_v2 = vpop.eup %1440  ;;  %v842_v32 = vmul.f32 1.442695, %v825_v58  ;;  %v788_v38 = vunpack.c.l.bf16 %v684_v22  ;;  %v789_v16 = vunpack.c.l.bf16 %v693_v35 }
 0x1a3   :  { %1442 = vpow2.f32 %v864_v46  ;;  %v876_v5 = vpack.c.bf16 %v1441_v2, %v1439_v40 }
 0x1a4   :  { %1444 = vpow2.f32 %v866_v6  ;;  %v804_v15 = vsub.f32 %v1631_v55, %v788_v38  ;;  %v805_v7 = vsub.f32 %v1696_v62, %v789_v16  ;;  %v790_v6 = vunpack.c.l.bf16 %v702_v56 }
 0x1a5   :  { %1446 = vpow2.f32 %v840_v29  ;;  %1084 = vmatmul.bf16.vlgmr.msra.gmra.mxu2 %v876_v5 }
 0x1a6   :  { %1448 = vpow2.f32 %v842_v32  ;;  %v818_v54 = vpack.c.bf16 %v805_v7, %v804_v15  ;;  %v769_v8 = vpop.permute.xlu0 %768 }
 0x1a7   :  { %v742_v19 = vpop.permute.xlu1 %741  ;;  %v774_v12 = vperm.slane %v769_v8, %v1586_v37 }
 0x1a8   :  { %v828_v23 = vunpack.c.l.bf16 %v818_v54  ;;  %v829_v24 = vunpack.c.h.bf16 %v818_v54  ;;  %v747_v25 = vperm.slane %v742_v19, %v1586_v37 }
 0x1a9   :  { %v1443_v61 = vpop.eup %1442  ;;  %v798_v62 = vunpack.c.l.bf16 %v774_v12 }
 0x1aa   :  { %v1445_v33 = vpop.eup %1444  ;;  %v848_v43 = vmul.f32 1.442695, %v828_v23  ;;  %v850_v55 = vmul.f32 1.442695, %v829_v24  ;;  %v795_v52 = vunpack.c.l.bf16 %v747_v25 }
 0x1ab   :  { %v1447_v53 = vpop.eup %1446  ;;  %v878_v0 = vpack.c.bf16 %v1445_v33, %v1443_v61  ;;  %v814_v11 = vsub.f32 %v1718_v26, %v798_v62 }
 0x1ac   :  { %v1449_v28 = vpop.eup %1448  ;;  %1450 = vpow2.f32 %v848_v43  ;;  %v811_v4 = vsub.f32 %v1660_v39, %v795_v52 }
 0x1ad   :  { %1452 = vpow2.f32 %v850_v55  ;;  %v872_v17 = vpack.c.bf16 %v1449_v28, %v1447_v53  ;;  %1094 = vmatmul.bf16.vlgmr.msra.gmra.mxu3 %v878_v0  ;;  %v823_v9 = vpack.c.bf16 %v815_v20, %v814_v11  ;;  %v904_v53 = vpop.permute.xlu2 %903 }
 0x1ae   :  { %v821_v18 = vpack.c.bf16 %v811_v4, %v810_v51  ;;  %v670_v44 = vpop.permute.xlu0 %669  ;;  %v1173_v51 = vlaneseq }
 0x1af   :  { %1064 = vmatmul.bf16.vlgmr.msra.gmra.mxu0 %v872_v17  ;;  %v661_v30 = vpop.permute.xlu1 %660  ;;  %v838_v59 = vunpack.c.l.bf16 %v823_v9  ;;  %v839_v49 = vunpack.c.h.bf16 %v823_v9  ;;  %v675_v42 = vperm.slane %v670_v44, %v1586_v37 }
 0x1b0   :  { %v834_v14 = vunpack.c.l.bf16 %v821_v18  ;;  %v835_v48 = vunpack.c.h.bf16 %v821_v18  ;;  %v666_v31 = vperm.slane %v661_v30, %v1586_v37  ;;  %v1951_v20 = vand.u32 127, %v1173_v51 }
 0x1b1   :  { %v868_v47 = vmul.f32 1.442695, %v838_v59  ;;  %v870_v60 = vmul.f32 1.442695, %v839_v49  ;;  %v787_v36 = vunpack.c.l.bf16 %v675_v42 }
 0x1b2   :  { %v1451_v39 = vpop.eup %1450  ;;  %v860_v45 = vmul.f32 1.442695, %v834_v14  ;;  %v862_v26 = vmul.f32 1.442695, %v835_v48  ;;  %v786_v21 = vunpack.c.l.bf16 %v666_v31  ;;  %vm1175_vm1 = vcmp.eq.s32.totalorder %v1951_v20, 4 }
 0x1b3   :  { %v1453_v57 = vpop.eup %1452  ;;  %v803_v35 = vsub.f32 %v1730_v63, %v787_v36 }
 0x1b4   :  { %1454 = vpow2.f32 %v860_v45  ;;  %v874_v58 = vpack.c.bf16 %v1453_v57, %v1451_v39  ;;  %v802_v22 = vsub.f32 %v1671_v10, %v786_v21  ;;  %v806_v10 = vsub.f32 %v1734_v34, %v790_v6 }
 0x1b5   :  { %1456 = vpow2.f32 %v862_v26  ;;  %v919_v17 = vpop.permute.xlu2 %918  ;;  %v977_v21 = vmul.f32 0.0, %v904_v53 }
 0x1b6   :  { %1458 = vpow2.f32 %v868_v47  ;;  %1074 = vmatmul.bf16.vlgmr.msra.gmra.mxu1 %v874_v58  ;;  %v817_v40 = vpack.c.bf16 %v803_v35, %v802_v22  ;;  %v899_v33 = vpop.permute.xlu0 %898  ;;  %v980_v31 = vmul.f32 0.0, %v919_v17 }
 0x1b7   :  { %1460 = vpow2.f32 %v870_v60  ;;  %v706_v46 = vpop.permute.xlu1 %705  ;;  %v976_v9 = vmul.f32 0.0, %v899_v33 }
 0x1b8   :  { %v711_v2 = vperm.slane %v706_v46, %v1586_v37  ;;  %v826_v29 = vunpack.c.l.bf16 %v817_v40  ;;  %v827_v32 = vunpack.c.h.bf16 %v817_v40 }
 0x1ba   :  { %v1455_v38 = vpop.eup %1454  ;;  %v791_v16 = vunpack.c.l.bf16 %v711_v2  ;;  %v844_v3 = vmul.f32 1.442695, %v826_v29  ;;  %v846_v5 = vmul.f32 1.442695, %v827_v32 }
 0x1bb   :  { %v1457_v1 = vpop.eup %1456 }
 0x1bc   :  { %v1459_v15 = vpop.eup %1458  ;;  %v807_v63 = vsub.f32 %v1720_v27, %v791_v16  ;;  %v877_v7 = vpack.c.bf16 %v1457_v1, %v1455_v38  ;;  %1462 = vpow2.f32 %v844_v3 }
 0x1bd   :  { %v1461_v54 = vpop.eup %1460  ;;  %1464 = vpow2.f32 %v846_v5  ;;  %v934_v42 = vpop.permute.xlu2 %933 }
 0x1be   :  { %v819_v41 = vpack.c.bf16 %v807_v63, %v806_v10  ;;  %1089 = vmatmul.bf16.gmra.mxu2 %v877_v7  ;;  %v879_v13 = vpack.c.bf16 %v1461_v54, %v1459_v15  ;;  %v1949_v55 = vpop.permute.xlu0 %913 }
 0x1bf   :  { %v909_v43 = vpop.permute.xlu1 %908 }
 0x1c0   :  { %v830_v37 = vunpack.c.l.bf16 %v819_v41  ;;  %v831_v19 = vunpack.c.h.bf16 %v819_v41  ;;  %1099 = vmatmul.bf16.gmra.mxu3 %v879_v13  ;;  %v978_v3 = vmul.f32 0.0, %v909_v43  ;;  %v983_v43 = vmul.f32 0.0, %v934_v42  ;;  %v2038_v42 = vld [vmem:[%s2124_s4] ss:$0 sm:$0xff] }
 0x1c2   :  { %v852_v8 = vmul.f32 1.442695, %v830_v37  ;;  %v854_v23 = vmul.f32 1.442695, %v831_v19  ;;  %v1463_v24 = vpop.eup %1462 }
 0x1c3   :  { %v1465_v25 = vpop.eup %1464 }
 0x1c4   :  { %1466 = vpow2.f32 %v852_v8  ;;  %v873_v12 = vpack.c.bf16 %v1465_v25, %v1463_v24 }
 0x1c5   :  { %1468 = vpow2.f32 %v854_v23  ;;  %v949_v6 = vpop.permute.xlu2 %948 }
 0x1c6   :  { %1069 = vmatmul.bf16.gmra.mxu0 %v873_v12  ;;  %v929_v62 = vpop.permute.xlu0 %928  ;;  %v986_v38 = vmul.f32 0.0, %v949_v6 }
 0x1c7   :  { %v924_v52 = vpop.permute.xlu1 %923  ;;  %v982_v37 = vmul.f32 0.0, %v929_v62 }
 0x1c8   :  { %v981_v58 = vmul.f32 0.0, %v924_v52 }
 0x1ca   :  { %v1467_v34 = vpop.eup %1466 }
 0x1cb   :  { %v1469_v27 = vpop.eup %1468 }
 0x1cc   :  { %v875_v61 = vpack.c.bf16 %v1469_v27, %v1467_v34 }
 0x1ce   :  { %1079 = vmatmul.bf16.gmra.mxu1 %v875_v61  ;;  %v944_v28 = vpop.permute.xlu0 %943  ;;  %v979_v61 = vmul.f32 0.0, %v1949_v55 }
 0x1cf   :  { %v939_v0 = vpop.permute.xlu1 %938  ;;  %v985_v56 = vmul.f32 0.0, %v944_v28 }
 0x1d0   :  { %v984_v4 = vmul.f32 0.0, %v939_v0  ;;  %v964_v0 = vpop.permute.xlu2 %963 }
 0x1d6   :  { %v959_v48 = vpop.permute.xlu0 %958 }
 0x1d7   :  { %v988_v50 = vmul.f32 0.0, %v959_v48  ;;  %v954_v15 = vpop.permute.xlu1 %953 }
 0x1d8   :  { %v987_v41 = vmul.f32 0.0, %v954_v15 }
 0x1de   :  { %v974_v28 = vpop.permute.xlu0 %973 }
 0x1df   :  { %v969_v25 = vpop.permute.xlu1 %968 }
 0x1e0   :  { %v990_v33 = vmul.f32 0.0, %v969_v25 }
 0x228   :  { %v1085_v11 = vpop.f32.mrf.mxu2 }
 0x229   :  { %v1954_v18 = vadd.f32 %v1085_v11, %v984_v4 }
 0x22b   :  { %v1184_v30 = vsel %vm1175_vm1, %v1954_v18, 0.0 }
 0x22c   :  { %v1065_v44 = vpop.f32.mrf.mxu0  ;;  %1208 = vadd.xlane.f32.xlu0 %v1184_v30  ;;  %v991_v30 = vmul.f32 0.0, %v974_v28 }
 0x22d   :  { %v1959_v14 = vadd.f32 %v1065_v44, %v976_v9  ;;  %v989_v9 = vmul.f32 0.0, %v964_v0 }
 0x22f   :  { %v1176_v59 = vsel %vm1175_vm1, %v1959_v14, 0.0 }
 0x230   :  { %1192 = vadd.xlane.f32.xlu2 %v1176_v59  ;;  %v1095_v49 = vpop.f32.mrf.mxu3  ;;  %v1087_v36 = vpop.f32.mrf.mxu2 }
 0x231   :  { %v1964_v39 = vadd.f32 %v1095_v49, %v988_v50  ;;  %v1976_v35 = vadd.f32 %v1087_v36, %v985_v56 }
 0x233   :  { %v1075_v45 = vpop.f32.mrf.mxu1  ;;  %v1188_v60 = vsel %vm1175_vm1, %v1964_v39, 0.0  ;;  %v1185_v32 = vsel %vm1175_vm1, %v1976_v35, 0.0 }
 0x234   :  { %v1966_v26 = vadd.f32 %v1075_v45, %v980_v31  ;;  %v1067_v57 = vpop.f32.mrf.mxu0 }
 0x235   :  { %v1974_v22 = vadd.f32 %v1067_v57, %v977_v21 }
 0x236   :  { %v1180_v47 = vsel %vm1175_vm1, %v1966_v26, 0.0 }
 0x237   :  { %1200 = vadd.xlane.f32.xlu1 %v1180_v47  ;;  %v1177_v2 = vsel %vm1175_vm1, %v1974_v22, 0.0 }
 0x238   :  { %1216 = vadd.xlane.f32.xlu2 %v1188_v60  ;;  %v1097_v5 = vpop.f32.mrf.mxu3 }
 0x239   :  { %v2025_v44 = vadd.f32 %v1097_v5, %v989_v9 }
 0x23b   :  { %v1077_v40 = vpop.f32.mrf.mxu1  ;;  %v1189_v59 = vsel %vm1175_vm1, %v2025_v44, 0.0 }
 0x23c   :  { %v1978_v46 = vadd.f32 %v1077_v40, %v981_v58 }
 0x23e   :  { %v1181_v29 = vsel %vm1175_vm1, %v1978_v46, 0.0 }
 0x23f   :  { %1194 = vadd.xlane.f32.xlu1 %v1177_v2  ;;  %1202 = vadd.xlane.f32.xlu0 %v1181_v29 }
 0x240   :  { %1210 = vadd.xlane.f32.xlu2 %v1185_v32 }
 0x241   :  { %v1090_v16 = vpop.f32.mrf.mxu2 }
 0x242   :  { %v1989_v1 = vadd.f32 %v1090_v16, %v986_v38 }
 0x243   :  { %v1070_v10 = vpop.f32.mrf.mxu0  ;;  %v1100_v24 = vpop.f32.mrf.mxu3 }
 0x244   :  { %v1991_v63 = vadd.f32 %v1070_v10, %v978_v3  ;;  %v1186_v7 = vsel %vm1175_vm1, %v1989_v1, 0.0  ;;  %v2012_v62 = vadd.f32 %v1100_v24, %v990_v33 }
 0x246   :  { %v1178_v54 = vsel %vm1175_vm1, %v1991_v63, 0.0  ;;  %v1190_v17 = vsel %vm1175_vm1, %v2012_v62, 0.0 }
 0x247   :  { %1212 = vadd.xlane.f32.xlu1 %v1186_v7  ;;  %1196 = vadd.xlane.f32.xlu0 %v1178_v54 }
 0x249   :  { %v1092_v13 = vpop.f32.mrf.mxu2 }
 0x24a   :  { %v1999_v19 = vadd.f32 %v1092_v13, %v987_v41 }
 0x24b   :  { %v1080_v8 = vpop.f32.mrf.mxu1  ;;  %v1072_v34 = vpop.f32.mrf.mxu0 }
 0x24c   :  { %v2001_v23 = vadd.f32 %v1080_v8, %v982_v37  ;;  %v1187_v27 = vsel %vm1175_vm1, %v1999_v19, 0.0  ;;  %v2010_v52 = vadd.f32 %v1072_v34, %v979_v61  ;;  %v1102_v11 = vpop.f32.mrf.mxu3 }
 0x24d   :  { %v2027_v48 = vadd.f32 %v1102_v11, %v991_v30 }
 0x24e   :  { %v1182_v12 = vsel %vm1175_vm1, %v2001_v23, 0.0  ;;  %v1179_v55 = vsel %vm1175_vm1, %v2010_v52, 0.0 }
 0x24f   :  { %1204 = vadd.xlane.f32.xlu2 %v1182_v12  ;;  %1214 = vadd.xlane.f32.xlu0 %v1187_v27  ;;  %v1191_v49 = vsel %vm1175_vm1, %v2027_v48, 0.0 }
 0x253   :  { %v1082_v53 = vpop.f32.mrf.mxu1 }
 0x254   :  { %v2014_v51 = vadd.f32 %v1082_v53, %v983_v43 }
 0x256   :  { %v1183_v4 = vsel %vm1175_vm1, %v2014_v51, 0.0 }
 0x257   :  { %1206 = vadd.xlane.f32.xlu1 %v1183_v4  ;;  %1198 = vadd.xlane.f32.xlu2 %v1179_v55 }
 0x258   :  { %1220 = vadd.xlane.f32.xlu0 %v1190_v17 }
 0x25f   :  { %1218 = vadd.xlane.f32.xlu1 %v1189_v59  ;;  %1222 = vadd.xlane.f32.xlu2 %v1191_v49 }
 0x29f   :  { %v1209_v50 = vpop.xlane.xlu0 %1208 }
 0x2a0   :  { %1470 = vrcp.f32 %v1209_v50 }
 0x2a3   :  { %v1193_v31 = vpop.xlane.xlu2 %1192 }
 0x2a4   :  { %1472 = vrcp.f32 %v1193_v31 }
 0x2a6   :  { %v1471_v45 = vpop.eup %1470 }
 0x2a7   :  { %v1248_v47 = vmul.f32 %v1471_v45, %v1954_v18 }
 0x2a9   :  { %v1268_v57 = vadd.f32 %v2038_v42, %v1248_v47 }
 0x2aa   :  { %v1473_v60 = vpop.eup %1472  ;;  %v1201_v21 = vpop.xlane.xlu1 %1200 }
 0x2ab   :  { %1284 = vst [vmem:[%s2125_s5 + $0x40] sm:$0xff] %v1268_v57  ;;  %v1240_v20 = vmul.f32 %v1473_v60, %v1959_v14  ;;  %1474 = vrcp.f32 %v1201_v21  ;;  %v1217_v36 = vpop.xlane.xlu2 %1216 }
 0x2ac   :  { %1476 = vrcp.f32 %v1217_v36 }
 0x2ad   :  { %v1260_v56 = vadd.f32 %v2038_v42, %v1240_v20 }
 0x2af   :  { %1276 = vst [vmem:[%s2125_s5] sm:$0xff] %v1260_v56 }
 0x2b1   :  { %v1475_v18 = vpop.eup %1474 }
 0x2b2   :  { %v1477_v58 = vpop.eup %1476  ;;  %v1244_v40 = vmul.f32 %v1475_v18, %v1966_v26  ;;  %v1195_v6 = vpop.xlane.xlu1 %1194 }
 0x2b3   :  { %v1203_v2 = vpop.xlane.xlu0 %1202  ;;  %v1252_v29 = vmul.f32 %v1477_v58, %v1964_v39  ;;  %1478 = vrcp.f32 %v1195_v6  ;;  %v1211_v32 = vpop.xlane.xlu2 %1210 }
 0x2b4   :  { %v1264_v14 = vadd.f32 %v2038_v42, %v1244_v40  ;;  %1480 = vrcp.f32 %v1211_v32 }
 0x2b5   :  { %v1272_v38 = vadd.f32 %v2038_v42, %v1252_v29  ;;  %1482 = vrcp.f32 %v1203_v2 }
 0x2b6   :  { %1280 = vst [vmem:[%s2125_s5 + $0x20] sm:$0xff] %v1264_v14 }
 0x2b7   :  { %1288 = vst [vmem:[%s2125_s5 + $0x60] sm:$0xff] %v1272_v38 }
 0x2b9   :  { %v1479_v26 = vpop.eup %1478 }
 0x2ba   :  { %v1481_v16 = vpop.eup %1480  ;;  %v1241_v39 = vmul.f32 %v1479_v26, %v1974_v22  ;;  %v1213_v3 = vpop.xlane.xlu1 %1212 }
 0x2bb   :  { %v1483_v5 = vpop.eup %1482  ;;  %v1249_v15 = vmul.f32 %v1481_v16, %v1976_v35  ;;  %1484 = vrcp.f32 %v1213_v3  ;;  %v1197_v10 = vpop.xlane.xlu0 %1196 }
 0x2bc   :  { %v1261_v7 = vadd.f32 %v2038_v42, %v1241_v39  ;;  %v1245_v54 = vmul.f32 %v1483_v5, %v1978_v46  ;;  %1486 = vrcp.f32 %v1197_v10 }
 0x2bd   :  { %v1269_v41 = vadd.f32 %v2038_v42, %v1249_v15 }
 0x2be   :  { %1277 = vst [vmem:[%s2125_s5 + $0x8] sm:$0xff] %v1261_v7  ;;  %v1265_v13 = vadd.f32 %v2038_v42, %v1245_v54 }
 0x2bf   :  { %1285 = vst [vmem:[%s2125_s5 + $0x48] sm:$0xff] %v1269_v41 }
 0x2c0   :  { %1281 = vst [vmem:[%s2125_s5 + $0x28] sm:$0xff] %v1265_v13 }
 0x2c1   :  { %v1485_v22 = vpop.eup %1484 }
 0x2c2   :  { %v1487_v35 = vpop.eup %1486  ;;  %v1250_v46 = vmul.f32 %v1485_v22, %v1989_v1  ;;  %v1205_v37 = vpop.xlane.xlu2 %1204 }
 0x2c3   :  { %v1242_v8 = vmul.f32 %v1487_v35, %v1991_v63  ;;  %1488 = vrcp.f32 %v1205_v37  ;;  %v1215_v24 = vpop.xlane.xlu0 %1214 }
 0x2c4   :  { %v1270_v25 = vadd.f32 %v2038_v42, %v1250_v46  ;;  %1490 = vrcp.f32 %v1215_v24 }
 0x2c5   :  { %v1262_v12 = vadd.f32 %v2038_v42, %v1242_v8 }
 0x2c6   :  { %1286 = vst [vmem:[%s2125_s5 + $0x50] sm:$0xff] %v1270_v25 }
 0x2c7   :  { %1278 = vst [vmem:[%s2125_s5 + $0x10] sm:$0xff] %v1262_v12 }
 0x2c9   :  { %v1489_v34 = vpop.eup %1488 }
 0x2ca   :  { %v1491_v1 = vpop.eup %1490  ;;  %v1246_v27 = vmul.f32 %v1489_v34, %v2001_v23  ;;  %v1207_v63 = vpop.xlane.xlu1 %1206 }
 0x2cb   :  { %v1199_v61 = vpop.xlane.xlu2 %1198  ;;  %v1251_v33 = vmul.f32 %v1491_v1, %v1999_v19  ;;  %1492 = vrcp.f32 %v1207_v63  ;;  %v1221_v43 = vpop.xlane.xlu0 %1220 }
 0x2cc   :  { %v1266_v53 = vadd.f32 %v2038_v42, %v1246_v27  ;;  %1494 = vrcp.f32 %v1199_v61 }
 0x2cd   :  { %v1271_v0 = vadd.f32 %v2038_v42, %v1251_v33  ;;  %1496 = vrcp.f32 %v1221_v43 }
 0x2ce   :  { %1282 = vst [vmem:[%s2125_s5 + $0x30] sm:$0xff] %v1266_v53 }
 0x2cf   :  { %1287 = vst [vmem:[%s2125_s5 + $0x58] sm:$0xff] %v1271_v0 }
 0x2d1   :  { %v1493_v23 = vpop.eup %1492 }
 0x2d2   :  { %v1495_v28 = vpop.eup %1494  ;;  %v1247_v19 = vmul.f32 %v1493_v23, %v2014_v51  ;;  %v1219_v4 = vpop.xlane.xlu1 %1218 }
 0x2d3   :  { %v1223_v55 = vpop.xlane.xlu2 %1222  ;;  %v1497_v11 = vpop.eup %1496  ;;  %v1243_v17 = vmul.f32 %v1495_v28, %v2010_v52  ;;  %1498 = vrcp.f32 %v1219_v4 }
 0x2d4   :  { %v1267_v9 = vadd.f32 %v2038_v42, %v1247_v19  ;;  %v1254_v30 = vmul.f32 %v1497_v11, %v2012_v62  ;;  %1500 = vrcp.f32 %v1223_v55 }
 0x2d5   :  { %v1263_v59 = vadd.f32 %v2038_v42, %v1243_v17 }
 0x2d6   :  { %1283 = vst [vmem:[%s2125_s5 + $0x38] sm:$0xff] %v1267_v9  ;;  %v1274_v49 = vadd.f32 %v2038_v42, %v1254_v30 }
 0x2d7   :  { %1279 = vst [vmem:[%s2125_s5 + $0x18] sm:$0xff] %v1263_v59 }
 0x2d8   :  { %1290 = vst [vmem:[%s2125_s5 + $0x70] sm:$0xff] %v1274_v49 }
 0x2d9   :  { %v1499_v52 = vpop.eup %1498 }
 0x2da   :  { %v1501_v51 = vpop.eup %1500  ;;  %v1253_v62 = vmul.f32 %v1499_v52, %v2025_v44 }
 0x2db   :  { %v1255_v50 = vmul.f32 %v1501_v51, %v2027_v48 }
 0x2dc   :  { %v1273_v31 = vadd.f32 %v2038_v42, %v1253_v62 }
 0x2dd   :  { %v1275_v45 = vadd.f32 %v2038_v42, %v1255_v50 }
 0x2de   :  { %1289 = vst [vmem:[%s2125_s5 + $0x68] sm:$0xff] %v1273_v31 }
 0x2df   :  { %1291 = vst [vmem:[%s2125_s5 + $0x78] sm:$0xff] %v1275_v45 }

</bundles_post_ra>
